<compile_context>
chip_gen: v6e
topology: v6e:2x2x1
jax: 0.10.0
libtpu: 0.0.40
codegen_flags: <defaults>
</compile_context>

<pallas_src>
import numpy as np
import jax
import jax.numpy as jnp
from jax.experimental import pallas as pl
from jax.experimental.pallas import tpu as pltpu

LANE = 128
OUT_H = OUT_W = 28
OUT_ELEMS = OUT_H * OUT_W  # 784


def _round_up(x, m):
    return (x + m - 1) // m * m


# ---------------------------------------------------------------------------
# Parameter / operator-matrix setup (plain numpy glue, runs once at init)
# ---------------------------------------------------------------------------
def _convt_dense_matrix(w, h_in, w_in, stride, padding, h_out, w_out):
    """Dense M such that flatten_NCHW(conv_transpose(x)) = flatten(x) @ M.

    w: (C_in, C_out, kH, kW)  -- PyTorch ConvTranspose2d weight layout.
    """
    c_in, c_out, kh, kw = w.shape
    m = np.zeros((c_in * h_in * w_in, c_out * h_out * w_out), dtype=np.float32)
    for c in range(c_in):
        for i in range(h_in):
            for j in range(w_in):
                row = c * h_in * w_in + i * w_in + j
                for o in range(c_out):
                    for ki in range(kh):
                        for kj in range(kw):
                            oi = i * stride + ki - padding
                            oj = j * stride + kj - padding
                            if 0 <= oi < h_out and 0 <= oj < w_out:
                                col = o * h_out * w_out + oi * w_out + oj
                                m[row, col] += w[c, o, ki, kj]
    return m


def _convt_ref(x, w, b, stride, padding, h_out, w_out):
    """Loop reference for PyTorch ConvTranspose2d semantics (NCHW)."""
    n, c_in, h_in, w_in = x.shape
    _, c_out, kh, kw = w.shape
    out = np.zeros((n, c_out, h_out, w_out), dtype=np.float32)
    for nb in range(n):
        for c in range(c_in):
            for i in range(h_in):
                for j in range(w_in):
                    for o in range(c_out):
                        for ki in range(kh):
                            for kj in range(kw):
                                oi = i * stride + ki - padding
                                oj = j * stride + kj - padding
                                if 0 <= oi < h_out and 0 <= oj < w_out:
                                    out[nb, o, oi, oj] += x[nb, c, i, j] * w[c, o, ki, kj]
    return out + b[None, :, None, None]


def build_flat_params(layer_cfg, weights, biases, in_width):
    """Zero-padded (to LANE multiples) bf16 operator matrices + f32 bias rows."""
    flat_params = []
    k_prev_pad = in_width  # 16; equals full array dim so no lane padding needed
    for (ci, co, k, s, p, hin, hout), w, b in zip(layer_cfg, weights, biases):
        m = _convt_dense_matrix(w, hin, hin, s, p, hout, hout)
        rows, cols = m.shape
        cols_pad = _round_up(cols, LANE)
        m_pad = np.zeros((k_prev_pad, cols_pad), dtype=np.float32)
        m_pad[:rows, :cols] = m
        b_pad = np.zeros((1, cols_pad), dtype=np.float32)
        b_pad[0, :cols] = np.repeat(b, hout * hout)
        flat_params.append(jnp.asarray(m_pad, dtype=jnp.bfloat16))
        flat_params.append(jnp.asarray(b_pad, dtype=jnp.float32))
        k_prev_pad = cols_pad
    return flat_params


# ---------------------------------------------------------------------------
# Pallas kernel: 4 matmuls (bf16 in, f32 acc) + bias + ReLU, final tanh
# ---------------------------------------------------------------------------
def reconstructor_kernel(x_ref,
                         m1_ref, b1_ref, m2_ref, b2_ref,
                         m3_ref, b3_ref, m4_ref, b4_ref,
                         out_ref):
    h = x_ref[...].astype(jnp.bfloat16)
    h = jnp.dot(h, m1_ref[...], preferred_element_type=jnp.float32) + b1_ref[...]
    h = jnp.maximum(h, 0.0)
    h = jnp.dot(h.astype(jnp.bfloat16), m2_ref[...],
                preferred_element_type=jnp.float32) + b2_ref[...]
    h = jnp.maximum(h, 0.0)
    h = jnp.dot(h.astype(jnp.bfloat16), m3_ref[...],
                preferred_element_type=jnp.float32) + b3_ref[...]
    h = jnp.maximum(h, 0.0)
    h = jnp.dot(h.astype(jnp.bfloat16), m4_ref[...],
                preferred_element_type=jnp.float32) + b4_ref[...]
    # Module applies ReLU on the last conv, then tanh.
    out_ref[...] = jnp.tanh(jnp.maximum(h, 0.0))


def reconstructor2_forward(x_nchw, flat_params, *, tm=256):
    """x_nchw: (N, in_features, 2, 2) float32 -> (N, 1, 28, 28) float32."""
    n, c_in, h_in, w_in = x_nchw.shape
    k0 = c_in * h_in * w_in
    x_flat = x_nchw.reshape(n, k0).astype(jnp.float32)

    w_out_pad = flat_params[-1].shape[-1]  # padded output width (multiple of 128)

    # Batch tile: multiple of 8 (sublane), capped at tm; pad N up to a tile multiple.
    tile_m = min(tm, _round_up(max(n, 1), 8))
    n_pad = _round_up(n, tile_m)
    if n_pad != n:
        x_flat = jnp.pad(x_flat, ((0, n_pad - n), (0, 0)))

    grid = (n_pad // tile_m,)

    # Operator matrices / biases: constant block index -> resident in VMEM.
    param_specs = [pl.BlockSpec(p.shape, lambda i: (0, 0)) for p in flat_params]

    out_flat = pl.pallas_call(
        reconstructor_kernel,
        out_shape=jax.ShapeDtypeStruct((n_pad, w_out_pad), jnp.float32),
        grid=grid,
        in_specs=[pl.BlockSpec((tile_m, k0), lambda i: (i, 0))] + param_specs,
        out_specs=pl.BlockSpec((tile_m, w_out_pad), lambda i: (i, 0)),
        compiler_params=pltpu.CompilerParams(
            dimension_semantics=("parallel",)),
    )(x_flat, *flat_params)

    return out_flat[:n, :OUT_ELEMS].reshape(n, 1, OUT_H, OUT_W)


# ---------------------------------------------------------------------------
if __name__ == "__main__":
    in_features = 4
    batch = 2

    # Layer configs: (C_in, C_out, k, stride, pad, H_in, H_out)
    layer_cfg = [
        (in_features, 16, 2, 2, 0, 2, 4),
        (16, 8, 3, 2, 1, 4, 7),
        (8, 4, 2, 2, 0, 7, 14),
        (4, 1, 2, 2, 0, 14, 28),
    ]

    key = jax.random.PRNGKey(0)
    keys = jax.random.split(key, 2 * len(layer_cfg) + 2)

    weights, biases = [], []
    for li, (ci, co, k, s, p, hin, hout) in enumerate(layer_cfg):
        bound = 1.0 / np.sqrt(ci * k * k)
        w = jax.random.uniform(keys[2 * li], (ci, co, k, k),
                               minval=-bound, maxval=bound, dtype=jnp.float32)
        b = jax.random.uniform(keys[2 * li + 1], (co,),
                               minval=-bound, maxval=bound, dtype=jnp.float32)
        weights.append(np.asarray(w))
        biases.append(np.asarray(b))

    flat_params = build_flat_params(layer_cfg, weights, biases,
                                    in_width=in_features * 2 * 2)

    # --- small example (batch=2), checked against a ConvTranspose2d loop ref ---
    x = jax.random.normal(keys[-2], (batch, in_features, 2, 2), dtype=jnp.float32)
    out = jax.block_until_ready(reconstructor2_forward(x, flat_params))
    assert out.shape == (batch, 1, 28, 28), out.shape

    h_ref = np.asarray(x)
    for (ci, co, k, s, p, hin, hout), w, b in zip(layer_cfg, weights, biases):
        h_ref = np.maximum(_convt_ref(h_ref, w, b, s, p, hout, hout), 0.0)
    ref = np.tanh(h_ref)
    # bf16 weights/activations with f32 accumulation -> relaxed tolerance.
    np.testing.assert_allclose(np.asarray(out), ref, rtol=3e-2, atol=3e-2)

    # --- larger batch to exercise the batch grid / pipelining (2 grid steps) ---
    big_n = 512
    x_big = jax.random.normal(keys[-1], (big_n, in_features, 2, 2), dtype=jnp.float32)
    out_big = jax.block_until_ready(reconstructor2_forward(x_big, flat_params))
    assert out_big.shape == (big_n, 1, 28, 28), out_big.shape

    # f32 dense-matrix reference chain (unpadded operators) for the big batch.
    h_big = np.asarray(x_big).reshape(big_n, -1)
    for (ci, co, k, s, p, hin, hout), w, b in zip(layer_cfg, weights, biases):
        m = _convt_dense_matrix(w, hin, hin, s, p, hout, hout)
        h_big = np.maximum(h_big @ m + np.repeat(b, hout * hout)[None, :], 0.0)
    ref_big = np.tanh(h_big).reshape(big_n, 1, 28, 28)
    np.testing.assert_allclose(np.asarray(out_big), ref_big, rtol=3e-2, atol=3e-2)

    print("KERNEL_OK")
</pallas_src>

<mosaic_0001>
module attributes {stable_mosaic.version = 11 : i64} {
  func.func @reconstructor_kernel(%arg0: i32, %arg1: memref<8x16xf32, #tpu.memory_space<vmem>>, %arg2: memref<16x256xbf16, #tpu.memory_space<vmem>>, %arg3: memref<1x256xf32, #tpu.memory_space<vmem>>, %arg4: memref<256x512xbf16, #tpu.memory_space<vmem>>, %arg5: memref<1x512xf32, #tpu.memory_space<vmem>>, %arg6: memref<512x896xbf16, #tpu.memory_space<vmem>>, %arg7: memref<1x896xf32, #tpu.memory_space<vmem>>, %arg8: memref<896x896xbf16, #tpu.memory_space<vmem>>, %arg9: memref<1x896xf32, #tpu.memory_space<vmem>>, %arg10: memref<8x896xf32, #tpu.memory_space<vmem>>) attributes {dimension_semantics = [#tpu.dimension_semantics<parallel>], iteration_bounds = array<i64: 1>, scalar_prefetch = 0 : i64, scratch_operands = 0 : i64, tpu.core_type = #tpu.core_type<tc>, window_params = [{transform_indices = @transform_0, window_bounds = array<i64: 8, 16>}, {pipeline_mode = #tpu.pipeline_mode<synchronous>, transform_indices = @transform_1, window_bounds = array<i64: 16, 256>}, {pipeline_mode = #tpu.pipeline_mode<synchronous>, transform_indices = @transform_2, window_bounds = array<i64: 1, 256>}, {pipeline_mode = #tpu.pipeline_mode<synchronous>, transform_indices = @transform_3, window_bounds = array<i64: 256, 512>}, {pipeline_mode = #tpu.pipeline_mode<synchronous>, transform_indices = @transform_4, window_bounds = array<i64: 1, 512>}, {pipeline_mode = #tpu.pipeline_mode<synchronous>, transform_indices = @transform_5, window_bounds = array<i64: 512, 896>}, {pipeline_mode = #tpu.pipeline_mode<synchronous>, transform_indices = @transform_6, window_bounds = array<i64: 1, 896>}, {pipeline_mode = #tpu.pipeline_mode<synchronous>, transform_indices = @transform_7, window_bounds = array<i64: 896, 896>}, {pipeline_mode = #tpu.pipeline_mode<synchronous>, transform_indices = @transform_8, window_bounds = array<i64: 1, 896>}, {transform_indices = @transform_9, window_bounds = array<i64: 8, 896>}]} {
    %c0 = arith.constant 0 : index
    %c0_0 = arith.constant 0 : index
    %0 = vector.load %arg1[%c0, %c0_0] : memref<8x16xf32, #tpu.memory_space<vmem>>, vector<8x16xf32>
    %1 = arith.truncf %0 : vector<8x16xf32> to vector<8x16xbf16>
    %c0_1 = arith.constant 0 : index
    %c0_2 = arith.constant 0 : index
    %2 = vector.load %arg2[%c0_1, %c0_2] : memref<16x256xbf16, #tpu.memory_space<vmem>>, vector<16x256xbf16>
    %cst = arith.constant dense<0.000000e+00> : vector<8x256xf32>
    %3 = tpu.matmul %1, %2, %cst {dimension_numbers = #tpu.dot_dimension_numbers<[1], [0], [0], [1], [0, 0, 1, 1], [], []>} : vector<8x16xbf16>, vector<16x256xbf16>, vector<8x256xf32> -> vector<8x256xf32>
    %c0_3 = arith.constant 0 : index
    %c0_4 = arith.constant 0 : index
    %4 = vector.load %arg3[%c0_3, %c0_4] : memref<1x256xf32, #tpu.memory_space<vmem>>, vector<1x256xf32>
    %5 = vector.broadcast %4 : vector<1x256xf32> to vector<8x256xf32>
    %6 = arith.addf %3, %5 : vector<8x256xf32>
    %cst_5 = arith.constant 0.000000e+00 : f32
    %7 = vector.broadcast %cst_5 : f32 to vector<8x256xf32>
    %8 = arith.maximumf %6, %7 : vector<8x256xf32>
    %9 = arith.truncf %8 : vector<8x256xf32> to vector<8x256xbf16>
    %c0_6 = arith.constant 0 : index
    %c0_7 = arith.constant 0 : index
    %10 = vector.load %arg4[%c0_6, %c0_7] : memref<256x512xbf16, #tpu.memory_space<vmem>>, vector<256x512xbf16>
    %cst_8 = arith.constant dense<0.000000e+00> : vector<8x512xf32>
    %11 = tpu.matmul %9, %10, %cst_8 {dimension_numbers = #tpu.dot_dimension_numbers<[1], [0], [0], [1], [0, 0, 1, 1], [], []>} : vector<8x256xbf16>, vector<256x512xbf16>, vector<8x512xf32> -> vector<8x512xf32>
    %c0_9 = arith.constant 0 : index
    %c0_10 = arith.constant 0 : index
    %12 = vector.load %arg5[%c0_9, %c0_10] : memref<1x512xf32, #tpu.memory_space<vmem>>, vector<1x512xf32>
    %13 = vector.broadcast %12 : vector<1x512xf32> to vector<8x512xf32>
    %14 = arith.addf %11, %13 : vector<8x512xf32>
    %cst_11 = arith.constant 0.000000e+00 : f32
    %15 = vector.broadcast %cst_11 : f32 to vector<8x512xf32>
    %16 = arith.maximumf %14, %15 : vector<8x512xf32>
    %17 = arith.truncf %16 : vector<8x512xf32> to vector<8x512xbf16>
    %c0_12 = arith.constant 0 : index
    %c0_13 = arith.constant 0 : index
    %18 = vector.load %arg6[%c0_12, %c0_13] : memref<512x896xbf16, #tpu.memory_space<vmem>>, vector<512x896xbf16>
    %cst_14 = arith.constant dense<0.000000e+00> : vector<8x896xf32>
    %19 = tpu.matmul %17, %18, %cst_14 {dimension_numbers = #tpu.dot_dimension_numbers<[1], [0], [0], [1], [0, 0, 1, 1], [], []>} : vector<8x512xbf16>, vector<512x896xbf16>, vector<8x896xf32> -> vector<8x896xf32>
    %c0_15 = arith.constant 0 : index
    %c0_16 = arith.constant 0 : index
    %20 = vector.load %arg7[%c0_15, %c0_16] : memref<1x896xf32, #tpu.memory_space<vmem>>, vector<1x896xf32>
    %21 = vector.broadcast %20 : vector<1x896xf32> to vector<8x896xf32>
    %22 = arith.addf %19, %21 : vector<8x896xf32>
    %cst_17 = arith.constant 0.000000e+00 : f32
    %23 = vector.broadcast %cst_17 : f32 to vector<8x896xf32>
    %24 = arith.maximumf %22, %23 : vector<8x896xf32>
    %25 = arith.truncf %24 : vector<8x896xf32> to vector<8x896xbf16>
    %c0_18 = arith.constant 0 : index
    %c0_19 = arith.constant 0 : index
    %26 = vector.load %arg8[%c0_18, %c0_19] : memref<896x896xbf16, #tpu.memory_space<vmem>>, vector<896x896xbf16>
    %cst_20 = arith.constant dense<0.000000e+00> : vector<8x896xf32>
    %27 = tpu.matmul %25, %26, %cst_20 {dimension_numbers = #tpu.dot_dimension_numbers<[1], [0], [0], [1], [0, 0, 1, 1], [], []>} : vector<8x896xbf16>, vector<896x896xbf16>, vector<8x896xf32> -> vector<8x896xf32>
    %c0_21 = arith.constant 0 : index
    %c0_22 = arith.constant 0 : index
    %28 = vector.load %arg9[%c0_21, %c0_22] : memref<1x896xf32, #tpu.memory_space<vmem>>, vector<1x896xf32>
    %29 = vector.broadcast %28 : vector<1x896xf32> to vector<8x896xf32>
    %30 = arith.addf %27, %29 : vector<8x896xf32>
    %cst_23 = arith.constant 0.000000e+00 : f32
    %31 = vector.broadcast %cst_23 : f32 to vector<8x896xf32>
    %32 = arith.maximumf %30, %31 : vector<8x896xf32>
    %33 = math.tanh %32 : vector<8x896xf32>
    %c0_24 = arith.constant 0 : index
    %c0_25 = arith.constant 0 : index
    %34 = vector.load %arg10[%c0_24, %c0_25] : memref<8x896xf32, #tpu.memory_space<vmem>>, vector<8x896xf32>
    tpu.vector_store %arg10[%c0_24, %c0_25], %33 {strides = array<i32>} : memref<8x896xf32, #tpu.memory_space<vmem>>, vector<8x896xf32>,
    return
  }
  func.func @transform_0(%arg0: i32) -> (i32, i32) {
    %c0_i32 = arith.constant 0 : i32
    %c0_i32_0 = arith.constant 0 : i32
    return %arg0, %c0_i32 : i32, i32
  }
  func.func @transform_1(%arg0: i32) -> (i32, i32) {
    %c0_i32 = arith.constant 0 : i32
    %c0_i32_0 = arith.constant 0 : i32
    %c0_i32_1 = arith.constant 0 : i32
    return %c0_i32, %c0_i32_0 : i32, i32
  }
  func.func @transform_2(%arg0: i32) -> (i32, i32) {
    %c0_i32 = arith.constant 0 : i32
    %c0_i32_0 = arith.constant 0 : i32
    %c0_i32_1 = arith.constant 0 : i32
    return %c0_i32, %c0_i32_0 : i32, i32
  }
  func.func @transform_3(%arg0: i32) -> (i32, i32) {
    %c0_i32 = arith.constant 0 : i32
    %c0_i32_0 = arith.constant 0 : i32
    %c0_i32_1 = arith.constant 0 : i32
    return %c0_i32, %c0_i32_0 : i32, i32
  }
  func.func @transform_4(%arg0: i32) -> (i32, i32) {
    %c0_i32 = arith.constant 0 : i32
    %c0_i32_0 = arith.constant 0 : i32
    %c0_i32_1 = arith.constant 0 : i32
    return %c0_i32, %c0_i32_0 : i32, i32
  }
  func.func @transform_5(%arg0: i32) -> (i32, i32) {
    %c0_i32 = arith.constant 0 : i32
    %c0_i32_0 = arith.constant 0 : i32
    %c0_i32_1 = arith.constant 0 : i32
    return %c0_i32, %c0_i32_0 : i32, i32
  }
  func.func @transform_6(%arg0: i32) -> (i32, i32) {
    %c0_i32 = arith.constant 0 : i32
    %c0_i32_0 = arith.constant 0 : i32
    %c0_i32_1 = arith.constant 0 : i32
    return %c0_i32, %c0_i32_0 : i32, i32
  }
  func.func @transform_7(%arg0: i32) -> (i32, i32) {
    %c0_i32 = arith.constant 0 : i32
    %c0_i32_0 = arith.constant 0 : i32
    %c0_i32_1 = arith.constant 0 : i32
    return %c0_i32, %c0_i32_0 : i32, i32
  }
  func.func @transform_8(%arg0: i32) -> (i32, i32) {
    %c0_i32 = arith.constant 0 : i32
    %c0_i32_0 = arith.constant 0 : i32
    %c0_i32_1 = arith.constant 0 : i32
    return %c0_i32, %c0_i32_0 : i32, i32
  }
  func.func @transform_9(%arg0: i32) -> (i32, i32) {
    %c0_i32 = arith.constant 0 : i32
    %c0_i32_0 = arith.constant 0 : i32
    return %arg0, %c0_i32 : i32, i32
  }
}

</mosaic_0001>

<bundles_post_ra>
// kernel: tpu_custom_call.1
= control target key start
LH: loop header
LB: loop body
LE: loop exit
PB: predicated region body
PF: predicated region fallthrough
CT: control target
= control target key end

     0   :  { %14 = vsyncpa [#allocation3], 0  ;;  %s7995_s0 = inlined_call_operand.hbm [shape: f32[8,16], index: 0, kind: input, shape index: {}]   ;;  %s7996_s1 = inlined_call_operand.hbm [shape: bf16[16,256], index: 1, kind: input, shape index: {}]   ;;  %s7997_s2 = inlined_call_operand.hbm [shape: f32[1,256], index: 2, kind: input, shape index: {}]   ;;  %s7998_s3 = inlined_call_operand.hbm [shape: bf16[256,512], index: 3, kind: input, shape index: {}]   ;;  %s7999_s4 = inlined_call_operand.hbm [shape: f32[1,512], index: 4, kind: input, shape index: {}]   ;;  %s8000_s5 = inlined_call_operand.hbm [shape: bf16[512,896], index: 5, kind: input, shape index: {}]   ;;  %s8001_s6 = inlined_call_operand.hbm [shape: f32[1,896], index: 6, kind: input, shape index: {}]   ;;  %s8002_s7 = inlined_call_operand.hbm [shape: bf16[896,896], index: 7, kind: input, shape index: {}]   ;;  %s8003_s8 = inlined_call_operand.hbm [shape: f32[1,896], index: 8, kind: input, shape index: {}]   ;;  %s8004_s9 = inlined_call_operand.hbm [shape: f32[8,896], index: 9, kind: output, shape index: {}]  }
   0x1   :  { %15 = vsyncpa [#allocation6], 0 }
   0x2   :  { %16 = vsyncpa [#allocation9], 0 }
   0x3   :  { %17 = vsyncpa [#allocation12], 0 }
   0x4   :  { %18 = vsyncpa [#allocation15], 0 }
   0x5   :  { %19 = vsyncpa [#allocation4], 0  ;;  %s7741_s30 = smov [#allocation5]  }
   0x6   :  { %s35_s10 = sshll.u32 %s7741_s30, 4  ;;  %s36_s10 = int_to_ptr.vmem [resolvable:$true] %s35_s10 }
   0x7   :  { %s7537_s11 = scalar_lea.vmem %s36_s10, 256  ;;  %p7542_p1 = scmp.lt.s32.totalorder %s36_s10, %s36_s10 }
   0x8   :  { %p7538_p0 = scmp.ne.s32.totalorder %s36_s10, %s7537_s11  ;;  %p7543_p2 = scmp.lt.s32.totalorder %s7537_s11, %s7537_s11 }
   0xa   :  { %p7544_p3 = por %p7543_p2, %p7542_p1 }
   0xc   :  { %p7545_p4 = pnand %p7544_p3, %p7538_p0 }
   0xe   :  { %7548 = shalt.err (!%p7545_p4)
}
   0xf   :  { %s7742_s12 = smov 128   ;;  %s7743_s13 = smov 8  }
  0x10   :  { %41 = dma.hbm_to_vmem [thread:$0]  %s7996_s1, 256, %s36_s10, [#allocation6], %s7742_s12, %s7742_s12, %s7743_s13  }
  0x11   :  { %s7744_s16 = smov [#allocation8]  }
  0x12   :  { %s57_s17 = sshll.u32 %s7744_s16, 4  ;;  %s58_s17 = int_to_ptr.vmem [resolvable:$true] %s57_s17 }
  0x13   :  { %s7557_s18 = scalar_lea.vmem %s58_s17, 8192  ;;  %p7562_p6 = scmp.lt.s32.totalorder %s58_s17, %s58_s17 }
  0x14   :  { %p7558_p5 = scmp.ne.s32.totalorder %s58_s17, %s7557_s18  ;;  %p7563_p7 = scmp.lt.s32.totalorder %s7557_s18, %s7557_s18 }
  0x16   :  { %p7564_p8 = por %p7563_p7, %p7562_p6 }
  0x18   :  { %p7565_p9 = pnand %p7564_p8, %p7558_p5 }
  0x1a   :  { %7568 = shalt.err (!%p7565_p9)
}
  0x1b   :  { %s7745_s19 = smov 256   ;;  %s7746_s20 = smov 16  }
  0x1c   :  { %63 = dma.hbm_to_vmem [thread:$0]  %s7998_s3, 8192, %s58_s17, [#allocation9], %s7745_s19, %s7745_s19, %s7746_s20  }
  0x1d   :  { %s7747_s23 = smov [#allocation11]  }
  0x1e   :  { %s79_s24 = sshll.u32 %s7747_s23, 4  ;;  %s80_s24 = int_to_ptr.vmem [resolvable:$true] %s79_s24 }
  0x1f   :  { %s7577_s1 = scalar_lea.vmem %s80_s24, 28672  ;;  %p7582_p11 = scmp.lt.s32.totalorder %s80_s24, %s80_s24 }
  0x20   :  { %p7578_p10 = scmp.ne.s32.totalorder %s80_s24, %s7577_s1  ;;  %p7583_p12 = scmp.lt.s32.totalorder %s7577_s1, %s7577_s1 }
  0x22   :  { %p7584_p13 = por %p7583_p12, %p7582_p11 }
  0x24   :  { %p7585_p0 = pnand %p7584_p13, %p7578_p10 }
  0x26   :  { %7588 = shalt.err (!%p7585_p0)
}
  0x27   :  { %s7748_s25 = smov 448   ;;  %s7749_s26 = smov 28  }
  0x28   :  { %85 = dma.hbm_to_vmem [thread:$0]  %s8000_s5, 28672, %s80_s24, [#allocation12], %s7748_s25, %s7748_s25, %s7749_s26  }
  0x29   :  { %s7750_s29 = smov [#allocation14]   ;;  %s7751_s3 = smov [#allocation2]  }
  0x2a   :  { %s101_s30 = sshll.u32 %s7750_s29, 4  ;;  %s26_s10 = sshll.u32 %s7751_s3, 4  ;;  %s102_s30 = int_to_ptr.vmem [resolvable:$true] %s101_s30  ;;  %s27_s10 = int_to_ptr.vmem [resolvable:$true] %s26_s10 }
  0x2b   :  { %s7597_s11 = scalar_lea.vmem %s102_s30, 50176  ;;  %p7602_p2 = scmp.lt.s32.totalorder %s102_s30, %s102_s30 }
  0x2c   :  { %p7598_p1 = scmp.ne.s32.totalorder %s102_s30, %s7597_s11  ;;  %p7603_p3 = scmp.lt.s32.totalorder %s7597_s11, %s7597_s11 }
  0x2e   :  { %p7604_p4 = por %p7603_p3, %p7602_p2 }
  0x30   :  { %p7605_p5 = pnand %p7604_p4, %p7598_p1 }
  0x32   :  { %7608 = shalt.err (!%p7605_p5)
}
  0x33   :  { %107 = dma.hbm_to_vmem [thread:$0]  %s8002_s7, 50176, %s102_s30, [#allocation15], %s7748_s25, %s7748_s25, %s7749_s26  }
  0x34   :  { %s7617_s14 = scalar_lea.vmem %s27_s10, 128  ;;  %p7622_p7 = scmp.lt.s32.totalorder %s27_s10, %s27_s10 }
  0x35   :  { %p7618_p6 = scmp.ne.s32.totalorder %s27_s10, %s7617_s14  ;;  %p7623_p8 = scmp.lt.s32.totalorder %s7617_s14, %s7617_s14 }
  0x37   :  { %p7624_p9 = por %p7623_p8, %p7622_p7 }
  0x39   :  { %p7625_p10 = pnand %p7624_p9, %p7618_p6 }
  0x3b   :  { %7628 = shalt.err (!%p7625_p10)
}
  0x3c   :  { %29 = dma.hbm_to_vmem [thread:$0]  %s7995_s0, 128, %s27_s10, [#allocation3]  }
  0x3d   :  { %s7752_s16 = smov [#allocation7]   ;;  %s7753_s18 = smov [#allocation10]  }
  0x3e   :  { %s48_s17 = sshll.u32 %s7752_s16, 4  ;;  %s70_s19 = sshll.u32 %s7753_s18, 4  ;;  %s49_s17 = int_to_ptr.vmem [resolvable:$true] %s48_s17  ;;  %s71_s19 = int_to_ptr.vmem [resolvable:$true] %s70_s19 }
  0x3f   :  { %s7637_s20 = scalar_lea.vmem %s49_s17, 32  ;;  %p7642_p12 = scmp.lt.s32.totalorder %s49_s17, %s49_s17 }
  0x40   :  { %p7638_p11 = scmp.ne.s32.totalorder %s49_s17, %s7637_s20  ;;  %p7643_p13 = scmp.lt.s32.totalorder %s7637_s20, %s7637_s20 }
  0x42   :  { %p7644_p0 = por %p7643_p13, %p7642_p12 }
  0x44   :  { %p7645_p1 = pnand %p7644_p0, %p7638_p11 }
  0x46   :  { %7648 = shalt.err (!%p7645_p1)
}
  0x47   :  { %51 = dma.hbm_to_vmem [thread:$0]  %s7997_s2, 32, %s49_s17, [#allocation6]  }
  0x48   :  { %s7657_s22 = scalar_lea.vmem %s71_s19, 64  ;;  %p7662_p3 = scmp.lt.s32.totalorder %s71_s19, %s71_s19 }
  0x49   :  { %p7658_p2 = scmp.ne.s32.totalorder %s71_s19, %s7657_s22  ;;  %p7663_p4 = scmp.lt.s32.totalorder %s7657_s22, %s7657_s22 }
  0x4b   :  { %p7664_p5 = por %p7663_p4, %p7662_p3 }
  0x4d   :  { %p7665_p6 = pnand %p7664_p5, %p7658_p2 }
  0x4f   :  { %7668 = shalt.err (!%p7665_p6)
}
  0x50   :  { %73 = dma.hbm_to_vmem [thread:$0]  %s7999_s4, 64, %s71_s19, [#allocation9]  }
  0x51   :  { %s7754_s24 = smov [#allocation13]   ;;  %s7755_s25 = smov [#allocation16]  }
  0x52   :  { %s92_s1 = sshll.u32 %s7754_s24, 4  ;;  %s114_s26 = sshll.u32 %s7755_s25, 4  ;;  %s93_s1 = int_to_ptr.vmem [resolvable:$true] %s92_s1  ;;  %s115_s26 = int_to_ptr.vmem [resolvable:$true] %s114_s26 }
  0x53   :  { %s7677_s27 = scalar_lea.vmem %s93_s1, 112  ;;  %s7681_s2 = scalar_lea.vmem %s93_s1, 128 }
  0x54   :  { %p7678_p7 = scmp.ne.s32.totalorder %s93_s1, %s7677_s27  ;;  %p7682_p8 = scmp.lt.s32.totalorder %s93_s1, %s93_s1 }
  0x55   :  { %p7683_p9 = scmp.lt.s32.totalorder %s7681_s2, %s7677_s27 }
  0x57   :  { %p7684_p10 = por %p7683_p9, %p7682_p8 }
  0x59   :  { %p7685_p11 = pnand %p7684_p10, %p7678_p7 }
  0x5b   :  { %7688 = shalt.err (!%p7685_p11)
}
  0x5c   :  { %95 = dma.hbm_to_vmem [thread:$0]  %s8001_s6, 112, %s93_s1, [#allocation12]  }
  0x5d   :  { %s7697_s30 = scalar_lea.vmem %s115_s26, 112  ;;  %s7701_s4 = scalar_lea.vmem %s115_s26, 128 }
  0x5e   :  { %p7698_p12 = scmp.ne.s32.totalorder %s115_s26, %s7697_s30  ;;  %p7702_p13 = scmp.lt.s32.totalorder %s115_s26, %s115_s26 }
  0x5f   :  { %p7703_p0 = scmp.lt.s32.totalorder %s7701_s4, %s7697_s30 }
  0x61   :  { %p7704_p1 = por %p7703_p0, %p7702_p13 }
  0x63   :  { %p7705_p2 = pnand %p7704_p1, %p7698_p12 }
  0x65   :  { %7708 = shalt.err (!%p7705_p2)
}
  0x66   :  { %117 = dma.hbm_to_vmem [thread:$0]  %s8003_s8, 112, %s115_s26, [#allocation15]  }
  0x67   :  { %7729 = dma.done.wait [#allocation3], 128  }
  0x68   :  { %7730 = vsyncadd [#allocation3], 4294967168 }
  0x69   :  { %7731 = dma.done.wait [#allocation6], 288  }
  0x6a   :  { %7732 = vsyncadd [#allocation6], 4294967008 }
  0x6b   :  { %7733 = dma.done.wait [#allocation9], 8256  }
  0x6c   :  { %7734 = vsyncadd [#allocation9], 4294959040 }
  0x6d   :  { %7735 = dma.done.wait [#allocation12], 28784  }
  0x6e   :  { %7736 = vsyncadd [#allocation12], 4294938512 }
  0x6f   :  { %7737 = dma.done.wait [#allocation15], 50288  }
  0x70   :  { %7738 = vsyncadd [#allocation15], 4294917008  ;;  %v7756_v0 = vmov 0   ;;  %v6536_v1 = vld [vmem:[#allocation5 + $0x4] ss:$8 sps:$4 sm:$0xff]   ;;  %v146_v3 = vld [vmem:[#allocation2] sm:$0xff] }
  0x71   :  { %208 = vmatprep.mubr.bf16.mxu0 %v7756_v0  ;;  %v6538_v2 = vld [vmem:[#allocation5] ss:$8 sps:$4 sm:$0xff]   ;;  %190 = vmatprep.subr.bf16.mxu0 %v6536_v1  ;;  %v147_v4 = vpack.c.bf16 %v146_v3, %v146_v3  ;;  %vm172_vm0 = vcmask 130048   ;;  %vm7758_vm1 = vmmov 0   ;;  %s7759_s6 = smov [#allocation17]  }
  0x72   :  { %v6539_v5 = vld [vmem:[#allocation8 + $0xe4] ss:$16 sps:$4 sm:$0xff]   ;;  %191 = vmatpush1.bf16.msra.mxu0 %v6538_v2  ;;  %v6541_v6 = vld [vmem:[#allocation8 + $0xe8] ss:$16 sps:$4 sm:$0xff]   ;;  %v6543_v7 = vld [vmem:[#allocation8 + $0xec] ss:$16 sps:$4 sm:$0xff]  }
  0x73   :  { %627 = vmatprep.subr.bf16.mxu1 %v6539_v5  ;;  %v6544_v8 = vld [vmem:[#allocation8 + $0xe0] ss:$16 sps:$4 sm:$0xff]   ;;  %668 = vmatprep.subr.bf16.mxu0 %v6543_v7  ;;  %v6545_v9 = vld [vmem:[#allocation8 + $0xc4] ss:$16 sps:$4 sm:$0xff]   ;;  %v6547_v10 = vld [vmem:[#allocation8 + $0xc8] ss:$16 sps:$4 sm:$0xff]  }
  0x74   :  { %628 = vmatpush1.bf16.msra.mxu1 %v6544_v8  ;;  %v6549_v11 = vld [vmem:[#allocation8 + $0xcc] ss:$16 sps:$4 sm:$0xff]   ;;  %v6550_v12 = vld [vmem:[#allocation8 + $0xc0] ss:$16 sps:$4 sm:$0xff]   ;;  %v6551_v13 = vld [vmem:[#allocation8 + $0xa4] ss:$16 sps:$4 sm:$0xff]   ;;  %v152_v8 = vlaneseq }
  0x75   :  { %5697 = vmatmul.mubr.msk.bf16.vlgmr.msra.gmra.mxu0 %vm172_vm0, %v147_v4  ;;  %629 = vmatprep.subr.bf16.mxu1 %v6545_v9  ;;  %v6555_v14 = vld [vmem:[#allocation8 + $0xac] ss:$16 sps:$4 sm:$0xff]   ;;  %v6556_v15 = vld [vmem:[#allocation8 + $0xa0] ss:$16 sps:$4 sm:$0xff]   ;;  %v6553_v16 = vld [vmem:[#allocation8 + $0xa8] ss:$16 sps:$4 sm:$0xff]  }
  0x76   :  { %669 = vmatpush1.bf16.msra.mxu0 %v6541_v6  ;;  %v6557_v17 = vld [vmem:[#allocation8 + $0x84] ss:$16 sps:$4 sm:$0xff]   ;;  %v6561_v18 = vld [vmem:[#allocation8 + $0x8c] ss:$16 sps:$4 sm:$0xff]   ;;  %v6559_v19 = vld [vmem:[#allocation8 + $0x88] ss:$16 sps:$4 sm:$0xff]  }
  0x77   :  { %670 = vmatprep.subr.bf16.mxu0 %v6549_v11  ;;  %v6562_v20 = vld [vmem:[#allocation8 + $0x80] ss:$16 sps:$4 sm:$0xff]   ;;  %v6563_v21 = vld [vmem:[#allocation8 + $0x64] ss:$16 sps:$4 sm:$0xff]   ;;  %v6567_v22 = vld [vmem:[#allocation8 + $0x6c] ss:$16 sps:$4 sm:$0xff]  }
  0x78   :  { %630 = vmatpush1.bf16.msra.mxu1 %v6550_v12  ;;  %v6568_v23 = vld [vmem:[#allocation8 + $0x60] ss:$16 sps:$4 sm:$0xff]   ;;  %v6565_v24 = vld [vmem:[#allocation8 + $0x68] ss:$16 sps:$4 sm:$0xff]   ;;  %v6569_v25 = vld [vmem:[#allocation8 + $0x44] ss:$16 sps:$4 sm:$0xff]  }
  0x79   :  { %631 = vmatprep.subr.bf16.mxu1 %v6551_v13  ;;  %v6573_v26 = vld [vmem:[#allocation8 + $0x4c] ss:$16 sps:$4 sm:$0xff]   ;;  %v6571_v27 = vld [vmem:[#allocation8 + $0x48] ss:$16 sps:$4 sm:$0xff]   ;;  %v6574_v28 = vld [vmem:[#allocation8 + $0x40] ss:$16 sps:$4 sm:$0xff]  }
  0x7a   :  { %671 = vmatpush1.bf16.msra.mxu0 %v6547_v10  ;;  %v6575_v29 = vld [vmem:[#allocation8 + $0x24] ss:$16 sps:$4 sm:$0xff]   ;;  %v6579_v30 = vld [vmem:[#allocation8 + $0x2c] ss:$16 sps:$4 sm:$0xff]   ;;  %v6580_v31 = vld [vmem:[#allocation8 + $0x20] ss:$16 sps:$4 sm:$0xff]  }
  0x7b   :  { %672 = vmatprep.subr.bf16.mxu0 %v6555_v14  ;;  %v6577_v32 = vld [vmem:[#allocation8 + $0x28] ss:$16 sps:$4 sm:$0xff]   ;;  %v6581_v33 = vld [vmem:[#allocation8 + $0x4] ss:$16 sps:$4 sm:$0xff]   ;;  %v6585_v34 = vld [vmem:[#allocation8 + $0xc] ss:$16 sps:$4 sm:$0xff]  }
  0x7c   :  { %632 = vmatpush1.bf16.msra.mxu1 %v6556_v15  ;;  %v6583_v35 = vld [vmem:[#allocation8 + $0x8] ss:$16 sps:$4 sm:$0xff]   ;;  %v6586_v36 = vld [vmem:[#allocation8] ss:$16 sps:$4 sm:$0xff]   ;;  %v6587_v37 = vld [vmem:[#allocation8 + $0x1e4] ss:$16 sps:$4 sm:$0xff]  }
  0x7d   :  { %633 = vmatprep.subr.bf16.mxu1 %v6557_v17  ;;  %v6591_v38 = vld [vmem:[#allocation8 + $0x1ec] ss:$16 sps:$4 sm:$0xff]   ;;  %v6592_v39 = vld [vmem:[#allocation8 + $0x1e0] ss:$16 sps:$4 sm:$0xff]   ;;  %v6589_v40 = vld [vmem:[#allocation8 + $0x1e8] ss:$16 sps:$4 sm:$0xff]  }
  0x7e   :  { %673 = vmatpush1.bf16.msra.mxu0 %v6553_v16  ;;  %v6593_v41 = vld [vmem:[#allocation8 + $0x1c4] ss:$16 sps:$4 sm:$0xff]   ;;  %v6597_v42 = vld [vmem:[#allocation8 + $0x1cc] ss:$16 sps:$4 sm:$0xff]   ;;  %v6595_v43 = vld [vmem:[#allocation8 + $0x1c8] ss:$16 sps:$4 sm:$0xff]  }
  0x7f   :  { %674 = vmatprep.subr.bf16.mxu0 %v6561_v18  ;;  %v6598_v44 = vld [vmem:[#allocation8 + $0x1c0] ss:$16 sps:$4 sm:$0xff]   ;;  %v6599_v45 = vld [vmem:[#allocation8 + $0x1a4] ss:$16 sps:$4 sm:$0xff]   ;;  %v6603_v46 = vld [vmem:[#allocation8 + $0x1ac] ss:$16 sps:$4 sm:$0xff]  }
  0x80   :  { %634 = vmatpush1.bf16.msra.mxu1 %v6562_v20  ;;  %v6604_v47 = vld [vmem:[#allocation8 + $0x1a0] ss:$16 sps:$4 sm:$0xff]   ;;  %v6601_v48 = vld [vmem:[#allocation8 + $0x1a8] ss:$16 sps:$4 sm:$0xff]   ;;  %v6605_v49 = vld [vmem:[#allocation8 + $0x184] ss:$16 sps:$4 sm:$0xff]  }
  0x81   :  { %635 = vmatprep.subr.bf16.mxu1 %v6563_v21  ;;  %v6609_v50 = vld [vmem:[#allocation8 + $0x18c] ss:$16 sps:$4 sm:$0xff]   ;;  %v6610_v51 = vld [vmem:[#allocation8 + $0x180] ss:$16 sps:$4 sm:$0xff]   ;;  %v6607_v52 = vld [vmem:[#allocation8 + $0x188] ss:$16 sps:$4 sm:$0xff]  }
  0x82   :  { %675 = vmatpush1.bf16.msra.mxu0 %v6559_v19  ;;  %v6611_v53 = vld [vmem:[#allocation8 + $0x164] ss:$16 sps:$4 sm:$0xff]   ;;  %v6615_v54 = vld [vmem:[#allocation8 + $0x16c] ss:$16 sps:$4 sm:$0xff]   ;;  %v6616_v55 = vld [vmem:[#allocation8 + $0x160] ss:$16 sps:$4 sm:$0xff]  }
  0x83   :  { %676 = vmatprep.subr.bf16.mxu0 %v6567_v22  ;;  %v6613_v56 = vld [vmem:[#allocation8 + $0x168] ss:$16 sps:$4 sm:$0xff]   ;;  %v6617_v57 = vld [vmem:[#allocation8 + $0x144] ss:$16 sps:$4 sm:$0xff]   ;;  %v6621_v58 = vld [vmem:[#allocation8 + $0x14c] ss:$16 sps:$4 sm:$0xff]  }
  0x84   :  { %636 = vmatpush1.bf16.msra.mxu1 %v6568_v23  ;;  %v6622_v59 = vld [vmem:[#allocation8 + $0x140] ss:$16 sps:$4 sm:$0xff]   ;;  %v6619_v60 = vld [vmem:[#allocation8 + $0x148] ss:$16 sps:$4 sm:$0xff]   ;;  %v6623_v61 = vld [vmem:[#allocation8 + $0x124] ss:$16 sps:$4 sm:$0xff]  }
  0x85   :  { %637 = vmatprep.subr.bf16.mxu1 %v6569_v25  ;;  %v6627_v62 = vld [vmem:[#allocation8 + $0x12c] ss:$16 sps:$4 sm:$0xff]   ;;  %v6625_v63 = vld [vmem:[#allocation8 + $0x128] ss:$16 sps:$4 sm:$0xff]   ;;  %v6628_v1 = vld [vmem:[#allocation8 + $0x120] ss:$16 sps:$4 sm:$0xff]  }
  0x86   :  { %677 = vmatpush1.bf16.msra.mxu0 %v6565_v24  ;;  %v6629_v2 = vld [vmem:[#allocation8 + $0x104] ss:$16 sps:$4 sm:$0xff]   ;;  %v6633_v3 = vld [vmem:[#allocation8 + $0x10c] ss:$16 sps:$4 sm:$0xff]   ;;  %v6631_v4 = vld [vmem:[#allocation8 + $0x108] ss:$16 sps:$4 sm:$0xff]  }
  0x87   :  { %678 = vmatprep.subr.bf16.mxu0 %v6573_v26  ;;  %v6634_v5 = vld [vmem:[#allocation8 + $0x100] ss:$16 sps:$4 sm:$0xff]   ;;  %v7838_v9 = vshrl.u32 %v152_v8, 7  ;;  %v150_v10 = vld [vmem:[#allocation7] sm:$0x3]  ;;  %s5682_s8 = sshll.u32 %s7759_s6, 4  ;;  %s5683_s8 = int_to_ptr.vmem [resolvable:$true] %s5682_s8 }
  0x88   :  { %638 = vmatpush1.bf16.msra.mxu1 %v6574_v28  ;;  %v6637_v6 = vld [vmem:[#allocation11 + $0x18c] ss:$28 sps:$4 sm:$0xff]   ;;  %v6643_v25 = vld [vmem:[#allocation11 + $0x154] ss:$28 sps:$4 sm:$0xff]   ;;  %s7709_s11 = scalar_lea.vmem %s5683_s8, 896  ;;  %p7714_p4 = scmp.lt.s32.totalorder %s5683_s8, %s5683_s8 }
  0x89   :  { %639 = vmatprep.subr.bf16.mxu1 %v6575_v29  ;;  %v6640_v7 = vld [vmem:[#allocation11 + $0x50c] ss:$28 sps:$4 sm:$0xff]   ;;  %v7841_v11 = vsub.s32 0, %v7838_v9  ;;  %v7844_v12 = vsub.s32 1, %v7838_v9  ;;  %v6646_v26 = vld [vmem:[#allocation11 + $0x4d4] ss:$28 sps:$4 sm:$0xff]   ;;  %p7710_p3 = scmp.ne.s32.totalorder %s5683_s8, %s7709_s11  ;;  %p7715_p5 = scmp.lt.s32.totalorder %s7709_s11, %s7709_s11 }
  0x8a   :  { %679 = vmatpush1.bf16.msra.mxu0 %v6571_v27  ;;  %v6635_v22 = vld [vmem:[#allocation11 + $0x188] ss:$28 sps:$4 sm:$0xff]   ;;  %v6641_v29 = vld [vmem:[#allocation11 + $0x150] ss:$28 sps:$4 sm:$0xff]  }
  0x8b   :  { %680 = vmatprep.subr.bf16.mxu0 %v6579_v30  ;;  %v155_v13 = vrot.slane %v150_v10, %v7841_v11  ;;  %v159_v14 = vrot.slane %v150_v10, %v7844_v12  ;;  %v6638_v23 = vld [vmem:[#allocation11 + $0x508] ss:$28 sps:$4 sm:$0xff]   ;;  %v6644_v30 = vld [vmem:[#allocation11 + $0x4d0] ss:$28 sps:$4 sm:$0xff]   ;;  %p7716_p6 = por %p7715_p5, %p7714_p4 }
  0x8c   :  { %640 = vmatpush1.bf16.msra.mxu1 %v6580_v31  ;;  %v6649_v31 = vld [vmem:[#allocation11 + $0x11c] ss:$28 sps:$4 sm:$0xff]   ;;  %v6709_v8 = vld [vmem:[#allocation11 + $0x26c] ss:$28 sps:$4 sm:$0xff]  }
  0x8d   :  { %641 = vmatprep.subr.bf16.mxu1 %v6581_v33  ;;  %v6647_v33 = vld [vmem:[#allocation11 + $0x118] ss:$28 sps:$4 sm:$0xff]   ;;  %v6712_v10 = vld [vmem:[#allocation11 + $0x5ec] ss:$28 sps:$4 sm:$0xff]   ;;  %p7717_p7 = pnand %p7716_p6, %p7710_p3 }
  0x8e   :  { %681 = vmatpush1.bf16.msra.mxu0 %v6577_v32  ;;  %v6652_v32 = vld [vmem:[#allocation11 + $0x49c] ss:$28 sps:$4 sm:$0xff]  }
  0x8f   :  { %682 = vmatprep.subr.bf16.mxu0 %v6585_v34  ;;  %v6650_v34 = vld [vmem:[#allocation11 + $0x498] ss:$28 sps:$4 sm:$0xff]  }
  0x90   :  { %642 = vmatpush1.bf16.msra.mxu1 %v6586_v36  ;;  %v6658_v36 = vld [vmem:[#allocation11 + $0x464] ss:$28 sps:$4 sm:$0xff]  }
  0x91   :  { %643 = vmatprep.subr.bf16.mxu1 %v6587_v37  ;;  %v6653_v37 = vld [vmem:[#allocation11 + $0xe0] ss:$28 sps:$4 sm:$0xff]  }
  0x92   :  { %683 = vmatpush1.bf16.msra.mxu0 %v6583_v35  ;;  %v6655_v35 = vld [vmem:[#allocation11 + $0xe4] ss:$28 sps:$4 sm:$0xff]  }
  0x93   :  { %684 = vmatprep.subr.bf16.mxu0 %v6591_v38  ;;  %v6656_v38 = vld [vmem:[#allocation11 + $0x460] ss:$28 sps:$4 sm:$0xff]  }
  0x94   :  { %644 = vmatpush2.bf16.msra.mxu1 %v6592_v39  ;;  %v6661_v39 = vld [vmem:[#allocation11 + $0xac] ss:$28 sps:$4 sm:$0xff]  }
  0x95   :  { %645 = vmatprep.subr.bf16.mxu1 %v6593_v41  ;;  %v6659_v41 = vld [vmem:[#allocation11 + $0xa8] ss:$28 sps:$4 sm:$0xff]  }
  0x96   :  { %685 = vmatpush2.bf16.msra.mxu0 %v6589_v40  ;;  %v6664_v40 = vld [vmem:[#allocation11 + $0x42c] ss:$28 sps:$4 sm:$0xff]  }
  0x97   :  { %686 = vmatprep.subr.bf16.mxu0 %v6597_v42  ;;  %v6662_v42 = vld [vmem:[#allocation11 + $0x428] ss:$28 sps:$4 sm:$0xff]  }
  0x98   :  { %646 = vmatpush2.bf16.msra.mxu1 %v6598_v44  ;;  %v6670_v44 = vld [vmem:[#allocation11 + $0x3f4] ss:$28 sps:$4 sm:$0xff]  }
  0x99   :  { %647 = vmatprep.subr.bf16.mxu1 %v6599_v45  ;;  %v6665_v45 = vld [vmem:[#allocation11 + $0x70] ss:$28 sps:$4 sm:$0xff]  }
  0x9a   :  { %687 = vmatpush2.bf16.msra.mxu0 %v6595_v43  ;;  %v6667_v43 = vld [vmem:[#allocation11 + $0x74] ss:$28 sps:$4 sm:$0xff]  }
  0x9b   :  { %688 = vmatprep.subr.bf16.mxu0 %v6603_v46  ;;  %v6668_v46 = vld [vmem:[#allocation11 + $0x3f0] ss:$28 sps:$4 sm:$0xff]  }
  0x9c   :  { %648 = vmatpush2.bf16.msra.mxu1 %v6604_v47  ;;  %v6673_v47 = vld [vmem:[#allocation11 + $0x3c] ss:$28 sps:$4 sm:$0xff]  }
  0x9d   :  { %649 = vmatprep.subr.bf16.mxu1 %v6605_v49  ;;  %v6671_v49 = vld [vmem:[#allocation11 + $0x38] ss:$28 sps:$4 sm:$0xff]  }
  0x9e   :  { %689 = vmatpush2.bf16.msra.mxu0 %v6601_v48  ;;  %v6676_v48 = vld [vmem:[#allocation11 + $0x3bc] ss:$28 sps:$4 sm:$0xff]  }
  0x9f   :  { %690 = vmatprep.subr.bf16.mxu0 %v6609_v50  ;;  %v6674_v50 = vld [vmem:[#allocation11 + $0x3b8] ss:$28 sps:$4 sm:$0xff]  }
  0xa0   :  { %650 = vmatpush2.bf16.msra.mxu1 %v6610_v51  ;;  %v6679_v51 = vld [vmem:[#allocation11 + $0x4] ss:$28 sps:$4 sm:$0xff]  }
  0xa1   :  { %651 = vmatprep.subr.bf16.mxu1 %v6611_v53  ;;  %v6677_v53 = vld [vmem:[#allocation11] ss:$28 sps:$4 sm:$0xff]  }
  0xa2   :  { %691 = vmatpush2.bf16.msra.mxu0 %v6607_v52  ;;  %v6682_v52 = vld [vmem:[#allocation11 + $0x384] ss:$28 sps:$4 sm:$0xff]  }
  0xa3   :  { %692 = vmatprep.subr.bf16.mxu0 %v6615_v54  ;;  %v6680_v54 = vld [vmem:[#allocation11 + $0x380] ss:$28 sps:$4 sm:$0xff]  }
  0xa4   :  { %652 = vmatpush2.bf16.msra.mxu1 %v6616_v55  ;;  %v6685_v55 = vld [vmem:[#allocation11 + $0x34c] ss:$28 sps:$4 sm:$0xff]  }
  0xa5   :  { %653 = vmatprep.subr.bf16.mxu1 %v6617_v57  ;;  %v6683_v57 = vld [vmem:[#allocation11 + $0x348] ss:$28 sps:$4 sm:$0xff]  }
  0xa6   :  { %693 = vmatpush2.bf16.msra.mxu0 %v6613_v56  ;;  %v6688_v56 = vld [vmem:[#allocation11 + $0x6cc] ss:$28 sps:$4 sm:$0xff]  }
  0xa7   :  { %694 = vmatprep.subr.bf16.mxu0 %v6621_v58  ;;  %v6686_v58 = vld [vmem:[#allocation11 + $0x6c8] ss:$28 sps:$4 sm:$0xff]  }
  0xa8   :  { %654 = vmatpush2.bf16.msra.mxu1 %v6622_v59  ;;  %v6691_v59 = vld [vmem:[#allocation11 + $0x314] ss:$28 sps:$4 sm:$0xff]  }
  0xa9   :  { %655 = vmatprep.subr.bf16.mxu1 %v6623_v61  ;;  %v6689_v61 = vld [vmem:[#allocation11 + $0x310] ss:$28 sps:$4 sm:$0xff]  }
  0xaa   :  { %695 = vmatpush2.bf16.msra.mxu0 %v6619_v60  ;;  %v6694_v60 = vld [vmem:[#allocation11 + $0x694] ss:$28 sps:$4 sm:$0xff]  }
  0xab   :  { %696 = vmatprep.subr.bf16.mxu0 %v6627_v62  ;;  %v6692_v62 = vld [vmem:[#allocation11 + $0x690] ss:$28 sps:$4 sm:$0xff]  }
  0xac   :  { %656 = vmatpush2.bf16.msra.mxu1 %v6628_v1  ;;  %v6700_v1 = vld [vmem:[#allocation11 + $0x65c] ss:$28 sps:$4 sm:$0xff]  }
  0xad   :  { %657 = vmatprep.subr.bf16.mxu1 %v6629_v2  ;;  %v6695_v2 = vld [vmem:[#allocation11 + $0x2d8] ss:$28 sps:$4 sm:$0xff]  }
  0xae   :  { %697 = vmatpush2.bf16.msra.mxu0 %v6625_v63  ;;  %v6697_v63 = vld [vmem:[#allocation11 + $0x2dc] ss:$28 sps:$4 sm:$0xff]  }
  0xaf   :  { %698 = vmatprep.subr.bf16.mxu0 %v6633_v3  ;;  %v6698_v3 = vld [vmem:[#allocation11 + $0x658] ss:$28 sps:$4 sm:$0xff]  }
  0xb0   :  { %658 = vmatpush2.bf16.msra.mxu1 %v6634_v5  ;;  %v6706_v5 = vld [vmem:[#allocation11 + $0x624] ss:$28 sps:$4 sm:$0xff]  }
  0xb1   :  { %2162 = vmatprep.subr.bf16.mxu1 %v6637_v6  ;;  %v6701_v6 = vld [vmem:[#allocation11 + $0x2a0] ss:$28 sps:$4 sm:$0xff]  }
  0xb2   :  { %699 = vmatpush2.bf16.msra.mxu0 %v6631_v4  ;;  %v6703_v4 = vld [vmem:[#allocation11 + $0x2a4] ss:$28 sps:$4 sm:$0xff]  }
  0xb3   :  { %2203 = vmatprep.subr.bf16.mxu0 %v6640_v7  ;;  %v6704_v7 = vld [vmem:[#allocation11 + $0x620] ss:$28 sps:$4 sm:$0xff]  }
 0x135   :  { %v210_v15 = vpop.f32.mrf.mxu0 }
 0x136   :  { %v211_v16 = vadd.f32 %v210_v15, %v155_v13  ;;  %v6707_v13 = vld [vmem:[#allocation11 + $0x268] ss:$28 sps:$4 sm:$0xff]   ;;  %v6715_v15 = vld [vmem:[#allocation11 + $0x234] ss:$28 sps:$4 sm:$0xff]  }
 0x137   :  { %v212_v17 = vpop.f32.mrf.mxu0 }
 0x138   :  { %v213_v18 = vadd.f32 %v212_v17, %v159_v14  ;;  %v217_v19 = vmax.f32 %v211_v16, 0.0  ;;  %v6710_v14 = vld [vmem:[#allocation11 + $0x5e8] ss:$28 sps:$4 sm:$0xff]   ;;  %v6718_v16 = vld [vmem:[#allocation11 + $0x5b4] ss:$28 sps:$4 sm:$0xff]  }
 0x139   :  { %v214_v20 = vpop.f32.mrf.mxu0  ;;  %v6713_v17 = vld [vmem:[#allocation11 + $0x230] ss:$28 sps:$4 sm:$0xff]  }
 0x13a   :  { %v218_v21 = vmax.f32 %v213_v18, 0.0  ;;  %v219_v28 = vpack.c.bf16 %v217_v19, %v217_v19  ;;  %v6716_v18 = vld [vmem:[#allocation11 + $0x5b0] ss:$28 sps:$4 sm:$0xff]   ;;  %v6721_v19 = vld [vmem:[#allocation11 + $0x1fc] ss:$28 sps:$4 sm:$0xff]  }
 0x13b   :  { %v215_v24 = vpop.f32.mrf.mxu0  ;;  %v6724_v20 = vld [vmem:[#allocation11 + $0x57c] ss:$28 sps:$4 sm:$0xff]  }
 0x13c   :  { %v220_v27 = vpack.c.bf16 %v218_v21, %v218_v21  ;;  %v6719_v21 = vld [vmem:[#allocation11 + $0x1f8] ss:$28 sps:$4 sm:$0xff]   ;;  %v6730_v24 = vld [vmem:[#allocation11 + $0x544] ss:$28 sps:$4 sm:$0xff]  }
 0x13e   :  { %659 = vmatprep.mubr.bf16.mxu1 %v220_v27  ;;  %700 = vmatprep.mubr.bf16.mxu0 %v220_v27  ;;  %v6733_v27 = vld [vmem:[#allocation11 + $0x194] ss:$28 sps:$4 sm:$0xff]  }
 0x13f   :  { %660 = vmatmul.mubr.bf16.vlgmr.msra.gmra.mxu1 %v219_v28  ;;  %701 = vmatmul.mubr.bf16.vlgmr.msra.gmra.mxu0 %v219_v28  ;;  %v6736_v28 = vld [vmem:[#allocation11 + $0x514] ss:$28 sps:$4 sm:$0xff]  }
 0x140   :  { %2163 = vmatpush1.bf16.msra.mxu1 %v6635_v22  ;;  %2204 = vmatpush1.bf16.msra.mxu0 %v6638_v23  ;;  %v6722_v22 = vld [vmem:[#allocation11 + $0x578] ss:$28 sps:$4 sm:$0xff]   ;;  %v6727_v23 = vld [vmem:[#allocation11 + $0x1c4] ss:$28 sps:$4 sm:$0xff]  }
 0x141   :  { %2164 = vmatprep.subr.bf16.mxu1 %v6643_v25  ;;  %2205 = vmatprep.subr.bf16.mxu0 %v6646_v26  ;;  %v6725_v25 = vld [vmem:[#allocation11 + $0x1c0] ss:$28 sps:$4 sm:$0xff]  }
 0x142   :  { %v6728_v26 = vld [vmem:[#allocation11 + $0x540] ss:$28 sps:$4 sm:$0xff]  }
 0x144   :  { %2165 = vmatpush1.bf16.msra.mxu1 %v6641_v29  ;;  %2206 = vmatpush1.bf16.msra.mxu0 %v6644_v30  ;;  %v7849_v29 = vsub.s32 2, %v7838_v9  ;;  %v285_v30 = vld [vmem:[#allocation10] sm:$0xf] }
 0x145   :  { %2166 = vmatprep.subr.bf16.mxu1 %v6649_v31  ;;  %2207 = vmatprep.subr.bf16.mxu0 %v6652_v32  ;;  %v7852_v31 = vsub.s32 3, %v7838_v9  ;;  %v290_v32 = vrot.slane %v285_v30, %v7841_v11 }
 0x148   :  { %2167 = vmatpush1.bf16.msra.mxu1 %v6647_v33  ;;  %2208 = vmatpush1.bf16.msra.mxu0 %v6650_v34  ;;  %v298_v33 = vrot.slane %v285_v30, %v7849_v29  ;;  %v294_v34 = vrot.slane %v285_v30, %v7844_v12 }
 0x149   :  { %2168 = vmatprep.subr.bf16.mxu1 %v6655_v35  ;;  %2209 = vmatprep.subr.bf16.mxu0 %v6658_v36  ;;  %v302_v35 = vrot.slane %v285_v30, %v7852_v31  ;;  %v6782_v30 = vld [vmem:[#allocation11 + $0x6d0] ss:$28 sps:$4 sm:$0xff]  }
 0x14c   :  { %2169 = vmatpush1.bf16.msra.mxu1 %v6653_v37  ;;  %2210 = vmatpush1.bf16.msra.mxu0 %v6656_v38 }
 0x14d   :  { %2170 = vmatprep.subr.bf16.mxu1 %v6661_v39  ;;  %2211 = vmatprep.subr.bf16.mxu0 %v6664_v40 }
 0x150   :  { %2171 = vmatpush1.bf16.msra.mxu1 %v6659_v41  ;;  %2212 = vmatpush1.bf16.msra.mxu0 %v6662_v42 }
 0x151   :  { %2172 = vmatprep.subr.bf16.mxu1 %v6667_v43  ;;  %2213 = vmatprep.subr.bf16.mxu0 %v6670_v44 }
 0x154   :  { %2173 = vmatpush1.bf16.msra.mxu1 %v6665_v45  ;;  %2214 = vmatpush1.bf16.msra.mxu0 %v6668_v46 }
 0x155   :  { %2174 = vmatprep.subr.bf16.mxu1 %v6673_v47  ;;  %2215 = vmatprep.subr.bf16.mxu0 %v6676_v48 }
 0x158   :  { %2175 = vmatpush1.bf16.msra.mxu1 %v6671_v49  ;;  %2216 = vmatpush1.bf16.msra.mxu0 %v6674_v50 }
 0x159   :  { %2176 = vmatprep.subr.bf16.mxu1 %v6679_v51  ;;  %2217 = vmatprep.subr.bf16.mxu0 %v6682_v52 }
 0x15c   :  { %2177 = vmatpush1.bf16.msra.mxu1 %v6677_v53  ;;  %2218 = vmatpush1.bf16.msra.mxu0 %v6680_v54  ;;  %v6731_v54 = vld [vmem:[#allocation11 + $0x190] ss:$28 sps:$4 sm:$0xff]  }
 0x15d   :  { %2178 = vmatprep.subr.bf16.mxu1 %v6685_v55  ;;  %2219 = vmatprep.subr.bf16.mxu0 %v6688_v56  ;;  %v6734_v55 = vld [vmem:[#allocation11 + $0x510] ss:$28 sps:$4 sm:$0xff]  }
 0x160   :  { %2179 = vmatpush2.bf16.msra.mxu1 %v6683_v57  ;;  %2220 = vmatpush2.bf16.msra.mxu0 %v6686_v58  ;;  %v6739_v58 = vld [vmem:[#allocation11 + $0x15c] ss:$28 sps:$4 sm:$0xff]  }
 0x161   :  { %2180 = vmatprep.subr.bf16.mxu1 %v6691_v59  ;;  %2221 = vmatprep.subr.bf16.mxu0 %v6694_v60  ;;  %v6742_v59 = vld [vmem:[#allocation11 + $0x4dc] ss:$28 sps:$4 sm:$0xff]  }
 0x162   :  { %v6737_v60 = vld [vmem:[#allocation11 + $0x158] ss:$28 sps:$4 sm:$0xff]  }
 0x164   :  { %2181 = vmatpush2.bf16.msra.mxu1 %v6689_v61  ;;  %2222 = vmatpush2.bf16.msra.mxu0 %v6692_v62  ;;  %v6740_v61 = vld [vmem:[#allocation11 + $0x4d8] ss:$28 sps:$4 sm:$0xff]   ;;  %v6745_v62 = vld [vmem:[#allocation11 + $0x124] ss:$28 sps:$4 sm:$0xff]  }
 0x165   :  { %2182 = vmatprep.subr.bf16.mxu1 %v6697_v63  ;;  %2223 = vmatprep.subr.bf16.mxu0 %v6700_v1  ;;  %v6748_v63 = vld [vmem:[#allocation11 + $0x4a4] ss:$28 sps:$4 sm:$0xff]  }
 0x166   :  { %v6743_v1 = vld [vmem:[#allocation11 + $0x120] ss:$28 sps:$4 sm:$0xff]  }
 0x168   :  { %2183 = vmatpush2.bf16.msra.mxu1 %v6695_v2  ;;  %2224 = vmatpush2.bf16.msra.mxu0 %v6698_v3  ;;  %v6746_v2 = vld [vmem:[#allocation11 + $0x4a0] ss:$28 sps:$4 sm:$0xff]   ;;  %v6751_v3 = vld [vmem:[#allocation11 + $0xec] ss:$28 sps:$4 sm:$0xff]  }
 0x169   :  { %2184 = vmatprep.subr.bf16.mxu1 %v6703_v4  ;;  %2225 = vmatprep.subr.bf16.mxu0 %v6706_v5  ;;  %v6754_v4 = vld [vmem:[#allocation11 + $0x46c] ss:$28 sps:$4 sm:$0xff]  }
 0x16a   :  { %v6749_v5 = vld [vmem:[#allocation11 + $0xe8] ss:$28 sps:$4 sm:$0xff]  }
 0x16c   :  { %2185 = vmatpush2.bf16.msra.mxu1 %v6701_v6  ;;  %2226 = vmatpush2.bf16.msra.mxu0 %v6704_v7  ;;  %v6752_v6 = vld [vmem:[#allocation11 + $0x468] ss:$28 sps:$4 sm:$0xff]   ;;  %v6757_v7 = vld [vmem:[#allocation11 + $0xb4] ss:$28 sps:$4 sm:$0xff]  }
 0x16d   :  { %2186 = vmatprep.subr.bf16.mxu1 %v6709_v8  ;;  %2227 = vmatprep.subr.bf16.mxu0 %v6712_v10  ;;  %v6760_v8 = vld [vmem:[#allocation11 + $0x434] ss:$28 sps:$4 sm:$0xff]  }
 0x16e   :  { %v6755_v10 = vld [vmem:[#allocation11 + $0xb0] ss:$28 sps:$4 sm:$0xff]  }
 0x170   :  { %2187 = vmatpush2.bf16.msra.mxu1 %v6707_v13  ;;  %2228 = vmatpush2.bf16.msra.mxu0 %v6710_v14  ;;  %v6758_v13 = vld [vmem:[#allocation11 + $0x430] ss:$28 sps:$4 sm:$0xff]   ;;  %v6763_v14 = vld [vmem:[#allocation11 + $0x7c] ss:$28 sps:$4 sm:$0xff]  }
 0x171   :  { %2188 = vmatprep.subr.bf16.mxu1 %v6715_v15  ;;  %2229 = vmatprep.subr.bf16.mxu0 %v6718_v16  ;;  %v6766_v15 = vld [vmem:[#allocation11 + $0x3fc] ss:$28 sps:$4 sm:$0xff]  }
 0x172   :  { %v6761_v16 = vld [vmem:[#allocation11 + $0x78] ss:$28 sps:$4 sm:$0xff]  }
 0x174   :  { %2189 = vmatpush2.bf16.msra.mxu1 %v6713_v17  ;;  %2230 = vmatpush2.bf16.msra.mxu0 %v6716_v18  ;;  %v6764_v17 = vld [vmem:[#allocation11 + $0x3f8] ss:$28 sps:$4 sm:$0xff]   ;;  %v6769_v18 = vld [vmem:[#allocation11 + $0x44] ss:$28 sps:$4 sm:$0xff]  }
 0x175   :  { %2190 = vmatprep.subr.bf16.mxu1 %v6721_v19  ;;  %2231 = vmatprep.subr.bf16.mxu0 %v6724_v20  ;;  %v6772_v19 = vld [vmem:[#allocation11 + $0x3c4] ss:$28 sps:$4 sm:$0xff]  }
 0x176   :  { %v6767_v20 = vld [vmem:[#allocation11 + $0x40] ss:$28 sps:$4 sm:$0xff]  }
 0x178   :  { %2191 = vmatpush2.bf16.msra.mxu1 %v6719_v21  ;;  %2232 = vmatpush2.bf16.msra.mxu0 %v6722_v22  ;;  %v6770_v21 = vld [vmem:[#allocation11 + $0x3c0] ss:$28 sps:$4 sm:$0xff]   ;;  %v6775_v22 = vld [vmem:[#allocation11 + $0xc] ss:$28 sps:$4 sm:$0xff]  }
 0x179   :  { %2192 = vmatprep.subr.bf16.mxu1 %v6727_v23  ;;  %2233 = vmatprep.subr.bf16.mxu0 %v6730_v24  ;;  %v6778_v23 = vld [vmem:[#allocation11 + $0x38c] ss:$28 sps:$4 sm:$0xff]  }
 0x17a   :  { %v6773_v24 = vld [vmem:[#allocation11 + $0x8] ss:$28 sps:$4 sm:$0xff]  }
 0x17c   :  { %2193 = vmatpush2.bf16.msra.mxu1 %v6725_v25  ;;  %2234 = vmatpush2.bf16.msra.mxu0 %v6728_v26  ;;  %v6776_v25 = vld [vmem:[#allocation11 + $0x388] ss:$28 sps:$4 sm:$0xff]   ;;  %v6781_v26 = vld [vmem:[#allocation11 + $0x354] ss:$28 sps:$4 sm:$0xff]  }
 0x17d   :  { %2244 = vmatprep.subr.bf16.mxu1 %v6733_v27  ;;  %2285 = vmatprep.subr.bf16.mxu0 %v6736_v28  ;;  %v6784_v27 = vld [vmem:[#allocation11 + $0x6d4] ss:$28 sps:$4 sm:$0xff]  }
 0x17e   :  { %v6779_v28 = vld [vmem:[#allocation11 + $0x350] ss:$28 sps:$4 sm:$0xff]  }
 0x1ff   :  { %v661_v36 = vpop.f32.mrf.mxu1  ;;  %v702_v37 = vpop.f32.mrf.mxu0 }
 0x200   :  { %v662_v38 = vadd.f32 %v661_v36, %v290_v32  ;;  %v703_v39 = vadd.f32 %v702_v37, %v298_v33  ;;  %v6787_v32 = vld [vmem:[#allocation11 + $0x31c] ss:$28 sps:$4 sm:$0xff]   ;;  %v6793_v36 = vld [vmem:[#allocation11 + $0x2e4] ss:$28 sps:$4 sm:$0xff]  }
 0x201   :  { %v663_v40 = vpop.f32.mrf.mxu1  ;;  %v704_v41 = vpop.f32.mrf.mxu0  ;;  %v6790_v33 = vld [vmem:[#allocation11 + $0x69c] ss:$28 sps:$4 sm:$0xff]   ;;  %v6796_v37 = vld [vmem:[#allocation11 + $0x664] ss:$28 sps:$4 sm:$0xff]  }
 0x202   :  { %v664_v42 = vadd.f32 %v663_v40, %v294_v34  ;;  %v705_v43 = vadd.f32 %v704_v41, %v302_v35  ;;  %v709_v44 = vmax.f32 %v662_v38, 0.0  ;;  %v711_v45 = vmax.f32 %v703_v39, 0.0  ;;  %v6785_v34 = vld [vmem:[#allocation11 + $0x318] ss:$28 sps:$4 sm:$0xff]   ;;  %v6791_v38 = vld [vmem:[#allocation11 + $0x2e0] ss:$28 sps:$4 sm:$0xff]  }
 0x203   :  { %v665_v46 = vpop.f32.mrf.mxu1  ;;  %v706_v47 = vpop.f32.mrf.mxu0  ;;  %v6788_v35 = vld [vmem:[#allocation11 + $0x698] ss:$28 sps:$4 sm:$0xff]   ;;  %v6794_v39 = vld [vmem:[#allocation11 + $0x660] ss:$28 sps:$4 sm:$0xff]   ;;  %v6799_v40 = vld [vmem:[#allocation11 + $0x2ac] ss:$28 sps:$4 sm:$0xff]  }
 0x204   :  { %v710_v48 = vmax.f32 %v664_v42, 0.0  ;;  %v712_v49 = vmax.f32 %v705_v43, 0.0  ;;  %v7862_v56 = vpack.c.bf16 %v709_v44, %v709_v44  ;;  %v7864_v57 = vpack.c.bf16 %v711_v45, %v711_v45  ;;  %v6802_v41 = vld [vmem:[#allocation11 + $0x62c] ss:$28 sps:$4 sm:$0xff]   ;;  %v6805_v44 = vld [vmem:[#allocation11 + $0x274] ss:$28 sps:$4 sm:$0xff]  }
 0x205   :  { %v666_v50 = vpop.f32.mrf.mxu1  ;;  %v707_v51 = vpop.f32.mrf.mxu0  ;;  %v6797_v42 = vld [vmem:[#allocation11 + $0x2a8] ss:$28 sps:$4 sm:$0xff]   ;;  %v6808_v45 = vld [vmem:[#allocation11 + $0x5f4] ss:$28 sps:$4 sm:$0xff]  }
 0x206   :  { %v7858_v52 = vpack.c.bf16 %v710_v48, %v710_v48  ;;  %v7860_v53 = vpack.c.bf16 %v712_v49, %v712_v49  ;;  %v6800_v43 = vld [vmem:[#allocation11 + $0x628] ss:$28 sps:$4 sm:$0xff]   ;;  %v6803_v46 = vld [vmem:[#allocation11 + $0x270] ss:$28 sps:$4 sm:$0xff]   ;;  %v6811_v48 = vld [vmem:[#allocation11 + $0x23c] ss:$28 sps:$4 sm:$0xff]  }
 0x207   :  { %v6806_v47 = vld [vmem:[#allocation11 + $0x5f0] ss:$28 sps:$4 sm:$0xff]   ;;  %v6814_v49 = vld [vmem:[#allocation11 + $0x5bc] ss:$28 sps:$4 sm:$0xff]  }
 0x208   :  { %2194 = vmatprep.mubr.bf16.mxu1 %v7858_v52  ;;  %2235 = vmatprep.mubr.bf16.mxu0 %v7860_v53  ;;  %v6809_v50 = vld [vmem:[#allocation11 + $0x238] ss:$28 sps:$4 sm:$0xff]  }
 0x209   :  { %2195 = vmatmul.mubr.bf16.vlgmr.msra.gmra.mxu1 %v7862_v56  ;;  %2236 = vmatmul.mubr.bf16.vlgmr.msra.gmra.mxu0 %v7864_v57  ;;  %v6812_v51 = vld [vmem:[#allocation11 + $0x5b8] ss:$28 sps:$4 sm:$0xff]  }
 0x20a   :  { %2245 = vmatpush1.bf16.msra.mxu1 %v6731_v54  ;;  %2286 = vmatpush1.bf16.msra.mxu0 %v6734_v55  ;;  %v6817_v54 = vld [vmem:[#allocation11 + $0x204] ss:$28 sps:$4 sm:$0xff]  }
 0x20b   :  { %2276 = vmatprep.mubr.bf16.mxu1 %v7858_v52  ;;  %2317 = vmatprep.mubr.bf16.mxu0 %v7860_v53  ;;  %v6820_v55 = vld [vmem:[#allocation11 + $0x584] ss:$28 sps:$4 sm:$0xff]  }
 0x20c   :  { %2246 = vmatprep.subr.bf16.mxu1 %v6739_v58  ;;  %2287 = vmatprep.subr.bf16.mxu0 %v6742_v59  ;;  %v6815_v58 = vld [vmem:[#allocation11 + $0x200] ss:$28 sps:$4 sm:$0xff]  }
 0x20d   :  { %v6818_v59 = vld [vmem:[#allocation11 + $0x580] ss:$28 sps:$4 sm:$0xff]  }
 0x20e   :  { %2247 = vmatpush1.bf16.msra.mxu1 %v6737_v60  ;;  %2288 = vmatpush1.bf16.msra.mxu0 %v6740_v61  ;;  %v6823_v60 = vld [vmem:[#allocation11 + $0x1cc] ss:$28 sps:$4 sm:$0xff]  }
 0x20f   :  { %2248 = vmatprep.subr.bf16.mxu1 %v6745_v62  ;;  %2289 = vmatprep.subr.bf16.mxu0 %v6748_v63  ;;  %v6826_v61 = vld [vmem:[#allocation11 + $0x54c] ss:$28 sps:$4 sm:$0xff]  }
 0x210   :  { %v6821_v62 = vld [vmem:[#allocation11 + $0x1c8] ss:$28 sps:$4 sm:$0xff]  }
 0x211   :  { %v6824_v63 = vld [vmem:[#allocation11 + $0x548] ss:$28 sps:$4 sm:$0xff]  }
 0x212   :  { %2249 = vmatpush1.bf16.msra.mxu1 %v6743_v1  ;;  %2290 = vmatpush1.bf16.msra.mxu0 %v6746_v2  ;;  %v6829_v1 = vld [vmem:[#allocation11 + $0x19c] ss:$28 sps:$4 sm:$0xff]  }
 0x213   :  { %2250 = vmatprep.subr.bf16.mxu1 %v6751_v3  ;;  %2291 = vmatprep.subr.bf16.mxu0 %v6754_v4  ;;  %v6832_v2 = vld [vmem:[#allocation11 + $0x51c] ss:$28 sps:$4 sm:$0xff]  }
 0x214   :  { %v6827_v3 = vld [vmem:[#allocation11 + $0x198] ss:$28 sps:$4 sm:$0xff]  }
 0x215   :  { %v6830_v4 = vld [vmem:[#allocation11 + $0x518] ss:$28 sps:$4 sm:$0xff]  }
 0x216   :  { %2251 = vmatpush1.bf16.msra.mxu1 %v6749_v5  ;;  %2292 = vmatpush1.bf16.msra.mxu0 %v6752_v6  ;;  %v6835_v5 = vld [vmem:[#allocation11 + $0x164] ss:$28 sps:$4 sm:$0xff]  }
 0x217   :  { %2252 = vmatprep.subr.bf16.mxu1 %v6757_v7  ;;  %2293 = vmatprep.subr.bf16.mxu0 %v6760_v8  ;;  %v6838_v6 = vld [vmem:[#allocation11 + $0x4e4] ss:$28 sps:$4 sm:$0xff]  }
 0x218   :  { %v6833_v7 = vld [vmem:[#allocation11 + $0x160] ss:$28 sps:$4 sm:$0xff]  }
 0x219   :  { %v6836_v8 = vld [vmem:[#allocation11 + $0x4e0] ss:$28 sps:$4 sm:$0xff]  }
 0x21a   :  { %2253 = vmatpush1.bf16.msra.mxu1 %v6755_v10  ;;  %2294 = vmatpush1.bf16.msra.mxu0 %v6758_v13  ;;  %v6841_v10 = vld [vmem:[#allocation11 + $0x12c] ss:$28 sps:$4 sm:$0xff]  }
 0x21b   :  { %2254 = vmatprep.subr.bf16.mxu1 %v6763_v14  ;;  %2295 = vmatprep.subr.bf16.mxu0 %v6766_v15  ;;  %v6844_v13 = vld [vmem:[#allocation11 + $0x4ac] ss:$28 sps:$4 sm:$0xff]  }
 0x21c   :  { %v6839_v14 = vld [vmem:[#allocation11 + $0x128] ss:$28 sps:$4 sm:$0xff]  }
 0x21d   :  { %v6842_v15 = vld [vmem:[#allocation11 + $0x4a8] ss:$28 sps:$4 sm:$0xff]  }
 0x21e   :  { %2255 = vmatpush1.bf16.msra.mxu1 %v6761_v16  ;;  %2296 = vmatpush1.bf16.msra.mxu0 %v6764_v17  ;;  %v6847_v16 = vld [vmem:[#allocation11 + $0xf4] ss:$28 sps:$4 sm:$0xff]  }
 0x21f   :  { %2256 = vmatprep.subr.bf16.mxu1 %v6769_v18  ;;  %2297 = vmatprep.subr.bf16.mxu0 %v6772_v19  ;;  %v6850_v17 = vld [vmem:[#allocation11 + $0x474] ss:$28 sps:$4 sm:$0xff]  }
 0x220   :  { %v6845_v18 = vld [vmem:[#allocation11 + $0xf0] ss:$28 sps:$4 sm:$0xff]  }
 0x221   :  { %v6848_v19 = vld [vmem:[#allocation11 + $0x470] ss:$28 sps:$4 sm:$0xff]  }
 0x222   :  { %2257 = vmatpush1.bf16.msra.mxu1 %v6767_v20  ;;  %2298 = vmatpush1.bf16.msra.mxu0 %v6770_v21  ;;  %v6853_v20 = vld [vmem:[#allocation11 + $0xbc] ss:$28 sps:$4 sm:$0xff]  }
 0x223   :  { %2258 = vmatprep.subr.bf16.mxu1 %v6775_v22  ;;  %2299 = vmatprep.subr.bf16.mxu0 %v6778_v23  ;;  %v6856_v21 = vld [vmem:[#allocation11 + $0x43c] ss:$28 sps:$4 sm:$0xff]  }
 0x224   :  { %v6851_v22 = vld [vmem:[#allocation11 + $0xb8] ss:$28 sps:$4 sm:$0xff]  }
 0x225   :  { %v6854_v23 = vld [vmem:[#allocation11 + $0x438] ss:$28 sps:$4 sm:$0xff]  }
 0x226   :  { %2259 = vmatpush1.bf16.msra.mxu1 %v6773_v24  ;;  %2300 = vmatpush1.bf16.msra.mxu0 %v6776_v25  ;;  %v6859_v24 = vld [vmem:[#allocation11 + $0x84] ss:$28 sps:$4 sm:$0xff]  }
 0x227   :  { %2260 = vmatprep.subr.bf16.mxu1 %v6781_v26  ;;  %2301 = vmatprep.subr.bf16.mxu0 %v6784_v27  ;;  %v6862_v25 = vld [vmem:[#allocation11 + $0x404] ss:$28 sps:$4 sm:$0xff]  }
 0x228   :  { %v6857_v26 = vld [vmem:[#allocation11 + $0x80] ss:$28 sps:$4 sm:$0xff]  }
 0x229   :  { %v6860_v27 = vld [vmem:[#allocation11 + $0x400] ss:$28 sps:$4 sm:$0xff]  }
 0x22a   :  { %2261 = vmatpush2.bf16.msra.mxu1 %v6779_v28  ;;  %2302 = vmatpush2.bf16.msra.mxu0 %v6782_v30  ;;  %v6865_v28 = vld [vmem:[#allocation11 + $0x4c] ss:$28 sps:$4 sm:$0xff]  }
 0x22b   :  { %2262 = vmatprep.subr.bf16.mxu1 %v6787_v32  ;;  %2303 = vmatprep.subr.bf16.mxu0 %v6790_v33  ;;  %v6868_v30 = vld [vmem:[#allocation11 + $0x3cc] ss:$28 sps:$4 sm:$0xff]  }
 0x22c   :  { %v6863_v32 = vld [vmem:[#allocation11 + $0x48] ss:$28 sps:$4 sm:$0xff]  }
 0x22d   :  { %v6866_v33 = vld [vmem:[#allocation11 + $0x3c8] ss:$28 sps:$4 sm:$0xff]  }
 0x22e   :  { %2263 = vmatpush2.bf16.msra.mxu1 %v6785_v34  ;;  %2304 = vmatpush2.bf16.msra.mxu0 %v6788_v35  ;;  %v6871_v34 = vld [vmem:[#allocation11 + $0x14] ss:$28 sps:$4 sm:$0xff]  }
 0x22f   :  { %2264 = vmatprep.subr.bf16.mxu1 %v6793_v36  ;;  %2305 = vmatprep.subr.bf16.mxu0 %v6796_v37  ;;  %v6874_v35 = vld [vmem:[#allocation11 + $0x394] ss:$28 sps:$4 sm:$0xff]  }
 0x230   :  { %v6869_v36 = vld [vmem:[#allocation11 + $0x10] ss:$28 sps:$4 sm:$0xff]  }
 0x231   :  { %v6872_v37 = vld [vmem:[#allocation11 + $0x390] ss:$28 sps:$4 sm:$0xff]  }
 0x232   :  { %2265 = vmatpush2.bf16.msra.mxu1 %v6791_v38  ;;  %2306 = vmatpush2.bf16.msra.mxu0 %v6794_v39  ;;  %v6877_v38 = vld [vmem:[#allocation11 + $0x35c] ss:$28 sps:$4 sm:$0xff]  }
 0x233   :  { %2266 = vmatprep.subr.bf16.mxu1 %v6799_v40  ;;  %2307 = vmatprep.subr.bf16.mxu0 %v6802_v41  ;;  %v6880_v39 = vld [vmem:[#allocation11 + $0x6dc] ss:$28 sps:$4 sm:$0xff]  }
 0x234   :  { %v6875_v40 = vld [vmem:[#allocation11 + $0x358] ss:$28 sps:$4 sm:$0xff]  }
 0x235   :  { %v6878_v41 = vld [vmem:[#allocation11 + $0x6d8] ss:$28 sps:$4 sm:$0xff]  }
 0x236   :  { %2267 = vmatpush2.bf16.msra.mxu1 %v6797_v42  ;;  %2308 = vmatpush2.bf16.msra.mxu0 %v6800_v43  ;;  %v6883_v42 = vld [vmem:[#allocation11 + $0x324] ss:$28 sps:$4 sm:$0xff]  }
 0x237   :  { %2268 = vmatprep.subr.bf16.mxu1 %v6805_v44  ;;  %2309 = vmatprep.subr.bf16.mxu0 %v6808_v45  ;;  %v6886_v43 = vld [vmem:[#allocation11 + $0x6a4] ss:$28 sps:$4 sm:$0xff]  }
 0x238   :  { %v6881_v44 = vld [vmem:[#allocation11 + $0x320] ss:$28 sps:$4 sm:$0xff]  }
 0x239   :  { %v6884_v45 = vld [vmem:[#allocation11 + $0x6a0] ss:$28 sps:$4 sm:$0xff]  }
 0x23a   :  { %2269 = vmatpush2.bf16.msra.mxu1 %v6803_v46  ;;  %2310 = vmatpush2.bf16.msra.mxu0 %v6806_v47  ;;  %v6889_v46 = vld [vmem:[#allocation11 + $0x2ec] ss:$28 sps:$4 sm:$0xff]  }
 0x23b   :  { %2270 = vmatprep.subr.bf16.mxu1 %v6811_v48  ;;  %2311 = vmatprep.subr.bf16.mxu0 %v6814_v49  ;;  %v6892_v47 = vld [vmem:[#allocation11 + $0x66c] ss:$28 sps:$4 sm:$0xff]  }
 0x23c   :  { %v6887_v48 = vld [vmem:[#allocation11 + $0x2e8] ss:$28 sps:$4 sm:$0xff]  }
 0x23d   :  { %v6890_v49 = vld [vmem:[#allocation11 + $0x668] ss:$28 sps:$4 sm:$0xff]  }
 0x23e   :  { %2271 = vmatpush2.bf16.msra.mxu1 %v6809_v50  ;;  %2312 = vmatpush2.bf16.msra.mxu0 %v6812_v51  ;;  %v6895_v50 = vld [vmem:[#allocation11 + $0x2b4] ss:$28 sps:$4 sm:$0xff]  }
 0x23f   :  { %2272 = vmatprep.subr.bf16.mxu1 %v6817_v54  ;;  %2313 = vmatprep.subr.bf16.mxu0 %v6820_v55  ;;  %v6898_v51 = vld [vmem:[#allocation11 + $0x634] ss:$28 sps:$4 sm:$0xff]  }
 0x240   :  { %v6893_v54 = vld [vmem:[#allocation11 + $0x2b0] ss:$28 sps:$4 sm:$0xff]  }
 0x241   :  { %v6896_v55 = vld [vmem:[#allocation11 + $0x630] ss:$28 sps:$4 sm:$0xff]  }
 0x242   :  { %2273 = vmatpush2.bf16.msra.mxu1 %v6815_v58  ;;  %2314 = vmatpush2.bf16.msra.mxu0 %v6818_v59  ;;  %v6901_v58 = vld [vmem:[#allocation11 + $0x27c] ss:$28 sps:$4 sm:$0xff]  }
 0x243   :  { %2274 = vmatprep.subr.bf16.mxu1 %v6823_v60  ;;  %2315 = vmatprep.subr.bf16.mxu0 %v6826_v61  ;;  %v6904_v59 = vld [vmem:[#allocation11 + $0x5fc] ss:$28 sps:$4 sm:$0xff]  }
 0x244   :  { %v6899_v60 = vld [vmem:[#allocation11 + $0x278] ss:$28 sps:$4 sm:$0xff]  }
 0x245   :  { %v6902_v61 = vld [vmem:[#allocation11 + $0x5f8] ss:$28 sps:$4 sm:$0xff]  }
 0x246   :  { %2275 = vmatpush2.bf16.msra.mxu1 %v6821_v62  ;;  %2316 = vmatpush2.bf16.msra.mxu0 %v6824_v63  ;;  %v6907_v62 = vld [vmem:[#allocation11 + $0x244] ss:$28 sps:$4 sm:$0xff]  }
 0x247   :  { %2326 = vmatprep.subr.bf16.mxu1 %v6829_v1  ;;  %2367 = vmatprep.subr.bf16.mxu0 %v6832_v2  ;;  %v6910_v63 = vld [vmem:[#allocation11 + $0x5c4] ss:$28 sps:$4 sm:$0xff]  }
 0x248   :  { %v6905_v1 = vld [vmem:[#allocation11 + $0x240] ss:$28 sps:$4 sm:$0xff]  }
 0x249   :  { %2277 = vmatmul.mubr.bf16.vlgmr.msra.gmra.mxu1 %v7862_v56  ;;  %2318 = vmatmul.mubr.bf16.vlgmr.msra.gmra.mxu0 %v7864_v57  ;;  %v6908_v2 = vld [vmem:[#allocation11 + $0x5c0] ss:$28 sps:$4 sm:$0xff]  }
 0x24a   :  { %2327 = vmatpush1.bf16.msra.mxu1 %v6827_v3  ;;  %2358 = vmatprep.mubr.bf16.mxu1 %v7858_v52  ;;  %v6913_v3 = vld [vmem:[#allocation11 + $0x20c] ss:$28 sps:$4 sm:$0xff]  }
 0x24b   :  { %2368 = vmatpush1.bf16.msra.mxu0 %v6830_v4  ;;  %2399 = vmatprep.mubr.bf16.mxu0 %v7860_v53  ;;  %v6916_v4 = vld [vmem:[#allocation11 + $0x58c] ss:$28 sps:$4 sm:$0xff]  }
 0x24c   :  { %2328 = vmatprep.subr.bf16.mxu1 %v6835_v5  ;;  %2369 = vmatprep.subr.bf16.mxu0 %v6838_v6  ;;  %v6911_v5 = vld [vmem:[#allocation11 + $0x208] ss:$28 sps:$4 sm:$0xff]  }
 0x24d   :  { %v6914_v6 = vld [vmem:[#allocation11 + $0x588] ss:$28 sps:$4 sm:$0xff]  }
 0x24e   :  { %2329 = vmatpush1.bf16.msra.mxu1 %v6833_v7  ;;  %v6919_v7 = vld [vmem:[#allocation11 + $0x1d4] ss:$28 sps:$4 sm:$0xff]  }
 0x24f   :  { %2370 = vmatpush1.bf16.msra.mxu0 %v6836_v8  ;;  %2330 = vmatprep.subr.bf16.mxu1 %v6841_v10  ;;  %v6922_v8 = vld [vmem:[#allocation11 + $0x554] ss:$28 sps:$4 sm:$0xff]  }
 0x250   :  { %2371 = vmatprep.subr.bf16.mxu0 %v6844_v13  ;;  %v6917_v10 = vld [vmem:[#allocation11 + $0x1d0] ss:$28 sps:$4 sm:$0xff]  }
 0x251   :  { %v6920_v13 = vld [vmem:[#allocation11 + $0x550] ss:$28 sps:$4 sm:$0xff]  }
 0x252   :  { %2331 = vmatpush1.bf16.msra.mxu1 %v6839_v14  ;;  %v6923_v14 = vld [vmem:[#allocation11 + $0x360] ss:$28 sps:$4 sm:$0xff]  }
 0x253   :  { %2372 = vmatpush1.bf16.msra.mxu0 %v6842_v15  ;;  %2332 = vmatprep.subr.bf16.mxu1 %v6847_v16  ;;  %v6924_v15 = vld [vmem:[#allocation11 + $0x6e0] ss:$28 sps:$4 sm:$0xff]  }
 0x254   :  { %2373 = vmatprep.subr.bf16.mxu0 %v6850_v17  ;;  %v6925_v16 = vld [vmem:[#allocation11 + $0x1a0] ss:$28 sps:$4 sm:$0xff]  }
 0x255   :  { %v6926_v17 = vld [vmem:[#allocation11 + $0x520] ss:$28 sps:$4 sm:$0xff]  }
 0x256   :  { %2333 = vmatpush1.bf16.msra.mxu1 %v6845_v18  ;;  %v6927_v18 = vld [vmem:[#allocation11 + $0x328] ss:$28 sps:$4 sm:$0xff]  }
 0x257   :  { %2374 = vmatpush1.bf16.msra.mxu0 %v6848_v19  ;;  %2334 = vmatprep.subr.bf16.mxu1 %v6853_v20  ;;  %v6928_v19 = vld [vmem:[#allocation11 + $0x6a8] ss:$28 sps:$4 sm:$0xff]  }
 0x258   :  { %2375 = vmatprep.subr.bf16.mxu0 %v6856_v21  ;;  %v6929_v20 = vld [vmem:[#allocation11 + $0x168] ss:$28 sps:$4 sm:$0xff]  }
 0x259   :  { %v6930_v21 = vld [vmem:[#allocation11 + $0x4e8] ss:$28 sps:$4 sm:$0xff]  }
 0x25a   :  { %2335 = vmatpush1.bf16.msra.mxu1 %v6851_v22  ;;  %v6931_v22 = vld [vmem:[#allocation11 + $0x2f0] ss:$28 sps:$4 sm:$0xff]  }
 0x25b   :  { %2376 = vmatpush1.bf16.msra.mxu0 %v6854_v23  ;;  %2336 = vmatprep.subr.bf16.mxu1 %v6859_v24  ;;  %v6932_v23 = vld [vmem:[#allocation11 + $0x670] ss:$28 sps:$4 sm:$0xff]  }
 0x25c   :  { %2377 = vmatprep.subr.bf16.mxu0 %v6862_v25  ;;  %v6933_v24 = vld [vmem:[#allocation11 + $0x130] ss:$28 sps:$4 sm:$0xff]  }
 0x25d   :  { %v6934_v25 = vld [vmem:[#allocation11 + $0x4b0] ss:$28 sps:$4 sm:$0xff]  }
 0x25e   :  { %2337 = vmatpush1.bf16.msra.mxu1 %v6857_v26  ;;  %v6935_v26 = vld [vmem:[#allocation11 + $0x2b8] ss:$28 sps:$4 sm:$0xff]  }
 0x25f   :  { %2378 = vmatpush1.bf16.msra.mxu0 %v6860_v27  ;;  %2338 = vmatprep.subr.bf16.mxu1 %v6865_v28  ;;  %v6936_v27 = vld [vmem:[#allocation11 + $0x638] ss:$28 sps:$4 sm:$0xff]  }
 0x260   :  { %2379 = vmatprep.subr.bf16.mxu0 %v6868_v30  ;;  %v6937_v28 = vld [vmem:[#allocation11 + $0xf8] ss:$28 sps:$4 sm:$0xff]   ;;  %v6939_v30 = vld [vmem:[#allocation11 + $0x280] ss:$28 sps:$4 sm:$0xff]  }
 0x262   :  { %2339 = vmatpush1.bf16.msra.mxu1 %v6863_v32  ;;  %v6940_v32 = vld [vmem:[#allocation11 + $0x600] ss:$28 sps:$4 sm:$0xff]  }
 0x263   :  { %2380 = vmatpush1.bf16.msra.mxu0 %v6866_v33  ;;  %2340 = vmatprep.subr.bf16.mxu1 %v6871_v34  ;;  %v6942_v33 = vld [vmem:[#allocation11 + $0x440] ss:$28 sps:$4 sm:$0xff]   ;;  %v6943_v34 = vld [vmem:[#allocation11 + $0x248] ss:$28 sps:$4 sm:$0xff]  }
 0x264   :  { %2381 = vmatprep.subr.bf16.mxu0 %v6874_v35  ;;  %v6944_v35 = vld [vmem:[#allocation11 + $0x5c8] ss:$28 sps:$4 sm:$0xff]  }
 0x266   :  { %2341 = vmatpush1.bf16.msra.mxu1 %v6869_v36  ;;  %v6945_v36 = vld [vmem:[#allocation11 + $0x88] ss:$28 sps:$4 sm:$0xff]  }
 0x267   :  { %2382 = vmatpush1.bf16.msra.mxu0 %v6872_v37  ;;  %2342 = vmatprep.subr.bf16.mxu1 %v6877_v38  ;;  %v6946_v37 = vld [vmem:[#allocation11 + $0x408] ss:$28 sps:$4 sm:$0xff]   ;;  %v6947_v38 = vld [vmem:[#allocation11 + $0x210] ss:$28 sps:$4 sm:$0xff]  }
 0x268   :  { %2383 = vmatprep.subr.bf16.mxu0 %v6880_v39  ;;  %v6948_v39 = vld [vmem:[#allocation11 + $0x590] ss:$28 sps:$4 sm:$0xff]  }
 0x26a   :  { %2343 = vmatpush2.bf16.msra.mxu1 %v6875_v40  ;;  %v6949_v40 = vld [vmem:[#allocation11 + $0x50] ss:$28 sps:$4 sm:$0xff]  }
 0x26b   :  { %2384 = vmatpush2.bf16.msra.mxu0 %v6878_v41  ;;  %2344 = vmatprep.subr.bf16.mxu1 %v6883_v42  ;;  %v6950_v41 = vld [vmem:[#allocation11 + $0x3d0] ss:$28 sps:$4 sm:$0xff]   ;;  %v6951_v42 = vld [vmem:[#allocation11 + $0x1d8] ss:$28 sps:$4 sm:$0xff]  }
 0x26c   :  { %2385 = vmatprep.subr.bf16.mxu0 %v6886_v43  ;;  %v6952_v43 = vld [vmem:[#allocation11 + $0x558] ss:$28 sps:$4 sm:$0xff]  }
 0x26e   :  { %2345 = vmatpush2.bf16.msra.mxu1 %v6881_v44  ;;  %v6953_v44 = vld [vmem:[#allocation11 + $0x18] ss:$28 sps:$4 sm:$0xff]  }
 0x26f   :  { %2386 = vmatpush2.bf16.msra.mxu0 %v6884_v45  ;;  %2346 = vmatprep.subr.bf16.mxu1 %v6889_v46  ;;  %v6954_v45 = vld [vmem:[#allocation11 + $0x398] ss:$28 sps:$4 sm:$0xff]  }
 0x270   :  { %2387 = vmatprep.subr.bf16.mxu0 %v6892_v47  ;;  %v6957_v46 = vld [vmem:[#allocation14 + $0x18c] ss:$28 sps:$4 sm:$0xff]  }
 0x271   :  { %v6993_v47 = vld [vmem:[#allocation14 + $0x50c] ss:$28 sps:$4 sm:$0xff]  }
 0x272   :  { %2347 = vmatpush2.bf16.msra.mxu1 %v6887_v48  ;;  %v6955_v48 = vld [vmem:[#allocation14 + $0x188] ss:$28 sps:$4 sm:$0xff]  }
 0x273   :  { %2388 = vmatpush2.bf16.msra.mxu0 %v6890_v49  ;;  %2348 = vmatprep.subr.bf16.mxu1 %v6895_v50  ;;  %v6960_v49 = vld [vmem:[#allocation14 + $0x154] ss:$28 sps:$4 sm:$0xff]   ;;  %v6991_v50 = vld [vmem:[#allocation14 + $0x508] ss:$28 sps:$4 sm:$0xff]  }
 0x274   :  { %2389 = vmatprep.subr.bf16.mxu0 %v6898_v51  ;;  %v6999_v51 = vld [vmem:[#allocation14 + $0x4d4] ss:$28 sps:$4 sm:$0xff]  }
 0x276   :  { %2349 = vmatpush2.bf16.msra.mxu1 %v6893_v54  ;;  %v6958_v54 = vld [vmem:[#allocation14 + $0x150] ss:$28 sps:$4 sm:$0xff]  }
 0x277   :  { %2390 = vmatpush2.bf16.msra.mxu0 %v6896_v55  ;;  %2350 = vmatprep.subr.bf16.mxu1 %v6901_v58  ;;  %v6963_v55 = vld [vmem:[#allocation14 + $0x11c] ss:$28 sps:$4 sm:$0xff]   ;;  %v6997_v58 = vld [vmem:[#allocation14 + $0x4d0] ss:$28 sps:$4 sm:$0xff]  }
 0x278   :  { %2391 = vmatprep.subr.bf16.mxu0 %v6904_v59  ;;  %v7005_v59 = vld [vmem:[#allocation14 + $0x49c] ss:$28 sps:$4 sm:$0xff]  }
 0x27a   :  { %2351 = vmatpush2.bf16.msra.mxu1 %v6899_v60  ;;  %v6961_v60 = vld [vmem:[#allocation14 + $0x118] ss:$28 sps:$4 sm:$0xff]  }
 0x27b   :  { %2392 = vmatpush2.bf16.msra.mxu0 %v6902_v61  ;;  %2352 = vmatprep.subr.bf16.mxu1 %v6907_v62  ;;  %v6966_v61 = vld [vmem:[#allocation14 + $0xe4] ss:$28 sps:$4 sm:$0xff]   ;;  %v7003_v62 = vld [vmem:[#allocation14 + $0x498] ss:$28 sps:$4 sm:$0xff]  }
 0x27c   :  { %2393 = vmatprep.subr.bf16.mxu0 %v6910_v63  ;;  %v7011_v63 = vld [vmem:[#allocation14 + $0x464] ss:$28 sps:$4 sm:$0xff]  }
 0x27e   :  { %2353 = vmatpush2.bf16.msra.mxu1 %v6905_v1  ;;  %v7009_v1 = vld [vmem:[#allocation14 + $0x460] ss:$28 sps:$4 sm:$0xff]  }
 0x27f   :  { %2394 = vmatpush2.bf16.msra.mxu0 %v6908_v2  ;;  %2354 = vmatprep.subr.bf16.mxu1 %v6913_v3  ;;  %v7017_v2 = vld [vmem:[#allocation14 + $0x42c] ss:$28 sps:$4 sm:$0xff]  }
 0x280   :  { %2395 = vmatprep.subr.bf16.mxu0 %v6916_v4  ;;  %v6967_v3 = vld [vmem:[#allocation14 + $0xa8] ss:$28 sps:$4 sm:$0xff]   ;;  %v6972_v4 = vld [vmem:[#allocation14 + $0x74] ss:$28 sps:$4 sm:$0xff]  }
 0x282   :  { %2355 = vmatpush2.bf16.msra.mxu1 %v6911_v5  ;;  %v7015_v5 = vld [vmem:[#allocation14 + $0x428] ss:$28 sps:$4 sm:$0xff]  }
 0x283   :  { %2396 = vmatpush2.bf16.msra.mxu0 %v6914_v6  ;;  %2356 = vmatprep.subr.bf16.mxu1 %v6919_v7  ;;  %v7020_v6 = vld [vmem:[#allocation14 + $0x3f4] ss:$28 sps:$4 sm:$0xff]  }
 0x284   :  { %2397 = vmatprep.subr.bf16.mxu0 %v6922_v8  ;;  %v6970_v7 = vld [vmem:[#allocation14 + $0x70] ss:$28 sps:$4 sm:$0xff]   ;;  %v6975_v8 = vld [vmem:[#allocation14 + $0x3c] ss:$28 sps:$4 sm:$0xff]  }
 0x286   :  { %2357 = vmatpush2.bf16.msra.mxu1 %v6917_v10  ;;  %v7018_v10 = vld [vmem:[#allocation14 + $0x3f0] ss:$28 sps:$4 sm:$0xff]  }
 0x287   :  { %2398 = vmatpush2.bf16.msra.mxu0 %v6920_v13  ;;  %6378 = vmatprep.subr.bf16.mxu1 %v6923_v14  ;;  %v7023_v13 = vld [vmem:[#allocation14 + $0x3bc] ss:$28 sps:$4 sm:$0xff]  }
 0x288   :  { %6400 = vmatprep.subr.bf16.mxu0 %v6924_v15  ;;  %v6973_v14 = vld [vmem:[#allocation14 + $0x38] ss:$28 sps:$4 sm:$0xff]   ;;  %v6978_v15 = vld [vmem:[#allocation14 + $0x4] ss:$28 sps:$4 sm:$0xff]  }
 0x289   :  { %2359 = vmatmul.mubr.bf16.vlgmr.msra.gmra.mxu1 %v7862_v56 }
 0x28a   :  { %2400 = vmatmul.mubr.bf16.vlgmr.msra.gmra.mxu0 %v7864_v57  ;;  %6379 = vmatpush3.bf16.msra.mxu1 %v6925_v16  ;;  %v7021_v16 = vld [vmem:[#allocation14 + $0x3b8] ss:$28 sps:$4 sm:$0xff]  }
 0x28b   :  { %2440 = vmatprep.mubr.bf16.mxu1 %v7858_v52  ;;  %6401 = vmatpush3.bf16.msra.mxu0 %v6926_v17  ;;  %v6938_v52 = vld [vmem:[#allocation11 + $0x478] ss:$28 sps:$4 sm:$0xff]   ;;  %v7026_v17 = vld [vmem:[#allocation14 + $0x384] ss:$28 sps:$4 sm:$0xff]  }
 0x28c   :  { %2480 = vmatprep.mubr.bf16.mxu0 %v7860_v53  ;;  %6380 = vmatprep.subr.bf16.mxu1 %v6927_v18  ;;  %v6941_v53 = vld [vmem:[#allocation11 + $0xc0] ss:$28 sps:$4 sm:$0xff]   ;;  %v6976_v18 = vld [vmem:[#allocation14] ss:$28 sps:$4 sm:$0xff]  }
 0x28d   :  { %6402 = vmatprep.subr.bf16.mxu0 %v6928_v19  ;;  %v6981_v19 = vld [vmem:[#allocation14 + $0x34c] ss:$28 sps:$4 sm:$0xff]  }
 0x28e   :  { %6381 = vmatpush3.bf16.msra.mxu1 %v6929_v20  ;;  %v7024_v20 = vld [vmem:[#allocation14 + $0x380] ss:$28 sps:$4 sm:$0xff]  }
 0x28f   :  { %6403 = vmatpush3.bf16.msra.mxu0 %v6930_v21  ;;  %6382 = vmatprep.subr.bf16.mxu1 %v6931_v22  ;;  %v7029_v21 = vld [vmem:[#allocation14 + $0x6cc] ss:$28 sps:$4 sm:$0xff]  }
 0x290   :  { %6404 = vmatprep.subr.bf16.mxu0 %v6932_v23  ;;  %v6979_v22 = vld [vmem:[#allocation14 + $0x348] ss:$28 sps:$4 sm:$0xff]   ;;  %v7882_v23 = vld [vmem:[#allocation13] sm:$0xff] }
 0x292   :  { %6383 = vmatpush3.bf16.msra.mxu1 %v6933_v24  ;;  %v6984_v24 = vld [vmem:[#allocation14 + $0x314] ss:$28 sps:$4 sm:$0xff]  }
 0x293   :  { %6405 = vmatpush3.bf16.msra.mxu0 %v6934_v25  ;;  %6384 = vmatprep.subr.bf16.mxu1 %v6935_v26  ;;  %v7027_v25 = vld [vmem:[#allocation14 + $0x6c8] ss:$28 sps:$4 sm:$0xff]   ;;  %v982_v26 = vrot.slane %v7882_v23, %v7844_v12 }
 0x294   :  { %6406 = vmatprep.subr.bf16.mxu0 %v6936_v27  ;;  %v7032_v27 = vld [vmem:[#allocation14 + $0x694] ss:$28 sps:$4 sm:$0xff]  }
 0x296   :  { %6385 = vmatpush3.bf16.msra.mxu1 %v6937_v28 }
 0x297   :  { %6407 = vmatpush3.bf16.msra.mxu0 %v6938_v52  ;;  %6386 = vmatprep.subr.bf16.mxu1 %v6939_v30  ;;  %v6982_v30 = vld [vmem:[#allocation14 + $0x310] ss:$28 sps:$4 sm:$0xff]  }
 0x298   :  { %6408 = vmatprep.subr.bf16.mxu0 %v6940_v32 }
 0x29a   :  { %6387 = vmatpush3.bf16.msra.mxu1 %v6941_v53 }
 0x29b   :  { %6409 = vmatpush3.bf16.msra.mxu0 %v6942_v33  ;;  %6388 = vmatprep.subr.bf16.mxu1 %v6943_v34  ;;  %v6987_v33 = vld [vmem:[#allocation14 + $0x2dc] ss:$28 sps:$4 sm:$0xff]   ;;  %v7030_v34 = vld [vmem:[#allocation14 + $0x690] ss:$28 sps:$4 sm:$0xff]  }
 0x29c   :  { %6410 = vmatprep.subr.bf16.mxu0 %v6944_v35 }
 0x29e   :  { %6389 = vmatpush3.bf16.msra.mxu1 %v6945_v36  ;;  %v7035_v36 = vld [vmem:[#allocation14 + $0x65c] ss:$28 sps:$4 sm:$0xff]  }
 0x29f   :  { %6411 = vmatpush3.bf16.msra.mxu0 %v6946_v37  ;;  %6390 = vmatprep.subr.bf16.mxu1 %v6947_v38 }
 0x2a0   :  { %6412 = vmatprep.subr.bf16.mxu0 %v6948_v39 }
 0x2a2   :  { %6391 = vmatpush3.bf16.msra.mxu1 %v6949_v40  ;;  %v6985_v40 = vld [vmem:[#allocation14 + $0x2d8] ss:$28 sps:$4 sm:$0xff]  }
 0x2a3   :  { %6413 = vmatpush3.bf16.msra.mxu0 %v6950_v41  ;;  %6392 = vmatprep.subr.bf16.mxu1 %v6951_v42 }
 0x2a4   :  { %6414 = vmatprep.subr.bf16.mxu0 %v6952_v43  ;;  %v6990_v43 = vld [vmem:[#allocation14 + $0x2a4] ss:$28 sps:$4 sm:$0xff]  }
 0x2a6   :  { %6393 = vmatpush3.bf16.msra.mxu1 %v6953_v44  ;;  %v7033_v44 = vld [vmem:[#allocation14 + $0x658] ss:$28 sps:$4 sm:$0xff]  }
 0x2a7   :  { %6415 = vmatpush3.bf16.msra.mxu0 %v6954_v45  ;;  %5003 = vmatprep.subr.bf16.mxu1 %v6957_v46  ;;  %v7038_v46 = vld [vmem:[#allocation14 + $0x624] ss:$28 sps:$4 sm:$0xff]  }
 0x2a8   :  { %5044 = vmatprep.subr.bf16.mxu0 %v6993_v47 }
 0x2a9   :  { %2441 = vmatmul.mubr.bf16.vlgmr.msra.gmra.mxu1 %v7862_v56  ;;  %v6964_v56 = vld [vmem:[#allocation14 + $0xe0] ss:$28 sps:$4 sm:$0xff]  }
 0x2aa   :  { %2481 = vmatmul.mubr.bf16.vlgmr.msra.gmra.mxu0 %v7864_v57  ;;  %5004 = vmatpush1.bf16.msra.mxu1 %v6955_v48  ;;  %v6969_v57 = vld [vmem:[#allocation14 + $0xac] ss:$28 sps:$4 sm:$0xff]   ;;  %v6988_v48 = vld [vmem:[#allocation14 + $0x2a0] ss:$28 sps:$4 sm:$0xff]  }
 0x2ab   :  { %5005 = vmatprep.subr.bf16.mxu1 %v6960_v49  ;;  %5045 = vmatpush1.bf16.msra.mxu0 %v6991_v50  ;;  %v6996_v49 = vld [vmem:[#allocation14 + $0x26c] ss:$28 sps:$4 sm:$0xff]   ;;  %v7036_v50 = vld [vmem:[#allocation14 + $0x620] ss:$28 sps:$4 sm:$0xff]  }
 0x2ac   :  { %5046 = vmatprep.subr.bf16.mxu0 %v6999_v51  ;;  %v7041_v51 = vld [vmem:[#allocation14 + $0x5ec] ss:$28 sps:$4 sm:$0xff]  }
 0x2ae   :  { %5006 = vmatpush1.bf16.msra.mxu1 %v6958_v54  ;;  %v6994_v54 = vld [vmem:[#allocation14 + $0x268] ss:$28 sps:$4 sm:$0xff]  }
 0x2af   :  { %5007 = vmatprep.subr.bf16.mxu1 %v6963_v55  ;;  %5047 = vmatpush1.bf16.msra.mxu0 %v6997_v58  ;;  %v978_v55 = vrot.slane %v7882_v23, %v7841_v11  ;;  %v7002_v58 = vld [vmem:[#allocation14 + $0x234] ss:$28 sps:$4 sm:$0xff]  }
 0x2b0   :  { %5048 = vmatprep.subr.bf16.mxu0 %v7005_v59  ;;  %v7039_v59 = vld [vmem:[#allocation14 + $0x5e8] ss:$28 sps:$4 sm:$0xff]  }
 0x2b2   :  { %5008 = vmatpush1.bf16.msra.mxu1 %v6961_v60  ;;  %v7044_v60 = vld [vmem:[#allocation14 + $0x5b4] ss:$28 sps:$4 sm:$0xff]  }
 0x2b3   :  { %5009 = vmatprep.subr.bf16.mxu1 %v6966_v61  ;;  %5049 = vmatpush1.bf16.msra.mxu0 %v7003_v62  ;;  %v7000_v61 = vld [vmem:[#allocation14 + $0x230] ss:$28 sps:$4 sm:$0xff]  }
 0x2b4   :  { %5050 = vmatprep.subr.bf16.mxu0 %v7011_v63  ;;  %v7008_v63 = vld [vmem:[#allocation14 + $0x1fc] ss:$28 sps:$4 sm:$0xff]  }
 0x2b6   :  { %5010 = vmatpush1.bf16.msra.mxu1 %v6964_v56  ;;  %v7042_v56 = vld [vmem:[#allocation14 + $0x5b0] ss:$28 sps:$4 sm:$0xff]  }
 0x2b7   :  { %5011 = vmatprep.subr.bf16.mxu1 %v6969_v57  ;;  %5051 = vmatpush1.bf16.msra.mxu0 %v7009_v1  ;;  %v7047_v57 = vld [vmem:[#allocation14 + $0x57c] ss:$28 sps:$4 sm:$0xff]  }
 0x2b8   :  { %5052 = vmatprep.subr.bf16.mxu0 %v7017_v2  ;;  %v7006_v1 = vld [vmem:[#allocation14 + $0x1f8] ss:$28 sps:$4 sm:$0xff]  }
 0x2ba   :  { %5012 = vmatpush1.bf16.msra.mxu1 %v6967_v3  ;;  %v7014_v3 = vld [vmem:[#allocation14 + $0x1c4] ss:$28 sps:$4 sm:$0xff]  }
 0x2bb   :  { %5013 = vmatprep.subr.bf16.mxu1 %v6972_v4  ;;  %5053 = vmatpush1.bf16.msra.mxu0 %v7015_v5  ;;  %v7045_v4 = vld [vmem:[#allocation14 + $0x578] ss:$28 sps:$4 sm:$0xff]   ;;  %v7050_v5 = vld [vmem:[#allocation14 + $0x544] ss:$28 sps:$4 sm:$0xff]  }
 0x2bc   :  { %5054 = vmatprep.subr.bf16.mxu0 %v7020_v6  ;;  %v7012_v6 = vld [vmem:[#allocation14 + $0x1c0] ss:$28 sps:$4 sm:$0xff]  }
 0x2be   :  { %5014 = vmatpush1.bf16.msra.mxu1 %v6970_v7 }
 0x2bf   :  { %5015 = vmatprep.subr.bf16.mxu1 %v6975_v8  ;;  %5055 = vmatpush1.bf16.msra.mxu0 %v7018_v10  ;;  %v7048_v8 = vld [vmem:[#allocation14 + $0x540] ss:$28 sps:$4 sm:$0xff]   ;;  %v7053_v10 = vld [vmem:[#allocation14 + $0x88c] ss:$28 sps:$4 sm:$0xff]  }
 0x2c0   :  { %5056 = vmatprep.subr.bf16.mxu0 %v7023_v13  ;;  %v7104_v13 = vld [vmem:[#allocation14 + $0xc0c] ss:$28 sps:$4 sm:$0xff]  }
 0x2c2   :  { %5016 = vmatpush1.bf16.msra.mxu1 %v6973_v14  ;;  %v7051_v14 = vld [vmem:[#allocation14 + $0x888] ss:$28 sps:$4 sm:$0xff]  }
 0x2c3   :  { %5017 = vmatprep.subr.bf16.mxu1 %v6978_v15  ;;  %5057 = vmatpush1.bf16.msra.mxu0 %v7021_v16  ;;  %v7056_v16 = vld [vmem:[#allocation14 + $0x854] ss:$28 sps:$4 sm:$0xff]  }
 0x2c4   :  { %5058 = vmatprep.subr.bf16.mxu0 %v7026_v17  ;;  %v7054_v17 = vld [vmem:[#allocation14 + $0x850] ss:$28 sps:$4 sm:$0xff]  }
 0x2c6   :  { %5018 = vmatpush1.bf16.msra.mxu1 %v6976_v18  ;;  %v7059_v18 = vld [vmem:[#allocation14 + $0x81c] ss:$28 sps:$4 sm:$0xff]  }
 0x2c7   :  { %5019 = vmatprep.subr.bf16.mxu1 %v6981_v19  ;;  %5059 = vmatpush1.bf16.msra.mxu0 %v7024_v20  ;;  %v7057_v19 = vld [vmem:[#allocation14 + $0x818] ss:$28 sps:$4 sm:$0xff]   ;;  %v7062_v20 = vld [vmem:[#allocation14 + $0x7e4] ss:$28 sps:$4 sm:$0xff]  }
 0x2c8   :  { %5060 = vmatprep.subr.bf16.mxu0 %v7029_v21  ;;  %v7060_v21 = vld [vmem:[#allocation14 + $0x7e0] ss:$28 sps:$4 sm:$0xff]  }
 0x2c9   :  { %v2196_v28 = vpop.f32.mrf.mxu1  ;;  %v2237_v52 = vpop.f32.mrf.mxu0 }
 0x2ca   :  { %5020 = vmatpush2.bf16.msra.mxu1 %v6979_v22  ;;  %v2197_v62 = vadd.f32 %v2196_v28, %v978_v55  ;;  %v7065_v22 = vld [vmem:[#allocation14 + $0x7ac] ss:$28 sps:$4 sm:$0xff]   ;;  %v7069_v28 = vld [vmem:[#allocation14 + $0x738] ss:$28 sps:$4 sm:$0xff]   ;;  %v7086_v55 = vld [vmem:[#allocation14 + $0x9a4] ss:$28 sps:$4 sm:$0xff]  }
 0x2cb   :  { %v2198_v32 = vpop.f32.mrf.mxu1  ;;  %v2239_v53 = vpop.f32.mrf.mxu0  ;;  %5021 = vmatprep.subr.bf16.mxu1 %v6984_v24  ;;  %5061 = vmatpush2.bf16.msra.mxu0 %v7027_v25  ;;  %v7063_v24 = vld [vmem:[#allocation14 + $0x7a8] ss:$28 sps:$4 sm:$0xff]   ;;  %v7068_v25 = vld [vmem:[#allocation14 + $0x774] ss:$28 sps:$4 sm:$0xff]  }
 0x2cc   :  { %v2199_v35 = vadd.f32 %v2198_v32, %v982_v26  ;;  %5062 = vmatprep.subr.bf16.mxu0 %v7032_v27  ;;  %v2238_v2 = vadd.f32 %v2237_v52, %v2197_v62  ;;  %v7066_v26 = vld [vmem:[#allocation14 + $0x770] ss:$28 sps:$4 sm:$0xff]   ;;  %v7071_v27 = vld [vmem:[#allocation14 + $0x73c] ss:$28 sps:$4 sm:$0xff]   ;;  %v7074_v52 = vld [vmem:[#allocation14 + $0x704] ss:$28 sps:$4 sm:$0xff]  }
 0x2cd   :  { %v2200_v37 = vpop.f32.mrf.mxu1  ;;  %v2241_v38 = vpop.f32.mrf.mxu0  ;;  %v7077_v32 = vld [vmem:[#allocation14 + $0xa4c] ss:$28 sps:$4 sm:$0xff]  }
 0x2ce   :  { %v2240_v39 = vadd.f32 %v2239_v53, %v2199_v35  ;;  %5022 = vmatpush2.bf16.msra.mxu1 %v6982_v30  ;;  %v2488_v7 = vmax.f32 %v2238_v2, 0.0  ;;  %v7072_v30 = vld [vmem:[#allocation14 + $0x700] ss:$28 sps:$4 sm:$0xff]   ;;  %v986_v53 = vrot.slane %v7882_v23, %v7849_v29  ;;  %v990_v35 = vrot.slane %v7882_v23, %v7852_v31  ;;  %v7092_v2 = vld [vmem:[#allocation14 + $0x934] ss:$28 sps:$4 sm:$0xff]  }
 0x2cf   :  { %v2201_v41 = vpop.f32.mrf.mxu1  ;;  %v2242_v42 = vpop.f32.mrf.mxu0  ;;  %5023 = vmatprep.subr.bf16.mxu1 %v6987_v33  ;;  %5063 = vmatpush2.bf16.msra.mxu0 %v7030_v34  ;;  %v7075_v33 = vld [vmem:[#allocation14 + $0xa48] ss:$28 sps:$4 sm:$0xff]   ;;  %v7080_v34 = vld [vmem:[#allocation14 + $0xa14] ss:$28 sps:$4 sm:$0xff]  }
 0x2d0   :  { %v2489_v45 = vmax.f32 %v2240_v39, 0.0  ;;  %5064 = vmatprep.subr.bf16.mxu0 %v7035_v36  ;;  %v7891_v15 = vpack.c.bf16 %v2488_v7, %v2488_v7  ;;  %v7078_v39 = vld [vmem:[#allocation14 + $0xa10] ss:$28 sps:$4 sm:$0xff]   ;;  %v7083_v42 = vld [vmem:[#allocation14 + $0x9dc] ss:$28 sps:$4 sm:$0xff]  }
 0x2d1   :  { %v7122_v7 = vld [vmem:[#allocation14 + $0xb64] ss:$28 sps:$4 sm:$0xff]  }
 0x2d2   :  { %v7886_v47 = vpack.c.bf16 %v2489_v45, %v2489_v45  ;;  %5024 = vmatpush2.bf16.msra.mxu1 %v6985_v40 }
 0x2d3   :  { %5025 = vmatprep.subr.bf16.mxu1 %v6990_v43  ;;  %5065 = vmatpush2.bf16.msra.mxu0 %v7033_v44 }
 0x2d4   :  { %5035 = vmatprep.mubr.bf16.mxu1 %v7886_v47  ;;  %5066 = vmatprep.subr.bf16.mxu0 %v7038_v46 }
 0x2d6   :  { %5026 = vmatpush2.bf16.msra.mxu1 %v6988_v48 }
 0x2d7   :  { %5027 = vmatprep.subr.bf16.mxu1 %v6996_v49  ;;  %5067 = vmatpush2.bf16.msra.mxu0 %v7036_v50  ;;  %v7081_v49 = vld [vmem:[#allocation14 + $0x9d8] ss:$28 sps:$4 sm:$0xff]  }
 0x2d8   :  { %5068 = vmatprep.subr.bf16.mxu0 %v7041_v51 }
 0x2da   :  { %5028 = vmatpush2.bf16.msra.mxu1 %v6994_v54 }
 0x2db   :  { %5029 = vmatprep.subr.bf16.mxu1 %v7002_v58  ;;  %5069 = vmatpush2.bf16.msra.mxu0 %v7039_v59 }
 0x2dc   :  { %5070 = vmatprep.subr.bf16.mxu0 %v7044_v60  ;;  %v7084_v60 = vld [vmem:[#allocation14 + $0x9a0] ss:$28 sps:$4 sm:$0xff]  }
 0x2de   :  { %5030 = vmatpush2.bf16.msra.mxu1 %v7000_v61  ;;  %v7102_v61 = vld [vmem:[#allocation14 + $0xc08] ss:$28 sps:$4 sm:$0xff]  }
 0x2df   :  { %5031 = vmatprep.subr.bf16.mxu1 %v7008_v63  ;;  %5071 = vmatpush2.bf16.msra.mxu0 %v7042_v56  ;;  %v7089_v63 = vld [vmem:[#allocation14 + $0x96c] ss:$28 sps:$4 sm:$0xff]   ;;  %v7110_v56 = vld [vmem:[#allocation14 + $0xbd4] ss:$28 sps:$4 sm:$0xff]  }
 0x2e0   :  { %5072 = vmatprep.subr.bf16.mxu0 %v7047_v57  ;;  %v7087_v57 = vld [vmem:[#allocation14 + $0x968] ss:$28 sps:$4 sm:$0xff]  }
 0x2e2   :  { %5032 = vmatpush2.bf16.msra.mxu1 %v7006_v1  ;;  %v7108_v1 = vld [vmem:[#allocation14 + $0xbd0] ss:$28 sps:$4 sm:$0xff]  }
 0x2e3   :  { %5033 = vmatprep.subr.bf16.mxu1 %v7014_v3  ;;  %5073 = vmatpush2.bf16.msra.mxu0 %v7045_v4  ;;  %v7116_v3 = vld [vmem:[#allocation14 + $0xb9c] ss:$28 sps:$4 sm:$0xff]   ;;  %v7090_v4 = vld [vmem:[#allocation14 + $0x930] ss:$28 sps:$4 sm:$0xff]  }
 0x2e4   :  { %5074 = vmatprep.subr.bf16.mxu0 %v7050_v5  ;;  %v7114_v5 = vld [vmem:[#allocation14 + $0xb98] ss:$28 sps:$4 sm:$0xff]  }
 0x2e6   :  { %5034 = vmatpush2.bf16.msra.mxu1 %v7012_v6  ;;  %v7095_v6 = vld [vmem:[#allocation14 + $0x8fc] ss:$28 sps:$4 sm:$0xff]  }
 0x2e7   :  { %5075 = vmatpush2.bf16.msra.mxu0 %v7048_v8  ;;  %5085 = vmatprep.subr.bf16.mxu1 %v7053_v10  ;;  %v7093_v8 = vld [vmem:[#allocation14 + $0x8f8] ss:$28 sps:$4 sm:$0xff]   ;;  %v7120_v10 = vld [vmem:[#allocation14 + $0xb60] ss:$28 sps:$4 sm:$0xff]  }
 0x2e8   :  { %5126 = vmatprep.subr.bf16.mxu0 %v7104_v13  ;;  %v7098_v13 = vld [vmem:[#allocation14 + $0x8c4] ss:$28 sps:$4 sm:$0xff]  }
 0x2e9   :  { %5036 = vmatmul.mubr.bf16.vlgmr.msra.gmra.mxu1 %v7891_v15 }
 0x2ea   :  { %5086 = vmatpush1.bf16.msra.mxu1 %v7051_v14  ;;  %v7128_v14 = vld [vmem:[#allocation14 + $0xb2c] ss:$28 sps:$4 sm:$0xff]  }
 0x2eb   :  { %5087 = vmatprep.subr.bf16.mxu1 %v7056_v16  ;;  %v7096_v16 = vld [vmem:[#allocation14 + $0x8c0] ss:$28 sps:$4 sm:$0xff]  }
 0x2ee   :  { %5088 = vmatpush1.bf16.msra.mxu1 %v7054_v17  ;;  %v7126_v17 = vld [vmem:[#allocation14 + $0xb28] ss:$28 sps:$4 sm:$0xff]  }
 0x2ef   :  { %5089 = vmatprep.subr.bf16.mxu1 %v7059_v18  ;;  %v7101_v18 = vld [vmem:[#allocation14 + $0x514] ss:$28 sps:$4 sm:$0xff]  }
 0x2f2   :  { %5090 = vmatpush1.bf16.msra.mxu1 %v7057_v19  ;;  %v7134_v19 = vld [vmem:[#allocation14 + $0xaf4] ss:$28 sps:$4 sm:$0xff]  }
 0x2f3   :  { %5091 = vmatprep.subr.bf16.mxu1 %v7062_v20  ;;  %v7132_v20 = vld [vmem:[#allocation14 + $0xaf0] ss:$28 sps:$4 sm:$0xff]  }
 0x2f6   :  { %5092 = vmatpush1.bf16.msra.mxu1 %v7060_v21  ;;  %v7140_v21 = vld [vmem:[#allocation14 + $0xabc] ss:$28 sps:$4 sm:$0xff]  }
 0x2f7   :  { %5093 = vmatprep.subr.bf16.mxu1 %v7065_v22  ;;  %v7138_v22 = vld [vmem:[#allocation14 + $0xab8] ss:$28 sps:$4 sm:$0xff]  }
 0x2fa   :  { %5094 = vmatpush1.bf16.msra.mxu1 %v7063_v24  ;;  %v7146_v24 = vld [vmem:[#allocation14 + $0xa84] ss:$28 sps:$4 sm:$0xff]  }
 0x2fb   :  { %5095 = vmatprep.subr.bf16.mxu1 %v7068_v25  ;;  %v7144_v25 = vld [vmem:[#allocation14 + $0xa80] ss:$28 sps:$4 sm:$0xff]  }
 0x2fe   :  { %5096 = vmatpush1.bf16.msra.mxu1 %v7066_v26  ;;  %v7152_v26 = vld [vmem:[#allocation14 + $0x194] ss:$28 sps:$4 sm:$0xff]  }
 0x2ff   :  { %5097 = vmatprep.subr.bf16.mxu1 %v7071_v27  ;;  %v993_v27 = vsub.s32 4, %v7838_v9 }
 0x302   :  { %5098 = vmatpush1.bf16.msra.mxu1 %v7069_v28  ;;  %v997_v28 = vsub.s32 5, %v7838_v9 }
 0x303   :  { %5099 = vmatprep.subr.bf16.mxu1 %v7074_v52  ;;  %v994_v52 = vrot.slane %v7882_v23, %v993_v27 }
 0x306   :  { %5100 = vmatpush1.bf16.msra.mxu1 %v7072_v30  ;;  %v998_v30 = vrot.slane %v7882_v23, %v997_v28 }
 0x307   :  { %5101 = vmatprep.subr.bf16.mxu1 %v7077_v32 }
 0x309   :  { %v2278_v36 = vpop.f32.mrf.mxu1  ;;  %v2319_v37 = vpop.f32.mrf.mxu0 }
 0x30a   :  { %v2279_v38 = vadd.f32 %v2278_v36, %v986_v53  ;;  %5102 = vmatpush2.bf16.msra.mxu1 %v7075_v33 }
 0x30b   :  { %v2280_v40 = vpop.f32.mrf.mxu1  ;;  %v2321_v41 = vpop.f32.mrf.mxu0  ;;  %5103 = vmatprep.subr.bf16.mxu1 %v7080_v34 }
 0x30c   :  { %v2320_v43 = vadd.f32 %v2319_v37, %v2279_v38  ;;  %v2281_v44 = vadd.f32 %v2280_v40, %v990_v35 }
 0x30d   :  { %v2282_v45 = vpop.f32.mrf.mxu1  ;;  %v2323_v46 = vpop.f32.mrf.mxu0 }
 0x30e   :  { %v2322_v48 = vadd.f32 %v2321_v41, %v2281_v44  ;;  %5104 = vmatpush2.bf16.msra.mxu1 %v7078_v39  ;;  %v2490_v50 = vmax.f32 %v2320_v43, 0.0  ;;  %v7099_v46 = vld [vmem:[#allocation14 + $0x510] ss:$28 sps:$4 sm:$0xff]  }
 0x30f   :  { %v2283_v51 = vpop.f32.mrf.mxu1  ;;  %v2324_v54 = vpop.f32.mrf.mxu0  ;;  %5105 = vmatprep.subr.bf16.mxu1 %v7083_v42 }
 0x310   :  { %v2491_v58 = vmax.f32 %v2322_v48, 0.0  ;;  %v7900_v62 = vpack.c.bf16 %v2490_v50, %v2490_v50  ;;  %v7105_v50 = vld [vmem:[#allocation14 + $0x4d8] ss:$28 sps:$4 sm:$0xff]   ;;  %v7113_v51 = vld [vmem:[#allocation14 + $0x4a4] ss:$28 sps:$4 sm:$0xff]  }
 0x311   :  { %v7111_v54 = vld [vmem:[#allocation14 + $0x4a0] ss:$28 sps:$4 sm:$0xff]  }
 0x312   :  { %v7898_v59 = vpack.c.bf16 %v2491_v58, %v2491_v58  ;;  %5106 = vmatpush2.bf16.msra.mxu1 %v7081_v49  ;;  %v7107_v49 = vld [vmem:[#allocation14 + $0x4dc] ss:$28 sps:$4 sm:$0xff]   ;;  %v7117_v58 = vld [vmem:[#allocation14 + $0x468] ss:$28 sps:$4 sm:$0xff]  }
 0x313   :  { %5107 = vmatprep.subr.bf16.mxu1 %v7086_v55  ;;  %v7119_v55 = vld [vmem:[#allocation14 + $0x46c] ss:$28 sps:$4 sm:$0xff]  }
 0x314   :  { %5076 = vmatprep.mubr.bf16.mxu0 %v7898_v59 }
 0x315   :  { %5077 = vmatmul.mubr.bf16.vlgmr.msra.gmra.mxu0 %v7900_v62 }
 0x316   :  { %5108 = vmatpush2.bf16.msra.mxu1 %v7084_v60  ;;  %5127 = vmatpush1.bf16.msra.mxu0 %v7102_v61  ;;  %v7125_v60 = vld [vmem:[#allocation14 + $0x434] ss:$28 sps:$4 sm:$0xff]  }
 0x317   :  { %5109 = vmatprep.subr.bf16.mxu1 %v7089_v63  ;;  %5128 = vmatprep.subr.bf16.mxu0 %v7110_v56  ;;  %v7123_v61 = vld [vmem:[#allocation14 + $0x430] ss:$28 sps:$4 sm:$0xff]   ;;  %v7131_v63 = vld [vmem:[#allocation14 + $0x3fc] ss:$28 sps:$4 sm:$0xff]  }
 0x318   :  { %5158 = vmatprep.mubr.bf16.mxu0 %v7756_v0  ;;  %v7129_v56 = vld [vmem:[#allocation14 + $0x3f8] ss:$28 sps:$4 sm:$0xff]  }
 0x31a   :  { %5110 = vmatpush2.bf16.msra.mxu1 %v7087_v57  ;;  %5129 = vmatpush1.bf16.msra.mxu0 %v7108_v1  ;;  %v1001_v57 = vsub.s32 6, %v7838_v9  ;;  %v7137_v1 = vld [vmem:[#allocation14 + $0x3c4] ss:$28 sps:$4 sm:$0xff]  }
 0x31b   :  { %5111 = vmatprep.subr.bf16.mxu1 %v7092_v2  ;;  %5130 = vmatprep.subr.bf16.mxu0 %v7116_v3 }
 0x31e   :  { %5112 = vmatpush2.bf16.msra.mxu1 %v7090_v4  ;;  %5131 = vmatpush1.bf16.msra.mxu0 %v7114_v5  ;;  %v1002_v4 = vrot.slane %v7882_v23, %v1001_v57  ;;  %v7135_v5 = vld [vmem:[#allocation14 + $0x3c0] ss:$28 sps:$4 sm:$0xff]   ;;  %v7147_v23 = vld [vmem:[#allocation14 + $0x6d0] ss:$28 sps:$4 sm:$0xff]  }
 0x31f   :  { %5113 = vmatprep.subr.bf16.mxu1 %v7095_v6  ;;  %5132 = vmatprep.subr.bf16.mxu0 %v7122_v7  ;;  %v7143_v7 = vld [vmem:[#allocation14 + $0x38c] ss:$28 sps:$4 sm:$0xff]  }
 0x322   :  { %5114 = vmatpush2.bf16.msra.mxu1 %v7093_v8  ;;  %5133 = vmatpush1.bf16.msra.mxu0 %v7120_v10 }
 0x323   :  { %5115 = vmatprep.subr.bf16.mxu1 %v7098_v13  ;;  %5134 = vmatprep.subr.bf16.mxu0 %v7128_v14 }
 0x326   :  { %5116 = vmatpush2.bf16.msra.mxu1 %v7096_v16  ;;  %5135 = vmatpush1.bf16.msra.mxu0 %v7126_v17 }
 0x327   :  { %5208 = vmatprep.subr.bf16.mxu1 %v7101_v18  ;;  %5136 = vmatprep.subr.bf16.mxu0 %v7134_v19  ;;  %v7141_v18 = vld [vmem:[#allocation14 + $0x388] ss:$28 sps:$4 sm:$0xff]  }
 0x32a   :  { %5137 = vmatpush1.bf16.msra.mxu0 %v7132_v20  ;;  %v7149_v20 = vld [vmem:[#allocation14 + $0x6d4] ss:$28 sps:$4 sm:$0xff]  }
 0x32b   :  { %5138 = vmatprep.subr.bf16.mxu0 %v7140_v21 }
 0x32e   :  { %5139 = vmatpush1.bf16.msra.mxu0 %v7138_v22 }
 0x32f   :  { %5140 = vmatprep.subr.bf16.mxu0 %v7146_v24 }
 0x332   :  { %5141 = vmatpush1.bf16.msra.mxu0 %v7144_v25  ;;  %v7150_v25 = vld [vmem:[#allocation14 + $0x190] ss:$28 sps:$4 sm:$0xff]  }
 0x333   :  { %5167 = vmatprep.subr.bf16.mxu0 %v7152_v26 }
 0x349   :  { %v2360_v32 = vpop.f32.mrf.mxu1 }
 0x34a   :  { %v2361_v53 = vadd.f32 %v2360_v32, %v994_v52  ;;  %v2401_v33 = vpop.f32.mrf.mxu0  ;;  %v7155_v52 = vld [vmem:[#allocation14 + $0x69c] ss:$28 sps:$4 sm:$0xff]  }
 0x34b   :  { %v2362_v34 = vpop.f32.mrf.mxu1  ;;  %v7153_v32 = vld [vmem:[#allocation14 + $0x698] ss:$28 sps:$4 sm:$0xff]  }
 0x34c   :  { %v2402_v35 = vadd.f32 %v2401_v33, %v2361_v53  ;;  %v2363_v36 = vadd.f32 %v2362_v34, %v998_v30  ;;  %v2403_v37 = vpop.f32.mrf.mxu0  ;;  %v7158_v30 = vld [vmem:[#allocation14 + $0x15c] ss:$28 sps:$4 sm:$0xff]   ;;  %v7161_v33 = vld [vmem:[#allocation14 + $0x664] ss:$28 sps:$4 sm:$0xff]  }
 0x34d   :  { %v2364_v38 = vpop.f32.mrf.mxu1  ;;  %v7156_v53 = vld [vmem:[#allocation14 + $0x158] ss:$28 sps:$4 sm:$0xff]   ;;  %v7164_v34 = vld [vmem:[#allocation14 + $0x124] ss:$28 sps:$4 sm:$0xff]  }
 0x34e   :  { %v2404_v39 = vadd.f32 %v2403_v37, %v2363_v36  ;;  %v2405_v40 = vpop.f32.mrf.mxu0  ;;  %v2492_v41 = vmax.f32 %v2402_v35, 0.0  ;;  %v7159_v35 = vld [vmem:[#allocation14 + $0x660] ss:$28 sps:$4 sm:$0xff]   ;;  %v7167_v37 = vld [vmem:[#allocation14 + $0x62c] ss:$28 sps:$4 sm:$0xff]  }
 0x34f   :  { %v2365_v42 = vpop.f32.mrf.mxu1  ;;  %v7162_v36 = vld [vmem:[#allocation14 + $0x120] ss:$28 sps:$4 sm:$0xff]   ;;  %v7170_v38 = vld [vmem:[#allocation14 + $0xec] ss:$28 sps:$4 sm:$0xff]  }
 0x350   :  { %v2493_v43 = vmax.f32 %v2404_v39, 0.0  ;;  %v2406_v44 = vpop.f32.mrf.mxu0  ;;  %v7915_v48 = vpack.c.bf16 %v2492_v41, %v2492_v41  ;;  %v7165_v39 = vld [vmem:[#allocation14 + $0x628] ss:$28 sps:$4 sm:$0xff]   ;;  %v7173_v41 = vld [vmem:[#allocation14 + $0x5f4] ss:$28 sps:$4 sm:$0xff]  }
 0x351   :  { %v7168_v40 = vld [vmem:[#allocation14 + $0xe8] ss:$28 sps:$4 sm:$0xff]   ;;  %v7176_v42 = vld [vmem:[#allocation14 + $0xb4] ss:$28 sps:$4 sm:$0xff]  }
 0x352   :  { %v7913_v45 = vpack.c.bf16 %v2493_v43, %v2493_v43  ;;  %v7171_v43 = vld [vmem:[#allocation14 + $0x5f0] ss:$28 sps:$4 sm:$0xff]  }
 0x353   :  { %v7174_v44 = vld [vmem:[#allocation14 + $0xb0] ss:$28 sps:$4 sm:$0xff]  }
 0x354   :  { %5117 = vmatprep.mubr.bf16.mxu1 %v7913_v45 }
 0x355   :  { %5118 = vmatmul.mubr.bf16.vlgmr.msra.gmra.mxu1 %v7915_v48 }
 0x356   :  { %5209 = vmatpush1.bf16.msra.mxu1 %v7099_v46  ;;  %5240 = vmatprep.mubr.bf16.mxu1 %v7898_v59  ;;  %v7179_v46 = vld [vmem:[#allocation14 + $0x5bc] ss:$28 sps:$4 sm:$0xff]  }
 0x357   :  { %5210 = vmatprep.subr.bf16.mxu1 %v7107_v49  ;;  %v7182_v49 = vld [vmem:[#allocation14 + $0x7c] ss:$28 sps:$4 sm:$0xff]  }
 0x35a   :  { %5211 = vmatpush1.bf16.msra.mxu1 %v7105_v50  ;;  %v7177_v50 = vld [vmem:[#allocation14 + $0x5b8] ss:$28 sps:$4 sm:$0xff]  }
 0x35b   :  { %5212 = vmatprep.subr.bf16.mxu1 %v7113_v51  ;;  %v7180_v51 = vld [vmem:[#allocation14 + $0x78] ss:$28 sps:$4 sm:$0xff]  }
 0x35e   :  { %5213 = vmatpush1.bf16.msra.mxu1 %v7111_v54  ;;  %v7185_v54 = vld [vmem:[#allocation14 + $0x584] ss:$28 sps:$4 sm:$0xff]  }
 0x35f   :  { %5214 = vmatprep.subr.bf16.mxu1 %v7119_v55  ;;  %v7188_v55 = vld [vmem:[#allocation14 + $0x44] ss:$28 sps:$4 sm:$0xff]  }
 0x362   :  { %5215 = vmatpush1.bf16.msra.mxu1 %v7117_v58  ;;  %v7183_v58 = vld [vmem:[#allocation14 + $0x580] ss:$28 sps:$4 sm:$0xff]  }
 0x363   :  { %5216 = vmatprep.subr.bf16.mxu1 %v7125_v60  ;;  %v7186_v60 = vld [vmem:[#allocation14 + $0x40] ss:$28 sps:$4 sm:$0xff]  }
 0x366   :  { %5217 = vmatpush1.bf16.msra.mxu1 %v7123_v61  ;;  %v7191_v61 = vld [vmem:[#allocation14 + $0x54c] ss:$28 sps:$4 sm:$0xff]  }
 0x367   :  { %5218 = vmatprep.subr.bf16.mxu1 %v7131_v63  ;;  %v7194_v63 = vld [vmem:[#allocation14 + $0xc] ss:$28 sps:$4 sm:$0xff]  }
 0x369   :  { %v6394_v2 = vpop.f32.mrf.mxu1 }
 0x36a   :  { %v6416_v3 = vpop.f32.mrf.mxu0  ;;  %5219 = vmatpush1.bf16.msra.mxu1 %v7129_v56  ;;  %v7189_v56 = vld [vmem:[#allocation14 + $0x548] ss:$28 sps:$4 sm:$0xff]  }
 0x36b   :  { %v6395_v6 = vpop.f32.mrf.mxu1  ;;  %5220 = vmatprep.subr.bf16.mxu1 %v7137_v1  ;;  %v7192_v1 = vld [vmem:[#allocation14 + $0x8] ss:$28 sps:$4 sm:$0xff]  }
 0x36c   :  { %v6396_v8 = vadd.f32 %v6395_v6, %v6394_v2  ;;  %v6417_v10 = vpop.f32.mrf.mxu0  ;;  %v7197_v2 = vld [vmem:[#allocation14 + $0xc14] ss:$28 sps:$4 sm:$0xff]   ;;  %v7203_v6 = vld [vmem:[#allocation14 + $0xbdc] ss:$28 sps:$4 sm:$0xff]  }
 0x36d   :  { %v6397_v13 = vpop.f32.mrf.mxu1  ;;  %v6418_v16 = vadd.f32 %v6417_v10, %v6416_v3  ;;  %v7200_v3 = vld [vmem:[#allocation14 + $0x354] ss:$28 sps:$4 sm:$0xff]  }
 0x36e   :  { %v2443_v14 = vadd.f32 %v6396_v8, %v1002_v4  ;;  %v6419_v17 = vpop.f32.mrf.mxu0  ;;  %5221 = vmatpush1.bf16.msra.mxu1 %v7135_v5  ;;  %v7195_v4 = vld [vmem:[#allocation14 + $0xc10] ss:$28 sps:$4 sm:$0xff]   ;;  %v7201_v8 = vld [vmem:[#allocation14 + $0xbd8] ss:$28 sps:$4 sm:$0xff]   ;;  %v7209_v13 = vld [vmem:[#allocation14 + $0xba4] ss:$28 sps:$4 sm:$0xff]  }
 0x36f   :  { %v6398_v19 = vpop.f32.mrf.mxu1  ;;  %5222 = vmatprep.subr.bf16.mxu1 %v7143_v7  ;;  %v7198_v5 = vld [vmem:[#allocation14 + $0x350] ss:$28 sps:$4 sm:$0xff]   ;;  %v7206_v7 = vld [vmem:[#allocation14 + $0x31c] ss:$28 sps:$4 sm:$0xff]  }
 0x370   :  { %v2483_v21 = vadd.f32 %v6418_v16, %v2443_v14  ;;  %v6420_v22 = vpop.f32.mrf.mxu0  ;;  %v7204_v10 = vld [vmem:[#allocation14 + $0x318] ss:$28 sps:$4 sm:$0xff]   ;;  %v7212_v14 = vld [vmem:[#allocation14 + $0x2e4] ss:$28 sps:$4 sm:$0xff]   ;;  %v7218_v19 = vld [vmem:[#allocation14 + $0x2ac] ss:$28 sps:$4 sm:$0xff]  }
 0x371   :  { %v7207_v16 = vld [vmem:[#allocation14 + $0xba0] ss:$28 sps:$4 sm:$0xff]   ;;  %v7221_v22 = vld [vmem:[#allocation14 + $0xb34] ss:$28 sps:$4 sm:$0xff]  }
 0x372   :  { %v2494_v24 = vmax.f32 %v2483_v21, 0.0  ;;  %5223 = vmatpush1.bf16.msra.mxu1 %v7141_v18  ;;  %v7210_v17 = vld [vmem:[#allocation14 + $0x2e0] ss:$28 sps:$4 sm:$0xff]   ;;  %v7215_v18 = vld [vmem:[#allocation14 + $0xb6c] ss:$28 sps:$4 sm:$0xff]  }
 0x373   :  { %5224 = vmatprep.subr.bf16.mxu1 %v7149_v20  ;;  %v7213_v20 = vld [vmem:[#allocation14 + $0xb68] ss:$28 sps:$4 sm:$0xff]  }
 0x374   :  { %v7924_v26 = vpack.c.bf16 %v2494_v24, %v2494_v24  ;;  %v7216_v21 = vld [vmem:[#allocation14 + $0x2a8] ss:$28 sps:$4 sm:$0xff]   ;;  %v7224_v24 = vld [vmem:[#allocation14 + $0x274] ss:$28 sps:$4 sm:$0xff]  }
 0x376   :  { %5225 = vmatpush2.bf16.msra.mxu1 %v7147_v23  ;;  %5159 = vmatmul.mubr.bf16.vlgmr.msra.gmra.mxu0 %v7924_v26  ;;  %v7219_v23 = vld [vmem:[#allocation14 + $0xb30] ss:$28 sps:$4 sm:$0xff]  }
 0x377   :  { %5168 = vmatpush1.bf16.msra.mxu0 %v7150_v25  ;;  %5199 = vmatprep.mubr.bf16.mxu0 %v7886_v47  ;;  %v7222_v25 = vld [vmem:[#allocation14 + $0x270] ss:$28 sps:$4 sm:$0xff]  }
 0x378   :  { %5226 = vmatprep.subr.bf16.mxu1 %v7155_v52  ;;  %5169 = vmatprep.subr.bf16.mxu0 %v7158_v30  ;;  %v7227_v52 = vld [vmem:[#allocation14 + $0xafc] ss:$28 sps:$4 sm:$0xff]  }
 0x379   :  { %v7230_v30 = vld [vmem:[#allocation14 + $0x23c] ss:$28 sps:$4 sm:$0xff]  }
 0x37a   :  { %5227 = vmatpush2.bf16.msra.mxu1 %v7153_v32  ;;  %v7225_v32 = vld [vmem:[#allocation14 + $0xaf8] ss:$28 sps:$4 sm:$0xff]  }
 0x37b   :  { %5170 = vmatpush1.bf16.msra.mxu0 %v7156_v53  ;;  %5228 = vmatprep.subr.bf16.mxu1 %v7161_v33  ;;  %v7228_v53 = vld [vmem:[#allocation14 + $0x238] ss:$28 sps:$4 sm:$0xff]   ;;  %v7233_v33 = vld [vmem:[#allocation14 + $0xac4] ss:$28 sps:$4 sm:$0xff]  }
 0x37c   :  { %5171 = vmatprep.subr.bf16.mxu0 %v7164_v34  ;;  %v7236_v34 = vld [vmem:[#allocation14 + $0x204] ss:$28 sps:$4 sm:$0xff]  }
 0x37e   :  { %5229 = vmatpush2.bf16.msra.mxu1 %v7159_v35 }
 0x37f   :  { %5172 = vmatpush1.bf16.msra.mxu0 %v7162_v36  ;;  %5230 = vmatprep.subr.bf16.mxu1 %v7167_v37  ;;  %v7231_v36 = vld [vmem:[#allocation14 + $0xac0] ss:$28 sps:$4 sm:$0xff]  }
 0x380   :  { %5173 = vmatprep.subr.bf16.mxu0 %v7170_v38  ;;  %v7234_v38 = vld [vmem:[#allocation14 + $0x200] ss:$28 sps:$4 sm:$0xff]  }
 0x382   :  { %5231 = vmatpush2.bf16.msra.mxu1 %v7165_v39  ;;  %v7239_v39 = vld [vmem:[#allocation14 + $0xa8c] ss:$28 sps:$4 sm:$0xff]  }
 0x383   :  { %5174 = vmatpush1.bf16.msra.mxu0 %v7168_v40  ;;  %5232 = vmatprep.subr.bf16.mxu1 %v7173_v41  ;;  %v7242_v40 = vld [vmem:[#allocation14 + $0x1cc] ss:$28 sps:$4 sm:$0xff]  }
 0x384   :  { %5175 = vmatprep.subr.bf16.mxu0 %v7176_v42  ;;  %v7237_v42 = vld [vmem:[#allocation14 + $0xa88] ss:$28 sps:$4 sm:$0xff]  }
 0x386   :  { %5233 = vmatpush2.bf16.msra.mxu1 %v7171_v43 }
 0x387   :  { %5176 = vmatpush1.bf16.msra.mxu0 %v7174_v44  ;;  %5234 = vmatprep.subr.bf16.mxu1 %v7179_v46  ;;  %v7240_v44 = vld [vmem:[#allocation14 + $0x1c8] ss:$28 sps:$4 sm:$0xff]   ;;  %v7245_v46 = vld [vmem:[#allocation14 + $0x19c] ss:$28 sps:$4 sm:$0xff]  }
 0x388   :  { %5177 = vmatprep.subr.bf16.mxu0 %v7182_v49  ;;  %v7248_v49 = vld [vmem:[#allocation14 + $0x894] ss:$28 sps:$4 sm:$0xff]  }
 0x38a   :  { %5235 = vmatpush2.bf16.msra.mxu1 %v7177_v50  ;;  %v7243_v50 = vld [vmem:[#allocation14 + $0x198] ss:$28 sps:$4 sm:$0xff]  }
 0x38b   :  { %5178 = vmatpush1.bf16.msra.mxu0 %v7180_v51  ;;  %5236 = vmatprep.subr.bf16.mxu1 %v7185_v54  ;;  %v7246_v51 = vld [vmem:[#allocation14 + $0x890] ss:$28 sps:$4 sm:$0xff]   ;;  %v7251_v54 = vld [vmem:[#allocation14 + $0x164] ss:$28 sps:$4 sm:$0xff]  }
 0x38c   :  { %5179 = vmatprep.subr.bf16.mxu0 %v7188_v55  ;;  %v7254_v55 = vld [vmem:[#allocation14 + $0x85c] ss:$28 sps:$4 sm:$0xff]  }
 0x38e   :  { %5237 = vmatpush2.bf16.msra.mxu1 %v7183_v58  ;;  %v7249_v58 = vld [vmem:[#allocation14 + $0x160] ss:$28 sps:$4 sm:$0xff]  }
 0x38f   :  { %5180 = vmatpush1.bf16.msra.mxu0 %v7186_v60  ;;  %5238 = vmatprep.subr.bf16.mxu1 %v7191_v61  ;;  %v7252_v60 = vld [vmem:[#allocation14 + $0x858] ss:$28 sps:$4 sm:$0xff]   ;;  %v7257_v61 = vld [vmem:[#allocation14 + $0x12c] ss:$28 sps:$4 sm:$0xff]  }
 0x390   :  { %5181 = vmatprep.subr.bf16.mxu0 %v7194_v63  ;;  %v7260_v63 = vld [vmem:[#allocation14 + $0x824] ss:$28 sps:$4 sm:$0xff]  }
 0x392   :  { %5239 = vmatpush2.bf16.msra.mxu1 %v7189_v56  ;;  %v7255_v56 = vld [vmem:[#allocation14 + $0x128] ss:$28 sps:$4 sm:$0xff]  }
 0x393   :  { %5182 = vmatpush1.bf16.msra.mxu0 %v7192_v1  ;;  %5290 = vmatprep.subr.bf16.mxu1 %v7197_v2  ;;  %v7258_v1 = vld [vmem:[#allocation14 + $0x820] ss:$28 sps:$4 sm:$0xff]   ;;  %v7263_v2 = vld [vmem:[#allocation14 + $0xf4] ss:$28 sps:$4 sm:$0xff]  }
 0x394   :  { %5183 = vmatprep.subr.bf16.mxu0 %v7200_v3  ;;  %v7266_v3 = vld [vmem:[#allocation14 + $0x7ec] ss:$28 sps:$4 sm:$0xff]  }
 0x395   :  { %5241 = vmatmul.mubr.bf16.vlgmr.msra.gmra.mxu1 %v7900_v62 }
 0x396   :  { %5291 = vmatpush1.bf16.msra.mxu1 %v7195_v4  ;;  %5322 = vmatprep.mubr.bf16.mxu1 %v7756_v0  ;;  %v7261_v4 = vld [vmem:[#allocation14 + $0xf0] ss:$28 sps:$4 sm:$0xff]  }
 0x397   :  { %5184 = vmatpush2.bf16.msra.mxu0 %v7198_v5  ;;  %5292 = vmatprep.subr.bf16.mxu1 %v7203_v6  ;;  %v7264_v5 = vld [vmem:[#allocation14 + $0x7e8] ss:$28 sps:$4 sm:$0xff]   ;;  %v7269_v6 = vld [vmem:[#allocation14 + $0xbc] ss:$28 sps:$4 sm:$0xff]  }
 0x398   :  { %5185 = vmatprep.subr.bf16.mxu0 %v7206_v7  ;;  %v7272_v7 = vld [vmem:[#allocation14 + $0x7b4] ss:$28 sps:$4 sm:$0xff]  }
 0x39a   :  { %5293 = vmatpush1.bf16.msra.mxu1 %v7201_v8  ;;  %v7267_v8 = vld [vmem:[#allocation14 + $0xb8] ss:$28 sps:$4 sm:$0xff]  }
 0x39b   :  { %5186 = vmatpush2.bf16.msra.mxu0 %v7204_v10  ;;  %5294 = vmatprep.subr.bf16.mxu1 %v7209_v13  ;;  %v7270_v10 = vld [vmem:[#allocation14 + $0x7b0] ss:$28 sps:$4 sm:$0xff]   ;;  %v7275_v13 = vld [vmem:[#allocation14 + $0x84] ss:$28 sps:$4 sm:$0xff]  }
 0x39c   :  { %5187 = vmatprep.subr.bf16.mxu0 %v7212_v14  ;;  %v7278_v14 = vld [vmem:[#allocation14 + $0x77c] ss:$28 sps:$4 sm:$0xff]  }
 0x39e   :  { %5295 = vmatpush1.bf16.msra.mxu1 %v7207_v16  ;;  %v7273_v16 = vld [vmem:[#allocation14 + $0x80] ss:$28 sps:$4 sm:$0xff]  }
 0x39f   :  { %5188 = vmatpush2.bf16.msra.mxu0 %v7210_v17  ;;  %5296 = vmatprep.subr.bf16.mxu1 %v7215_v18  ;;  %v7276_v17 = vld [vmem:[#allocation14 + $0x778] ss:$28 sps:$4 sm:$0xff]   ;;  %v7281_v18 = vld [vmem:[#allocation14 + $0x4c] ss:$28 sps:$4 sm:$0xff]  }
 0x3a0   :  { %5189 = vmatprep.subr.bf16.mxu0 %v7218_v19  ;;  %v7284_v19 = vld [vmem:[#allocation14 + $0x744] ss:$28 sps:$4 sm:$0xff]  }
 0x3a2   :  { %5297 = vmatpush1.bf16.msra.mxu1 %v7213_v20  ;;  %v7279_v20 = vld [vmem:[#allocation14 + $0x48] ss:$28 sps:$4 sm:$0xff]  }
 0x3a3   :  { %5190 = vmatpush2.bf16.msra.mxu0 %v7216_v21  ;;  %5298 = vmatprep.subr.bf16.mxu1 %v7221_v22  ;;  %v7282_v21 = vld [vmem:[#allocation14 + $0x740] ss:$28 sps:$4 sm:$0xff]   ;;  %v7287_v22 = vld [vmem:[#allocation14 + $0x14] ss:$28 sps:$4 sm:$0xff]  }
 0x3a4   :  { %5191 = vmatprep.subr.bf16.mxu0 %v7224_v24  ;;  %v7290_v24 = vld [vmem:[#allocation14 + $0x70c] ss:$28 sps:$4 sm:$0xff]  }
 0x3a6   :  { %5299 = vmatpush1.bf16.msra.mxu1 %v7219_v23  ;;  %v7938_v23 = vld [vmem:[#allocation16] sm:$0xff] }
 0x3a7   :  { %5192 = vmatpush2.bf16.msra.mxu0 %v7222_v25  ;;  %5300 = vmatprep.subr.bf16.mxu1 %v7227_v52  ;;  %v7285_v25 = vld [vmem:[#allocation14 + $0x10] ss:$28 sps:$4 sm:$0xff]   ;;  %v7288_v52 = vld [vmem:[#allocation14 + $0x708] ss:$28 sps:$4 sm:$0xff]  }
 0x3a8   :  { %5193 = vmatprep.subr.bf16.mxu0 %v7230_v30  ;;  %v7293_v30 = vld [vmem:[#allocation14 + $0x35c] ss:$28 sps:$4 sm:$0xff]  }
 0x3a9   :  { %v7930_v35 = vpop.f32.mrf.mxu1 }
 0x3aa   :  { %5301 = vmatpush1.bf16.msra.mxu1 %v7225_v32  ;;  %v2955_v32 = vrot.slane %v7938_v23, %v7841_v11  ;;  %v7297_v11 = vld [vmem:[#allocation14 + $0x320] ss:$28 sps:$4 sm:$0xff]  }
 0x3ab   :  { %5194 = vmatpush2.bf16.msra.mxu0 %v7228_v53  ;;  %v7932_v37 = vpop.f32.mrf.mxu1  ;;  %5302 = vmatprep.subr.bf16.mxu1 %v7233_v33  ;;  %v7296_v53 = vld [vmem:[#allocation14 + $0xa54] ss:$28 sps:$4 sm:$0xff]   ;;  %v2959_v33 = vrot.slane %v7938_v23, %v7844_v12 }
 0x3ac   :  { %5195 = vmatprep.subr.bf16.mxu0 %v7236_v34  ;;  %v7291_v34 = vld [vmem:[#allocation14 + $0x358] ss:$28 sps:$4 sm:$0xff]  }
 0x3ad   :  { %v5041_v41 = vpop.f32.mrf.mxu1  ;;  %v7300_v12 = vld [vmem:[#allocation14 + $0xa18] ss:$28 sps:$4 sm:$0xff]  }
 0x3ae   :  { %5303 = vmatpush1.bf16.msra.mxu1 %v7231_v36  ;;  %v7294_v36 = vld [vmem:[#allocation14 + $0xa50] ss:$28 sps:$4 sm:$0xff]  }
 0x3af   :  { %5196 = vmatpush2.bf16.msra.mxu0 %v7234_v38  ;;  %v5042_v43 = vpop.f32.mrf.mxu1  ;;  %5304 = vmatprep.subr.bf16.mxu1 %v7239_v39  ;;  %v7299_v38 = vld [vmem:[#allocation14 + $0x324] ss:$28 sps:$4 sm:$0xff]   ;;  %v5038_v39 = vadd.f32 %v7930_v35, %v2955_v32  ;;  %v7353_v32 = vld [vmem:[#allocation14 + $0x82c] ss:$28 sps:$4 sm:$0xff]  }
 0x3b0   :  { %5197 = vmatprep.subr.bf16.mxu0 %v7242_v40  ;;  %v7302_v40 = vld [vmem:[#allocation14 + $0xa1c] ss:$28 sps:$4 sm:$0xff]   ;;  %v7303_v35 = vld [vmem:[#allocation14 + $0x2e8] ss:$28 sps:$4 sm:$0xff]  }
 0x3b2   :  { %5305 = vmatpush1.bf16.msra.mxu1 %v7237_v42  ;;  %v5040_v42 = vadd.f32 %v7932_v37, %v2959_v33  ;;  %v7306_v37 = vld [vmem:[#allocation14 + $0x9e0] ss:$28 sps:$4 sm:$0xff]   ;;  %v7351_v33 = vld [vmem:[#allocation14 + $0x828] ss:$28 sps:$4 sm:$0xff]  }
 0x3b3   :  { %5198 = vmatpush2.bf16.msra.mxu0 %v7240_v44  ;;  %5331 = vmatprep.subr.bf16.mxu1 %v7245_v46  ;;  %v7305_v46 = vld [vmem:[#allocation14 + $0x2ec] ss:$28 sps:$4 sm:$0xff]  }
 0x3b4   :  { %5249 = vmatprep.subr.bf16.mxu0 %v7248_v49 }
 0x3b5   :  { %5323 = vmatmul.mubr.bf16.vlgmr.msra.gmra.mxu1 %v7924_v26 }
 0x3b6   :  { %5200 = vmatmul.mubr.bf16.vlgmr.msra.gmra.mxu0 %v7891_v15  ;;  %5332 = vmatpush1.bf16.msra.mxu1 %v7243_v50  ;;  %v7308_v50 = vld [vmem:[#allocation14 + $0x9e4] ss:$28 sps:$4 sm:$0xff]  }
 0x3b7   :  { %5363 = vmatprep.mubr.bf16.mxu1 %v7886_v47  ;;  %5250 = vmatpush1.bf16.msra.mxu0 %v7246_v51 }
 0x3b8   :  { %5281 = vmatprep.mubr.bf16.mxu0 %v7913_v45  ;;  %5333 = vmatprep.subr.bf16.mxu1 %v7251_v54 }
 0x3b9   :  { %5251 = vmatprep.subr.bf16.mxu0 %v7254_v55  ;;  %v7311_v55 = vld [vmem:[#allocation14 + $0x2b4] ss:$28 sps:$4 sm:$0xff]  }
 0x3ba   :  { %5334 = vmatpush1.bf16.msra.mxu1 %v7249_v58  ;;  %v7314_v58 = vld [vmem:[#allocation14 + $0x9ac] ss:$28 sps:$4 sm:$0xff]  }
 0x3bb   :  { %5252 = vmatpush1.bf16.msra.mxu0 %v7252_v60  ;;  %5335 = vmatprep.subr.bf16.mxu1 %v7257_v61  ;;  %v7309_v60 = vld [vmem:[#allocation14 + $0x2b0] ss:$28 sps:$4 sm:$0xff]   ;;  %v7312_v61 = vld [vmem:[#allocation14 + $0x9a8] ss:$28 sps:$4 sm:$0xff]  }
 0x3bc   :  { %5253 = vmatprep.subr.bf16.mxu0 %v7260_v63  ;;  %v7317_v63 = vld [vmem:[#allocation14 + $0x27c] ss:$28 sps:$4 sm:$0xff]  }
 0x3be   :  { %5336 = vmatpush1.bf16.msra.mxu1 %v7255_v56  ;;  %v7320_v56 = vld [vmem:[#allocation14 + $0x974] ss:$28 sps:$4 sm:$0xff]  }
 0x3bf   :  { %5254 = vmatpush1.bf16.msra.mxu0 %v7258_v1  ;;  %5337 = vmatprep.subr.bf16.mxu1 %v7263_v2  ;;  %v7315_v1 = vld [vmem:[#allocation14 + $0x278] ss:$28 sps:$4 sm:$0xff]   ;;  %v7318_v2 = vld [vmem:[#allocation14 + $0x970] ss:$28 sps:$4 sm:$0xff]  }
 0x3c0   :  { %5255 = vmatprep.subr.bf16.mxu0 %v7266_v3  ;;  %v7323_v3 = vld [vmem:[#allocation14 + $0x244] ss:$28 sps:$4 sm:$0xff]  }
 0x3c2   :  { %5338 = vmatpush1.bf16.msra.mxu1 %v7261_v4  ;;  %v7326_v4 = vld [vmem:[#allocation14 + $0x93c] ss:$28 sps:$4 sm:$0xff]  }
 0x3c3   :  { %5256 = vmatpush1.bf16.msra.mxu0 %v7264_v5  ;;  %5339 = vmatprep.subr.bf16.mxu1 %v7269_v6  ;;  %v7321_v5 = vld [vmem:[#allocation14 + $0x240] ss:$28 sps:$4 sm:$0xff]   ;;  %v7324_v6 = vld [vmem:[#allocation14 + $0x938] ss:$28 sps:$4 sm:$0xff]  }
 0x3c4   :  { %5257 = vmatprep.subr.bf16.mxu0 %v7272_v7  ;;  %v7329_v7 = vld [vmem:[#allocation14 + $0x20c] ss:$28 sps:$4 sm:$0xff]  }
 0x3c6   :  { %5340 = vmatpush1.bf16.msra.mxu1 %v7267_v8  ;;  %v7332_v8 = vld [vmem:[#allocation14 + $0x904] ss:$28 sps:$4 sm:$0xff]  }
 0x3c7   :  { %5258 = vmatpush1.bf16.msra.mxu0 %v7270_v10  ;;  %5341 = vmatprep.subr.bf16.mxu1 %v7275_v13  ;;  %v7327_v10 = vld [vmem:[#allocation14 + $0x208] ss:$28 sps:$4 sm:$0xff]   ;;  %v7330_v13 = vld [vmem:[#allocation14 + $0x900] ss:$28 sps:$4 sm:$0xff]  }
 0x3c8   :  { %5259 = vmatprep.subr.bf16.mxu0 %v7278_v14  ;;  %v7335_v14 = vld [vmem:[#allocation14 + $0x1d4] ss:$28 sps:$4 sm:$0xff]  }
 0x3ca   :  { %5342 = vmatpush1.bf16.msra.mxu1 %v7273_v16  ;;  %v7338_v16 = vld [vmem:[#allocation14 + $0x8cc] ss:$28 sps:$4 sm:$0xff]  }
 0x3cb   :  { %5260 = vmatpush1.bf16.msra.mxu0 %v7276_v17  ;;  %5343 = vmatprep.subr.bf16.mxu1 %v7281_v18  ;;  %v7333_v17 = vld [vmem:[#allocation14 + $0x1d0] ss:$28 sps:$4 sm:$0xff]   ;;  %v7336_v18 = vld [vmem:[#allocation14 + $0x8c8] ss:$28 sps:$4 sm:$0xff]  }
 0x3cc   :  { %5261 = vmatprep.subr.bf16.mxu0 %v7284_v19  ;;  %v7341_v19 = vld [vmem:[#allocation14 + $0x89c] ss:$28 sps:$4 sm:$0xff]  }
 0x3ce   :  { %5344 = vmatpush1.bf16.msra.mxu1 %v7279_v20  ;;  %v7344_v20 = vld [vmem:[#allocation14 + $0x51c] ss:$28 sps:$4 sm:$0xff]  }
 0x3cf   :  { %5262 = vmatpush1.bf16.msra.mxu0 %v7282_v21  ;;  %5345 = vmatprep.subr.bf16.mxu1 %v7287_v22  ;;  %v7339_v21 = vld [vmem:[#allocation14 + $0x898] ss:$28 sps:$4 sm:$0xff]  }
 0x3d0   :  { %5263 = vmatprep.subr.bf16.mxu0 %v7290_v24  ;;  %v7342_v22 = vld [vmem:[#allocation14 + $0x518] ss:$28 sps:$4 sm:$0xff]   ;;  %v7347_v24 = vld [vmem:[#allocation14 + $0x864] ss:$28 sps:$4 sm:$0xff]  }
 0x3d2   :  { %5346 = vmatpush1.bf16.msra.mxu1 %v7285_v25  ;;  %v7350_v25 = vld [vmem:[#allocation14 + $0x4e4] ss:$28 sps:$4 sm:$0xff]  }
 0x3d3   :  { %5264 = vmatpush1.bf16.msra.mxu0 %v7288_v52  ;;  %5347 = vmatprep.subr.bf16.mxu1 %v7293_v30  ;;  %v7345_v52 = vld [vmem:[#allocation14 + $0x860] ss:$28 sps:$4 sm:$0xff]  }
 0x3d4   :  { %5265 = vmatprep.subr.bf16.mxu0 %v7296_v53  ;;  %v7348_v30 = vld [vmem:[#allocation14 + $0x4e0] ss:$28 sps:$4 sm:$0xff]   ;;  %v7356_v53 = vld [vmem:[#allocation14 + $0x4ac] ss:$28 sps:$4 sm:$0xff]  }
 0x3d5   :  { %v5078_v41 = vpop.f32.mrf.mxu0 }
 0x3d6   :  { %v7946_v43 = vadd.f32 %v5078_v41, %v5038_v39  ;;  %5348 = vmatpush2.bf16.msra.mxu1 %v7291_v34  ;;  %v7354_v34 = vld [vmem:[#allocation14 + $0x4a8] ss:$28 sps:$4 sm:$0xff]   ;;  %v7357_v39 = vld [vmem:[#allocation14 + $0x7f0] ss:$28 sps:$4 sm:$0xff]   ;;  %v7365_v41 = vld [vmem:[#allocation14 + $0x7bc] ss:$28 sps:$4 sm:$0xff]  }
 0x3d7   :  { %5266 = vmatpush2.bf16.msra.mxu0 %v7294_v36  ;;  %v5080_v44 = vpop.f32.mrf.mxu0  ;;  %5349 = vmatprep.subr.bf16.mxu1 %v7299_v38  ;;  %v7359_v36 = vld [vmem:[#allocation14 + $0x7f4] ss:$28 sps:$4 sm:$0xff]  }
 0x3d8   :  { %v7948_v49 = vadd.f32 %v5080_v44, %v5040_v42  ;;  %5267 = vmatprep.subr.bf16.mxu0 %v7302_v40  ;;  %v7362_v38 = vld [vmem:[#allocation14 + $0x474] ss:$28 sps:$4 sm:$0xff]   ;;  %v7368_v42 = vld [vmem:[#allocation14 + $0x43c] ss:$28 sps:$4 sm:$0xff]  }
 0x3d9   :  { %v5082_v51 = vpop.f32.mrf.mxu0  ;;  %v7360_v40 = vld [vmem:[#allocation14 + $0x470] ss:$28 sps:$4 sm:$0xff]   ;;  %v7366_v44 = vld [vmem:[#allocation14 + $0x438] ss:$28 sps:$4 sm:$0xff]  }
 0x3da   :  { %5350 = vmatpush2.bf16.msra.mxu1 %v7297_v11  ;;  %v7363_v11 = vld [vmem:[#allocation14 + $0x7b8] ss:$28 sps:$4 sm:$0xff]   ;;  %v7372_v51 = vld [vmem:[#allocation14 + $0x400] ss:$28 sps:$4 sm:$0xff]  }
 0x3db   :  { %5268 = vmatpush2.bf16.msra.mxu0 %v7300_v12  ;;  %v5083_v54 = vpop.f32.mrf.mxu0  ;;  %5351 = vmatprep.subr.bf16.mxu1 %v7305_v46  ;;  %v7371_v12 = vld [vmem:[#allocation14 + $0x784] ss:$28 sps:$4 sm:$0xff]  }
 0x3dc   :  { %5269 = vmatprep.subr.bf16.mxu0 %v7308_v50  ;;  %v7374_v46 = vld [vmem:[#allocation14 + $0x404] ss:$28 sps:$4 sm:$0xff]   ;;  %v7380_v54 = vld [vmem:[#allocation14 + $0x3cc] ss:$28 sps:$4 sm:$0xff]  }
 0x3dd   :  { %v7369_v50 = vld [vmem:[#allocation14 + $0x780] ss:$28 sps:$4 sm:$0xff]  }
 0x3de   :  { %5352 = vmatpush2.bf16.msra.mxu1 %v7303_v35  ;;  %v7377_v35 = vld [vmem:[#allocation14 + $0x74c] ss:$28 sps:$4 sm:$0xff]  }
 0x3df   :  { %5270 = vmatpush2.bf16.msra.mxu0 %v7306_v37  ;;  %5353 = vmatprep.subr.bf16.mxu1 %v7311_v55  ;;  %v7375_v37 = vld [vmem:[#allocation14 + $0x748] ss:$28 sps:$4 sm:$0xff]  }
 0x3e0   :  { %5271 = vmatprep.subr.bf16.mxu0 %v7314_v58  ;;  %v7378_v55 = vld [vmem:[#allocation14 + $0x3c8] ss:$28 sps:$4 sm:$0xff]   ;;  %v7383_v58 = vld [vmem:[#allocation14 + $0x714] ss:$28 sps:$4 sm:$0xff]  }
 0x3e2   :  { %5354 = vmatpush2.bf16.msra.mxu1 %v7309_v60  ;;  %v7386_v60 = vld [vmem:[#allocation14 + $0x394] ss:$28 sps:$4 sm:$0xff]  }
 0x3e3   :  { %5272 = vmatpush2.bf16.msra.mxu0 %v7312_v61  ;;  %5355 = vmatprep.subr.bf16.mxu1 %v7317_v63  ;;  %v7381_v61 = vld [vmem:[#allocation14 + $0x710] ss:$28 sps:$4 sm:$0xff]  }
 0x3e4   :  { %5273 = vmatprep.subr.bf16.mxu0 %v7320_v56  ;;  %v7384_v63 = vld [vmem:[#allocation14 + $0x390] ss:$28 sps:$4 sm:$0xff]   ;;  %v7389_v56 = vld [vmem:[#allocation14 + $0xa5c] ss:$28 sps:$4 sm:$0xff]  }
 0x3e6   :  { %5356 = vmatpush2.bf16.msra.mxu1 %v7315_v1  ;;  %v7392_v1 = vld [vmem:[#allocation14 + $0x6dc] ss:$28 sps:$4 sm:$0xff]  }
 0x3e7   :  { %5274 = vmatpush2.bf16.msra.mxu0 %v7318_v2  ;;  %5357 = vmatprep.subr.bf16.mxu1 %v7323_v3  ;;  %v7387_v2 = vld [vmem:[#allocation14 + $0xa58] ss:$28 sps:$4 sm:$0xff]  }
 0x3e8   :  { %5275 = vmatprep.subr.bf16.mxu0 %v7326_v4  ;;  %v7390_v3 = vld [vmem:[#allocation14 + $0x6d8] ss:$28 sps:$4 sm:$0xff]   ;;  %v7395_v4 = vld [vmem:[#allocation14 + $0xa24] ss:$28 sps:$4 sm:$0xff]  }
 0x3ea   :  { %5358 = vmatpush2.bf16.msra.mxu1 %v7321_v5  ;;  %v7398_v5 = vld [vmem:[#allocation14 + $0x6a4] ss:$28 sps:$4 sm:$0xff]  }
 0x3eb   :  { %5276 = vmatpush2.bf16.msra.mxu0 %v7324_v6  ;;  %5359 = vmatprep.subr.bf16.mxu1 %v7329_v7  ;;  %v7393_v7 = vld [vmem:[#allocation14 + $0xa20] ss:$28 sps:$4 sm:$0xff]  }
 0x3ec   :  { %5277 = vmatprep.subr.bf16.mxu0 %v7332_v8 }
 0x3ee   :  { %5360 = vmatpush2.bf16.msra.mxu1 %v7327_v10  ;;  %v7396_v10 = vld [vmem:[#allocation14 + $0x6a0] ss:$28 sps:$4 sm:$0xff]  }
 0x3ef   :  { %5278 = vmatpush2.bf16.msra.mxu0 %v7330_v13  ;;  %5361 = vmatprep.subr.bf16.mxu1 %v7335_v14  ;;  %v7401_v13 = vld [vmem:[#allocation14 + $0x9ec] ss:$28 sps:$4 sm:$0xff]  }
 0x3f0   :  { %5279 = vmatprep.subr.bf16.mxu0 %v7338_v16  ;;  %v7404_v14 = vld [vmem:[#allocation14 + $0x66c] ss:$28 sps:$4 sm:$0xff]  }
 0x3f2   :  { %5362 = vmatpush2.bf16.msra.mxu1 %v7333_v17  ;;  %v7399_v17 = vld [vmem:[#allocation14 + $0x9e8] ss:$28 sps:$4 sm:$0xff]  }
 0x3f3   :  { %5280 = vmatpush2.bf16.msra.mxu0 %v7336_v18  ;;  %5413 = vmatprep.subr.bf16.mxu1 %v7341_v19  ;;  %v7402_v19 = vld [vmem:[#allocation14 + $0x668] ss:$28 sps:$4 sm:$0xff]  }
 0x3f4   :  { %5372 = vmatprep.subr.bf16.mxu0 %v7344_v20  ;;  %v7407_v20 = vld [vmem:[#allocation14 + $0x9b4] ss:$28 sps:$4 sm:$0xff]  }
 0x3f5   :  { %5364 = vmatmul.mubr.bf16.vlgmr.msra.gmra.mxu1 %v7891_v15 }
 0x3f6   :  { %5282 = vmatmul.mubr.bf16.vlgmr.msra.gmra.mxu0 %v7915_v48  ;;  %5414 = vmatpush1.bf16.msra.mxu1 %v7339_v21  ;;  %v7410_v21 = vld [vmem:[#allocation14 + $0x634] ss:$28 sps:$4 sm:$0xff]  }
 0x3f7   :  { %5445 = vmatprep.mubr.bf16.mxu1 %v7913_v45  ;;  %5373 = vmatpush1.bf16.msra.mxu0 %v7342_v22  ;;  %v7405_v22 = vld [vmem:[#allocation14 + $0x9b0] ss:$28 sps:$4 sm:$0xff]  }
 0x3f8   :  { %5404 = vmatprep.mubr.bf16.mxu0 %v7898_v59  ;;  %5415 = vmatprep.subr.bf16.mxu1 %v7347_v24  ;;  %v7408_v24 = vld [vmem:[#allocation14 + $0x630] ss:$28 sps:$4 sm:$0xff]  }
 0x3f9   :  { %5374 = vmatprep.subr.bf16.mxu0 %v7350_v25  ;;  %v7413_v25 = vld [vmem:[#allocation14 + $0x97c] ss:$28 sps:$4 sm:$0xff]  }
 0x3fa   :  { %5416 = vmatpush1.bf16.msra.mxu1 %v7345_v52  ;;  %v7416_v52 = vld [vmem:[#allocation14 + $0x5fc] ss:$28 sps:$4 sm:$0xff]  }
 0x3fb   :  { %5375 = vmatpush1.bf16.msra.mxu0 %v7348_v30  ;;  %5417 = vmatprep.subr.bf16.mxu1 %v7353_v32  ;;  %v7411_v30 = vld [vmem:[#allocation14 + $0x978] ss:$28 sps:$4 sm:$0xff]  }
 0x3fc   :  { %5376 = vmatprep.subr.bf16.mxu0 %v7356_v53  ;;  %v7414_v32 = vld [vmem:[#allocation14 + $0x5f8] ss:$28 sps:$4 sm:$0xff]   ;;  %v7419_v53 = vld [vmem:[#allocation14 + $0x944] ss:$28 sps:$4 sm:$0xff]  }
 0x3fe   :  { %5418 = vmatpush1.bf16.msra.mxu1 %v7351_v33  ;;  %v7422_v33 = vld [vmem:[#allocation14 + $0x5c4] ss:$28 sps:$4 sm:$0xff]  }
 0x3ff   :  { %5377 = vmatpush1.bf16.msra.mxu0 %v7354_v34  ;;  %5419 = vmatprep.subr.bf16.mxu1 %v7359_v36  ;;  %v7417_v34 = vld [vmem:[#allocation14 + $0x940] ss:$28 sps:$4 sm:$0xff]  }
 0x400   :  { %5378 = vmatprep.subr.bf16.mxu0 %v7362_v38  ;;  %v7420_v36 = vld [vmem:[#allocation14 + $0x5c0] ss:$28 sps:$4 sm:$0xff]   ;;  %v7425_v38 = vld [vmem:[#allocation14 + $0x90c] ss:$28 sps:$4 sm:$0xff]  }
 0x402   :  { %5420 = vmatpush1.bf16.msra.mxu1 %v7357_v39  ;;  %v7428_v39 = vld [vmem:[#allocation14 + $0x58c] ss:$28 sps:$4 sm:$0xff]  }
 0x403   :  { %5379 = vmatpush1.bf16.msra.mxu0 %v7360_v40  ;;  %5421 = vmatprep.subr.bf16.mxu1 %v7365_v41  ;;  %v7423_v40 = vld [vmem:[#allocation14 + $0x908] ss:$28 sps:$4 sm:$0xff]  }
 0x404   :  { %5380 = vmatprep.subr.bf16.mxu0 %v7368_v42  ;;  %v7426_v41 = vld [vmem:[#allocation14 + $0x588] ss:$28 sps:$4 sm:$0xff]   ;;  %v7431_v42 = vld [vmem:[#allocation14 + $0x8d4] ss:$28 sps:$4 sm:$0xff]  }
 0x406   :  { %5422 = vmatpush1.bf16.msra.mxu1 %v7363_v11  ;;  %v7434_v11 = vld [vmem:[#allocation14 + $0x554] ss:$28 sps:$4 sm:$0xff]  }
 0x407   :  { %5381 = vmatpush1.bf16.msra.mxu0 %v7366_v44  ;;  %5423 = vmatprep.subr.bf16.mxu1 %v7371_v12  ;;  %v7429_v44 = vld [vmem:[#allocation14 + $0x8d0] ss:$28 sps:$4 sm:$0xff]  }
 0x408   :  { %5382 = vmatprep.subr.bf16.mxu0 %v7374_v46  ;;  %v7432_v12 = vld [vmem:[#allocation14 + $0x550] ss:$28 sps:$4 sm:$0xff]   ;;  %v7435_v46 = vld [vmem:[#allocation14 + $0x6e0] ss:$28 sps:$4 sm:$0xff]  }
 0x40a   :  { %5424 = vmatpush1.bf16.msra.mxu1 %v7369_v50  ;;  %v7438_v50 = vld [vmem:[#allocation14 + $0xc1c] ss:$28 sps:$4 sm:$0xff]  }
 0x40b   :  { %5383 = vmatpush1.bf16.msra.mxu0 %v7372_v51  ;;  %5425 = vmatprep.subr.bf16.mxu1 %v7377_v35  ;;  %v7439_v51 = vld [vmem:[#allocation14 + $0x520] ss:$28 sps:$4 sm:$0xff]   ;;  %v7436_v35 = vld [vmem:[#allocation14 + $0xc18] ss:$28 sps:$4 sm:$0xff]  }
 0x40c   :  { %5384 = vmatprep.subr.bf16.mxu0 %v7380_v54  ;;  %v7440_v54 = vld [vmem:[#allocation14 + $0x6a8] ss:$28 sps:$4 sm:$0xff]  }
 0x40e   :  { %5426 = vmatpush1.bf16.msra.mxu1 %v7375_v37  ;;  %v7443_v37 = vld [vmem:[#allocation14 + $0xbe4] ss:$28 sps:$4 sm:$0xff]  }
 0x40f   :  { %5385 = vmatpush1.bf16.msra.mxu0 %v7378_v55  ;;  %5427 = vmatprep.subr.bf16.mxu1 %v7383_v58 }
 0x410   :  { %5386 = vmatprep.subr.bf16.mxu0 %v7386_v60  ;;  %v7444_v60 = vld [vmem:[#allocation14 + $0x4e8] ss:$28 sps:$4 sm:$0xff]  }
 0x412   :  { %5428 = vmatpush1.bf16.msra.mxu1 %v7381_v61 }
 0x413   :  { %5387 = vmatpush1.bf16.msra.mxu0 %v7384_v63  ;;  %5429 = vmatprep.subr.bf16.mxu1 %v7389_v56  ;;  %v7441_v56 = vld [vmem:[#allocation14 + $0xbe0] ss:$28 sps:$4 sm:$0xff]  }
 0x414   :  { %5388 = vmatprep.subr.bf16.mxu0 %v7392_v1  ;;  %v7445_v1 = vld [vmem:[#allocation14 + $0x670] ss:$28 sps:$4 sm:$0xff]  }
 0x415   :  { %v7954_v6 = vpop.f32.mrf.mxu1 }
 0x416   :  { %5430 = vmatpush2.bf16.msra.mxu1 %v7387_v2  ;;  %v5120_v55 = vadd.f32 %v7954_v6, %v7946_v43  ;;  %v7448_v43 = vld [vmem:[#allocation14 + $0xbac] ss:$28 sps:$4 sm:$0xff]  }
 0x417   :  { %5389 = vmatpush2.bf16.msra.mxu0 %v7390_v3  ;;  %v7956_v8 = vpop.f32.mrf.mxu1  ;;  %5431 = vmatprep.subr.bf16.mxu1 %v7395_v4  ;;  %v7449_v6 = vld [vmem:[#allocation14 + $0x4b0] ss:$28 sps:$4 sm:$0xff]  }
 0x418   :  { %5390 = vmatprep.subr.bf16.mxu0 %v7398_v5  ;;  %v5122_v61 = vadd.f32 %v7956_v8, %v7948_v49  ;;  %v7450_v49 = vld [vmem:[#allocation14 + $0x638] ss:$28 sps:$4 sm:$0xff]  }
 0x419   :  { %v5123_v16 = vpop.f32.mrf.mxu1 }
 0x41a   :  { %5432 = vmatpush2.bf16.msra.mxu1 %v7393_v7  ;;  %v7455_v16 = vld [vmem:[#allocation14 + $0x600] ss:$28 sps:$4 sm:$0xff]  }
 0x41b   :  { %5391 = vmatpush2.bf16.msra.mxu0 %v7396_v10  ;;  %v5124_v18 = vpop.f32.mrf.mxu1  ;;  %5433 = vmatprep.subr.bf16.mxu1 %v7401_v13  ;;  %v7453_v10 = vld [vmem:[#allocation14 + $0xb74] ss:$28 sps:$4 sm:$0xff]  }
 0x41c   :  { %5392 = vmatprep.subr.bf16.mxu0 %v7404_v14  ;;  %v7454_v13 = vld [vmem:[#allocation14 + $0x478] ss:$28 sps:$4 sm:$0xff]   ;;  %v7451_v14 = vld [vmem:[#allocation14 + $0xb70] ss:$28 sps:$4 sm:$0xff]  }
 0x41d   :  { %v7456_v18 = vld [vmem:[#allocation14 + $0xb38] ss:$28 sps:$4 sm:$0xff]  }
 0x41e   :  { %5434 = vmatpush2.bf16.msra.mxu1 %v7399_v17  ;;  %v7459_v17 = vld [vmem:[#allocation14 + $0x440] ss:$28 sps:$4 sm:$0xff]  }
 0x41f   :  { %5393 = vmatpush2.bf16.msra.mxu0 %v7402_v19  ;;  %5435 = vmatprep.subr.bf16.mxu1 %v7407_v20  ;;  %v7460_v19 = vld [vmem:[#allocation14 + $0x5c8] ss:$28 sps:$4 sm:$0xff]  }
 0x420   :  { %5394 = vmatprep.subr.bf16.mxu0 %v7410_v21  ;;  %v7463_v20 = vld [vmem:[#allocation14 + $0xb04] ss:$28 sps:$4 sm:$0xff]  }
 0x421   :  { %v7464_v21 = vld [vmem:[#allocation14 + $0x408] ss:$28 sps:$4 sm:$0xff]  }
 0x422   :  { %5436 = vmatpush2.bf16.msra.mxu1 %v7405_v22  ;;  %v7461_v22 = vld [vmem:[#allocation14 + $0xb00] ss:$28 sps:$4 sm:$0xff]  }
 0x423   :  { %5395 = vmatpush2.bf16.msra.mxu0 %v7408_v24  ;;  %5437 = vmatprep.subr.bf16.mxu1 %v7413_v25  ;;  %v7465_v24 = vld [vmem:[#allocation14 + $0x590] ss:$28 sps:$4 sm:$0xff]  }
 0x424   :  { %5396 = vmatprep.subr.bf16.mxu0 %v7416_v52  ;;  %v7468_v52 = vld [vmem:[#allocation14 + $0xacc] ss:$28 sps:$4 sm:$0xff]  }
 0x426   :  { %5438 = vmatpush2.bf16.msra.mxu1 %v7411_v30 }
 0x427   :  { %5397 = vmatpush2.bf16.msra.mxu0 %v7414_v32  ;;  %5439 = vmatprep.subr.bf16.mxu1 %v7419_v53  ;;  %v7469_v32 = vld [vmem:[#allocation14 + $0x3d0] ss:$28 sps:$4 sm:$0xff]   ;;  %v7466_v53 = vld [vmem:[#allocation14 + $0xac8] ss:$28 sps:$4 sm:$0xff]  }
 0x428   :  { %5398 = vmatprep.subr.bf16.mxu0 %v7422_v33  ;;  %v7470_v33 = vld [vmem:[#allocation14 + $0x558] ss:$28 sps:$4 sm:$0xff]  }
 0x42a   :  { %5440 = vmatpush2.bf16.msra.mxu1 %v7417_v34  ;;  %v7473_v34 = vld [vmem:[#allocation14 + $0xa94] ss:$28 sps:$4 sm:$0xff]  }
 0x42b   :  { %5399 = vmatpush2.bf16.msra.mxu0 %v7420_v36  ;;  %5441 = vmatprep.subr.bf16.mxu1 %v7425_v38  ;;  %v7474_v36 = vld [vmem:[#allocation14 + $0x398] ss:$28 sps:$4 sm:$0xff]   ;;  %v7471_v38 = vld [vmem:[#allocation14 + $0xa90] ss:$28 sps:$4 sm:$0xff]  }
 0x42c   :  { %5400 = vmatprep.subr.bf16.mxu0 %v7428_v39  ;;  %v7475_v39 = vld [vmem:[#allocation14 + $0x360] ss:$28 sps:$4 sm:$0xff]  }
 0x42e   :  { %5442 = vmatpush2.bf16.msra.mxu1 %v7423_v40  ;;  %v7476_v40 = vld [vmem:[#allocation14 + $0xc20] ss:$28 sps:$4 sm:$0xff]  }
 0x42f   :  { %5401 = vmatpush2.bf16.msra.mxu0 %v7426_v41  ;;  %5443 = vmatprep.subr.bf16.mxu1 %v7431_v42  ;;  %v7757_v41 = vmov 0.0   ;;  %v7477_v42 = vld [vmem:[#allocation14 + $0x1a0] ss:$28 sps:$4 sm:$0xff]  }
 0x430   :  { %5402 = vmatprep.subr.bf16.mxu0 %v7434_v11  ;;  %v7478_v11 = vld [vmem:[#allocation14 + $0x328] ss:$28 sps:$4 sm:$0xff]  }
 0x432   :  { %5444 = vmatpush2.bf16.msra.mxu1 %v7429_v44 }
 0x433   :  { %5403 = vmatpush2.bf16.msra.mxu0 %v7432_v12  ;;  %6444 = vmatprep.subr.bf16.mxu1 %v7435_v46  ;;  %v7479_v12 = vld [vmem:[#allocation14 + $0xbe8] ss:$28 sps:$4 sm:$0xff]  }
 0x434   :  { %5454 = vmatprep.subr.bf16.mxu0 %v7438_v50  ;;  %v7480_v50 = vld [vmem:[#allocation14 + $0x168] ss:$28 sps:$4 sm:$0xff]  }
 0x435   :  { %5446 = vmatmul.mubr.bf16.vlgmr.msra.gmra.mxu1 %v7915_v48 }
 0x436   :  { %5405 = vmatmul.mubr.bf16.vlgmr.msra.gmra.mxu0 %v7900_v62  ;;  %6445 = vmatpush3.bf16.msra.mxu1 %v7439_v51  ;;  %v5160_v58 = vpop.f32.mrf.mxu0  ;;  %v7481_v51 = vld [vmem:[#allocation14 + $0x2f0] ss:$28 sps:$4 sm:$0xff]  }
 0x437   :  { %5567 = vmatprep.mubr.bf16.mxu1 %v7898_v59  ;;  %v5161_v63 = vadd.f32 %v5160_v58, %v5120_v55  ;;  %5455 = vmatpush1.bf16.msra.mxu0 %v7436_v35  ;;  %v7446_v59 = vld [vmem:[#allocation14 + $0xba8] ss:$28 sps:$4 sm:$0xff]   ;;  %v7484_v55 = vld [vmem:[#allocation14 + $0x2b8] ss:$28 sps:$4 sm:$0xff]  }
 0x438   :  { %v5162_v2 = vpop.f32.mrf.mxu0  ;;  %6446 = vmatprep.subr.bf16.mxu1 %v7440_v54  ;;  %5456 = vmatprep.subr.bf16.mxu0 %v7443_v37  ;;  %v7482_v54 = vld [vmem:[#allocation14 + $0xbb0] ss:$28 sps:$4 sm:$0xff]   ;;  %v7485_v58 = vld [vmem:[#allocation14 + $0xb78] ss:$28 sps:$4 sm:$0xff]  }
 0x439   :  { %v5655_v3 = vmax.f32 %v5161_v63, 0.0  ;;  %v5163_v4 = vadd.f32 %v5162_v2, %v5122_v61  ;;  %5486 = vmatprep.mubr.bf16.mxu0 %v7756_v0  ;;  %v7458_v0 = vld [vmem:[#allocation14 + $0xb3c] ss:$28 sps:$4 sm:$0xff]   ;;  %v7492_v2 = vld [vmem:[#allocation14 + $0x88] ss:$28 sps:$4 sm:$0xff]  }
 0x43a   :  { %6447 = vmatpush3.bf16.msra.mxu1 %v7444_v60  ;;  %v5164_v5 = vpop.f32.mrf.mxu0  ;;  %v7487_v60 = vld [vmem:[#allocation14 + $0x280] ss:$28 sps:$4 sm:$0xff]  }
 0x43b   :  { %7515 = vtanh.f32 %v5655_v3  ;;  %v5656_v7 = vmax.f32 %v5163_v4, 0.0  ;;  %5457 = vmatpush1.bf16.msra.mxu0 %v7441_v56  ;;  %6448 = vmatprep.subr.bf16.mxu1 %v7445_v1  ;;  %v7488_v61 = vld [vmem:[#allocation14 + $0xb40] ss:$28 sps:$4 sm:$0xff]   ;;  %v7490_v56 = vld [vmem:[#allocation14 + $0x248] ss:$28 sps:$4 sm:$0xff]  }
 0x43c   :  { %v5165_v8 = vpop.f32.mrf.mxu0  ;;  %5458 = vmatprep.subr.bf16.mxu0 %v7448_v43  ;;  %v7489_v63 = vld [vmem:[#allocation14 + $0xc0] ss:$28 sps:$4 sm:$0xff]   ;;  %v7491_v1 = vld [vmem:[#allocation14 + $0xb08] ss:$28 sps:$4 sm:$0xff]   ;;  %v7493_v43 = vld [vmem:[#allocation14 + $0x210] ss:$28 sps:$4 sm:$0xff]  }
 0x43d   :  { %7517 = vtanh.f32 %v5656_v7  ;;  %v7494_v3 = vld [vmem:[#allocation14 + $0xad0] ss:$28 sps:$4 sm:$0xff]   ;;  %v7496_v5 = vld [vmem:[#allocation14 + $0x1d8] ss:$28 sps:$4 sm:$0xff]   ;;  %v7501_v8 = vld [vmem:[#allocation14 + $0xa28] ss:$28 sps:$4 sm:$0xff]  }
 0x43e   :  { %6449 = vmatpush3.bf16.msra.mxu1 %v7449_v6  ;;  %v7495_v4 = vld [vmem:[#allocation14 + $0x50] ss:$28 sps:$4 sm:$0xff]   ;;  %v7497_v6 = vld [vmem:[#allocation14 + $0xa98] ss:$28 sps:$4 sm:$0xff]  }
 0x43f   :  { %5459 = vmatpush1.bf16.msra.mxu0 %v7446_v59  ;;  %6450 = vmatprep.subr.bf16.mxu1 %v7450_v49  ;;  %v7498_v7 = vld [vmem:[#allocation14 + $0x18] ss:$28 sps:$4 sm:$0xff]   ;;  %v7499_v59 = vld [vmem:[#allocation14 + $0xa60] ss:$28 sps:$4 sm:$0xff]  }
 0x440   :  { %5460 = vmatprep.subr.bf16.mxu0 %v7453_v10  ;;  %v7500_v49 = vld [vmem:[#allocation14 + $0x8a0] ss:$28 sps:$4 sm:$0xff]  }
 0x442   :  { %6451 = vmatpush3.bf16.msra.mxu1 %v7454_v13 }
 0x443   :  { %5461 = vmatpush1.bf16.msra.mxu0 %v7451_v14  ;;  %6452 = vmatprep.subr.bf16.mxu1 %v7455_v16  ;;  %v7502_v16 = vld [vmem:[#allocation14 + $0x868] ss:$28 sps:$4 sm:$0xff]  }
 0x444   :  { %5462 = vmatprep.subr.bf16.mxu0 %v7458_v0 }
 0x446   :  { %6453 = vmatpush3.bf16.msra.mxu1 %v7459_v17  ;;  %v7503_v17 = vld [vmem:[#allocation14 + $0x9f0] ss:$28 sps:$4 sm:$0xff]  }
 0x447   :  { %5463 = vmatpush1.bf16.msra.mxu0 %v7456_v18  ;;  %6454 = vmatprep.subr.bf16.mxu1 %v7460_v19 }
 0x448   :  { %v7516_v25 = vpop.eup %7515  ;;  %5464 = vmatprep.subr.bf16.mxu0 %v7463_v20 }
 0x449   :  { %5669 = vst [vmem:[#allocation17] sm:$0xff] %v7516_v25  ;;  %v7508_v25 = vld [vmem:[#allocation14 + $0x7c0] ss:$28 sps:$4 sm:$0xff]  }
 0x44a   :  { %v7518_v30 = vpop.eup %7517  ;;  %6455 = vmatpush3.bf16.msra.mxu1 %v7464_v21  ;;  %v7504_v21 = vld [vmem:[#allocation14 + $0x830] ss:$28 sps:$4 sm:$0xff]  }
 0x44b   :  { %5670 = vst [vmem:[#allocation17 + $0x8] sm:$0xff] %v7518_v30  ;;  %5465 = vmatpush1.bf16.msra.mxu0 %v7461_v22  ;;  %6456 = vmatprep.subr.bf16.mxu1 %v7465_v24  ;;  %v7505_v24 = vld [vmem:[#allocation14 + $0x9b8] ss:$28 sps:$4 sm:$0xff]   ;;  %v7511_v30 = vld [vmem:[#allocation14 + $0x910] ss:$28 sps:$4 sm:$0xff]  }
 0x44c   :  { %5466 = vmatprep.subr.bf16.mxu0 %v7468_v52  ;;  %v7510_v52 = vld [vmem:[#allocation14 + $0x788] ss:$28 sps:$4 sm:$0xff]  }
 0x44e   :  { %6457 = vmatpush3.bf16.msra.mxu1 %v7469_v32  ;;  %v7512_v32 = vld [vmem:[#allocation14 + $0x750] ss:$28 sps:$4 sm:$0xff]  }
 0x44f   :  { %5467 = vmatpush1.bf16.msra.mxu0 %v7466_v53  ;;  %6458 = vmatprep.subr.bf16.mxu1 %v7470_v33  ;;  %v7513_v53 = vld [vmem:[#allocation14 + $0x8d8] ss:$28 sps:$4 sm:$0xff]  }
 0x450   :  { %5468 = vmatprep.subr.bf16.mxu0 %v7473_v34  ;;  %v7514_v33 = vld [vmem:[#allocation14 + $0x718] ss:$28 sps:$4 sm:$0xff]   ;;  %v2963_v34 = vrot.slane %v7938_v23, %v7849_v29 }
 0x452   :  { %6459 = vmatpush3.bf16.msra.mxu1 %v7474_v36  ;;  %v2967_v36 = vrot.slane %v7938_v23, %v7852_v31 }
 0x453   :  { %5469 = vmatpush1.bf16.msra.mxu0 %v7471_v38  ;;  %6497 = vmatprep.subr.bf16.mxu1 %v7757_v41 }
 0x454   :  { %6422 = vmatprep.subr.bf16.mxu0 %v7475_v39 }
 0x455   :  { %v7966_v44 = vpop.f32.mrf.mxu1  ;;  %5568 = vmatmul.mubr.bf16.vlgmr.msra.gmra.mxu1 %v7900_v62  ;;  %v7483_v62 = vld [vmem:[#allocation14 + $0x130] ss:$28 sps:$4 sm:$0xff]  }
 0x456   :  { %5487 = vmatmul.mubr.bf16.vlgmr.msra.gmra.mxu0 %v7924_v26  ;;  %6498 = vmatpush3.bf16.msra.mxu1 %v7476_v40 }
 0x457   :  { %v7970_v46 = vpop.f32.mrf.mxu1  ;;  %6423 = vmatpush3.bf16.msra.mxu0 %v7477_v42  ;;  %5527 = vmatprep.mubr.bf16.mxu0 %v7886_v47  ;;  %v7486_v47 = vld [vmem:[#allocation14 + $0xf8] ss:$28 sps:$4 sm:$0xff]  }
 0x458   :  { %6499 = vmatprep.subr.bf16.mxu1 %v7757_v41  ;;  %6424 = vmatprep.subr.bf16.mxu0 %v7478_v11 }
 0x459   :  { %v5246_v35 = vpop.f32.mrf.mxu1  ;;  %6513 = vmatprep.mubr.msk.bf16.mxu1 %vm7758_vm1, %v7757_v41 }
 0x45a   :  { %6500 = vmatpush3.bf16.msra.mxu1 %v7479_v12 }
 0x45b   :  { %v5247_v37 = vpop.f32.mrf.mxu1  ;;  %6425 = vmatpush3.bf16.msra.mxu0 %v7480_v50  ;;  %6501 = vmatprep.subr.bf16.mxu1 %v7757_v41 }
 0x45c   :  { %6426 = vmatprep.subr.bf16.mxu0 %v7481_v51 }
 0x45e   :  { %6502 = vmatpush3.bf16.msra.mxu1 %v7482_v54 }
 0x45f   :  { %6427 = vmatpush3.bf16.msra.mxu0 %v7483_v62  ;;  %6503 = vmatprep.subr.bf16.mxu1 %v7757_v41 }
 0x460   :  { %6428 = vmatprep.subr.bf16.mxu0 %v7484_v55 }
 0x462   :  { %6504 = vmatpush3.bf16.msra.mxu1 %v7485_v58 }
 0x463   :  { %6429 = vmatpush3.bf16.msra.mxu0 %v7486_v47  ;;  %6505 = vmatprep.subr.bf16.mxu1 %v7757_v41 }
 0x464   :  { %6430 = vmatprep.subr.bf16.mxu0 %v7487_v60 }
 0x466   :  { %6506 = vmatpush3.bf16.msra.mxu1 %v7488_v61 }
 0x467   :  { %6431 = vmatpush3.bf16.msra.mxu0 %v7489_v63  ;;  %6507 = vmatprep.subr.bf16.mxu1 %v7757_v41 }
 0x468   :  { %6432 = vmatprep.subr.bf16.mxu0 %v7490_v56 }
 0x46a   :  { %6508 = vmatpush3.bf16.msra.mxu1 %v7491_v1 }
 0x46b   :  { %6433 = vmatpush3.bf16.msra.mxu0 %v7492_v2  ;;  %6509 = vmatprep.subr.bf16.mxu1 %v7757_v41 }
 0x46c   :  { %6434 = vmatprep.subr.bf16.mxu0 %v7493_v43 }
 0x46e   :  { %6510 = vmatpush3.bf16.msra.mxu1 %v7494_v3  ;;  %v2971_v3 = vrot.slane %v7938_v23, %v993_v27 }
 0x46f   :  { %6435 = vmatpush3.bf16.msra.mxu0 %v7495_v4  ;;  %6511 = vmatprep.subr.bf16.mxu1 %v7757_v41  ;;  %v2975_v4 = vrot.slane %v7938_v23, %v997_v28 }
 0x470   :  { %6436 = vmatprep.subr.bf16.mxu0 %v7496_v5 }
 0x472   :  { %6512 = vmatpush3.bf16.msra.mxu1 %v7497_v6 }
 0x473   :  { %6437 = vmatpush3.bf16.msra.mxu0 %v7498_v7 }
 0x474   :  { %6466 = vmatprep.subr.bf16.mxu0 %v7499_v59 }
 0x475   :  { %v5324_v10 = vpop.f32.mrf.mxu1  ;;  %6514 = vmatmul.mubr.bf16.vlgmr.msra.gmra.mxu1 %v7924_v26  ;;  %v7506_v26 = vld [vmem:[#allocation14 + $0x7f8] ss:$28 sps:$4 sm:$0xff]  }
 0x476   :  { %v5201_v13 = vpop.f32.mrf.mxu0  ;;  %5528 = vmatmul.mubr.bf16.vlgmr.msra.gmra.mxu0 %v7891_v15  ;;  %v7507_v15 = vld [vmem:[#allocation14 + $0x980] ss:$28 sps:$4 sm:$0xff]  }
 0x477   :  { %v5326_v14 = vpop.f32.mrf.mxu1  ;;  %6467 = vmatpush3.bf16.msra.mxu0 %v7500_v49  ;;  %5607 = vmatprep.mubr.bf16.mxu0 %v7913_v45  ;;  %v7509_v45 = vld [vmem:[#allocation14 + $0x948] ss:$28 sps:$4 sm:$0xff]   ;;  %v5202_v38 = vadd.f32 %v5201_v13, %v2963_v34 }
 0x478   :  { %v5203_v0 = vpop.f32.mrf.mxu0  ;;  %6468 = vmatprep.subr.bf16.mxu0 %v7501_v8 }
 0x479   :  { %v5328_v18 = vpop.f32.mrf.mxu1  ;;  %v5204_v39 = vadd.f32 %v5203_v0, %v2967_v36  ;;  %v5243_v41 = vadd.f32 %v7966_v44, %v5202_v38 }
 0x47a   :  { %v5205_v19 = vpop.f32.mrf.mxu0 }
 0x47b   :  { %v5329_v20 = vpop.f32.mrf.mxu1  ;;  %6469 = vmatpush3.bf16.msra.mxu0 %v7502_v16  ;;  %v5245_v50 = vadd.f32 %v7970_v46, %v5204_v39 }
 0x47c   :  { %v5206_v22 = vpop.f32.mrf.mxu0  ;;  %6470 = vmatprep.subr.bf16.mxu0 %v7503_v17 }
 0x47f   :  { %6471 = vmatpush3.bf16.msra.mxu0 %v7504_v21 }
 0x480   :  { %6472 = vmatprep.subr.bf16.mxu0 %v7505_v24 }
 0x483   :  { %6473 = vmatpush3.bf16.msra.mxu0 %v7506_v26 }
 0x484   :  { %6474 = vmatprep.subr.bf16.mxu0 %v7507_v15 }
 0x487   :  { %6475 = vmatpush3.bf16.msra.mxu0 %v7508_v25 }
 0x488   :  { %6476 = vmatprep.subr.bf16.mxu0 %v7509_v45 }
 0x48b   :  { %6477 = vmatpush3.bf16.msra.mxu0 %v7510_v52 }
 0x48c   :  { %6478 = vmatprep.subr.bf16.mxu0 %v7511_v30 }
 0x48f   :  { %6479 = vmatpush3.bf16.msra.mxu0 %v7512_v32 }
 0x490   :  { %6480 = vmatprep.subr.bf16.mxu0 %v7513_v53 }
 0x493   :  { %6481 = vmatpush3.bf16.msra.mxu0 %v7514_v33  ;;  %v2979_v33 = vrot.slane %v7938_v23, %v1001_v57 }
 0x496   :  { %5608 = vmatmul.mubr.bf16.vlgmr.msra.gmra.mxu0 %v7915_v48 }
 0x4b5   :  { %v5365_v40 = vpop.f32.mrf.mxu1 }
 0x4b6   :  { %v5283_v42 = vpop.f32.mrf.mxu0  ;;  %v5366_v5 = vadd.f32 %v5365_v40, %v2971_v3 }
 0x4b7   :  { %v5284_v11 = vadd.f32 %v5283_v42, %v5243_v41  ;;  %v5367_v12 = vpop.f32.mrf.mxu1 }
 0x4b8   :  { %v5285_v51 = vpop.f32.mrf.mxu0  ;;  %v5368_v6 = vadd.f32 %v5367_v12, %v2975_v4 }
 0x4b9   :  { %v5325_v35 = vadd.f32 %v5324_v10, %v5284_v11  ;;  %v5286_v54 = vadd.f32 %v5285_v51, %v5245_v50  ;;  %v5369_v48 = vpop.f32.mrf.mxu1 }
 0x4ba   :  { %v5287_v37 = vpop.f32.mrf.mxu0 }
 0x4bb   :  { %v5657_v62 = vmax.f32 %v5325_v35, 0.0  ;;  %v5327_v29 = vadd.f32 %v5326_v14, %v5286_v54  ;;  %v5370_v55 = vpop.f32.mrf.mxu1 }
 0x4bc   :  { %v5288_v58 = vpop.f32.mrf.mxu0 }
 0x4bd   :  { %7519 = vtanh.f32 %v5657_v62  ;;  %v5658_v31 = vmax.f32 %v5327_v29, 0.0 }
 0x4bf   :  { %7521 = vtanh.f32 %v5658_v31 }
 0x4ca   :  { %v7520_v47 = vpop.eup %7519 }
 0x4cb   :  { %5671 = vst [vmem:[#allocation17 + $0x10] sm:$0xff] %v7520_v47 }
 0x4cc   :  { %v7522_v44 = vpop.eup %7521 }
 0x4cd   :  { %5672 = vst [vmem:[#allocation17 + $0x18] sm:$0xff] %v7522_v44 }
 0x4f5   :  { %v5447_v60 = vpop.f32.mrf.mxu1 }
 0x4f6   :  { %v5406_v61 = vpop.f32.mrf.mxu0 }
 0x4f7   :  { %v5449_v63 = vpop.f32.mrf.mxu1  ;;  %v5407_v7 = vadd.f32 %v5406_v61, %v5366_v5 }
 0x4f8   :  { %v5408_v46 = vpop.f32.mrf.mxu0 }
 0x4f9   :  { %v5451_v56 = vpop.f32.mrf.mxu1  ;;  %v5409_v59 = vadd.f32 %v5408_v46, %v5368_v6  ;;  %v5448_v8 = vadd.f32 %v5447_v60, %v5407_v7 }
 0x4fa   :  { %v5410_v1 = vpop.f32.mrf.mxu0 }
 0x4fb   :  { %v5452_v2 = vpop.f32.mrf.mxu1  ;;  %v5450_v16 = vadd.f32 %v5449_v63, %v5409_v59 }
 0x4fc   :  { %v5411_v43 = vpop.f32.mrf.mxu0 }
 0x515   :  { %v6460_v49 = vpop.f32.mrf.mxu1 }
 0x516   :  { %v5488_v10 = vpop.f32.mrf.mxu0 }
 0x517   :  { %v5489_v13 = vadd.f32 %v5488_v10, %v5448_v8  ;;  %v6461_v14 = vpop.f32.mrf.mxu1 }
 0x518   :  { %v5490_v0 = vpop.f32.mrf.mxu0  ;;  %v6462_v39 = vadd.f32 %v6461_v14, %v6460_v49 }
 0x519   :  { %v5659_v17 = vmax.f32 %v5489_v13, 0.0  ;;  %v5491_v18 = vadd.f32 %v5490_v0, %v5450_v16  ;;  %v6463_v19 = vpop.f32.mrf.mxu1 }
 0x51a   :  { %v5492_v20 = vpop.f32.mrf.mxu0 }
 0x51b   :  { %7523 = vtanh.f32 %v5659_v17  ;;  %v5660_v27 = vmax.f32 %v5491_v18, 0.0  ;;  %v6464_v21 = vpop.f32.mrf.mxu1 }
 0x51c   :  { %v5493_v22 = vpop.f32.mrf.mxu0 }
 0x51d   :  { %7525 = vtanh.f32 %v5660_v27 }
 0x528   :  { %v7524_v28 = vpop.eup %7523 }
 0x529   :  { %5673 = vst [vmem:[#allocation17 + $0x20] sm:$0xff] %v7524_v28 }
 0x52a   :  { %v7526_v24 = vpop.eup %7525 }
 0x52b   :  { %5674 = vst [vmem:[#allocation17 + $0x28] sm:$0xff] %v7526_v24 }
 0x535   :  { %v5649_v26 = vpop.f32.mrf.mxu1 }
 0x536   :  { %v6438_v15 = vpop.f32.mrf.mxu0 }
 0x537   :  { %v6515_v25 = vpop.f32.mrf.mxu1 }
 0x538   :  { %v6439_v45 = vpop.f32.mrf.mxu0 }
 0x539   :  { %v5652_v52 = vpop.f32.mrf.mxu1  ;;  %v6440_v34 = vadd.f32 %v6439_v45, %v6438_v15 }
 0x53a   :  { %v6441_v30 = vpop.f32.mrf.mxu0 }
 0x53b   :  { %v6516_v32 = vpop.f32.mrf.mxu1  ;;  %v5530_v36 = vadd.f32 %v6440_v34, %v2979_v33 }
 0x53c   :  { %v6442_v53 = vpop.f32.mrf.mxu0 }
 0x53d   :  { %v5570_v41 = vadd.f32 %v6462_v39, %v5530_v36 }
 0x556   :  { %v6482_v38 = vpop.f32.mrf.mxu0 }
 0x558   :  { %v6483_v40 = vpop.f32.mrf.mxu0 }
 0x559   :  { %v6484_v42 = vadd.f32 %v6483_v40, %v6482_v38 }
 0x55a   :  { %v6485_v11 = vpop.f32.mrf.mxu0 }
 0x55b   :  { %v5610_v12 = vadd.f32 %v6484_v42, %v5570_v41 }
 0x55c   :  { %v6486_v50 = vpop.f32.mrf.mxu0 }
 0x55d   :  { %v5650_v51 = vadd.f32 %v5649_v26, %v5610_v12 }
 0x55f   :  { %v5661_v35 = vmax.f32 %v5650_v51, 0.0 }
 0x561   :  { %7527 = vtanh.f32 %v5661_v35 }
 0x56e   :  { %v7528_v54 = vpop.eup %7527 }
 0x56f   :  { %5675 = vst [vmem:[#allocation17 + $0x30] sm:$0xff] %v7528_v54 }
 0x570   :  { %7720 = shalt.err (!%p7717_p7)
}
 0x571   :  { %5685 = dma.vmem_to_hbm [thread:$0]  %s5683_s8, 896, %s8004_s9, [#allocation4]  }
 0x572   :  { %7739 = dma.done.wait [#allocation4], 896  }
 0x573   :  { %7740 = vsyncadd [#allocation4], 4294966400 }
 0x574   :  { %5689 = vsyncpa [#allocation3], 1 }
 0x575   :  { %5690 = vsyncpa [#allocation6], 1 }
 0x576   :  { %5691 = vsyncpa [#allocation9], 1 }
 0x577   :  { %5692 = vsyncpa [#allocation12], 1 }
 0x578   :  { %5693 = vsyncpa [#allocation15], 1 }
 0x579   :  { %5694 = vsyncpa [#allocation4], 1 }

</bundles_post_ra>
